<compile_context>
chip_gen: v6e
topology: v6e:2x2x1
jax: 0.10.0
libtpu: 0.0.40
codegen_flags: <defaults>
</compile_context>

<pallas_src>
import functools

import jax
import jax.numpy as jnp
import numpy as np
from jax import lax
from jax.experimental import pallas as pl
from jax.experimental.pallas import tpu as pltpu

KS = 7            # spatial-attention conv kernel size
PAD = KS // 2     # = 3


def cbam_kernel(x_ref, w1t_ref, b1_ref, w2t_ref, b2_ref, convw_ref, convb_ref,
                colmask_ref, o_ref, pad_ref, *, W, HW):
    # x_ref/o_ref : (bb, C, HWL)   HWL = H*W lane-padded to a multiple of 128
    # w1t (C, hid), b1 (1, hid), w2t (hid, C), b2 (1, C)        [VMEM]
    # convw (2*KS*KS,), convb (1,)                              [SMEM]
    # colmask (KS, HWL) f32 0/1 horizontal-validity masks       [VMEM]
    # pad_ref (2, bb, HWL + 2*OFF) VMEM scratch for the flat-shift conv.
    bb, C, HWL = x_ref.shape
    OFF = PAD * W + PAD
    inv_hw = 1.0 / float(HW)
    inv_c = 1.0 / float(C)

    # --- hoisted scalar reads: all 98 conv weights + bias, once per grid step.
    wvals = [convw_ref[i] for i in range(2 * KS * KS)]
    conv_bias = convb_ref[0]

    # --- re-zero only the OFF-wide borders of the conv scratch.  The interior
    # is fully overwritten every step; re-zeroing every step keeps this correct
    # when the batch axis is sharded across TensorCores (scratch is per-core).
    zeros_border = jnp.zeros((2, bb, OFF), jnp.float32)
    pad_ref[:, :, pl.ds(0, OFF)] = zeros_border
    pad_ref[:, :, pl.ds(OFF + HWL, OFF)] = zeros_border

    # ---------------- Channel attention (batched over bb) ----------------
    avg_pool = jnp.sum(x_ref[...], axis=2) * inv_hw            # (bb, C)
    if HWL != HW:   # lane padding present: mask padded lanes out of the max
        lane_ok = lax.broadcasted_iota(jnp.int32, (1, 1, HWL), 2) < HW
        max_pool = jnp.max(jnp.where(lane_ok, x_ref[...], -jnp.inf), axis=2)
    else:
        max_pool = jnp.max(x_ref[...], axis=2)                 # (bb, C)

    pooled = jnp.concatenate([avg_pool, max_pool], axis=0)     # (2*bb, C)
    if C >= 128:
        # Production-sized C: one MXU pass for both pooled vectors.
        h = jnp.maximum(
            jnp.dot(pooled, w1t_ref[...], preferred_element_type=jnp.float32)
            + b1_ref[...], 0.0)                                # (2*bb, hid)
        z = jnp.dot(h, w2t_ref[...],
                    preferred_element_type=jnp.float32) + b2_ref[...]
    else:
        # Small C (demo): broadcast-multiply + reductions on the VPU/XLU.
        h = jnp.maximum(
            jnp.sum(pooled[:, :, None] * w1t_ref[...][None, :, :], axis=1)
            + b1_ref[...], 0.0)                                # (2*bb, hid)
        z = (jnp.sum(h[:, :, None] * w2t_ref[...][None, :, :], axis=1)
             + b2_ref[...])                                    # (2*bb, C)
    ca = jax.nn.sigmoid(z[:bb] + z[bb:])                       # (bb, C)

    # Stage xc through the output block (bounds vreg pressure; the spatial path
    # below re-reads it from VMEM instead of keeping it live through the conv).
    o_ref[...] = x_ref[...] * ca[:, :, None]                   # (bb, C, HWL)

    # ---------------- Spatial attention (batched over bb) ----------------
    avg_map = jnp.sum(o_ref[...], axis=1) * inv_c              # (bb, HWL)
    max_map = jnp.max(o_ref[...], axis=1)                      # (bb, HWL)
    pad_ref[0, :, pl.ds(OFF, HWL)] = avg_map
    pad_ref[1, :, pl.ds(OFF, HWL)] = max_map

    # 7x7 "same" conv (2 -> 1 channels) on the flattened maps.  Vertical
    # out-of-range taps fall into the zero borders; horizontal out-of-range is
    # removed by the per-kw column masks.  Lane-padded positions compute junk
    # that is multiplied by the zero padded lanes of o_ref (never reaches out).
    slabs = (pad_ref[0], pad_ref[1])                           # (bb, HWL+2*OFF)
    acc = jnp.zeros((bb, HWL), jnp.float32)
    for kw in range(KS):
        parts = []
        for c in range(2):
            p = jnp.zeros((bb, HWL), jnp.float32)
            for kh in range(KS):
                start = kh * W + kw
                p = p + (wvals[c * KS * KS + kh * KS + kw]
                         * slabs[c][:, start:start + HWL])
            parts.append(p)
        acc = acc + colmask_ref[kw:kw + 1, :] * (parts[0] + parts[1])
    sa = jax.nn.sigmoid(acc + conv_bias)                       # (bb, HWL)

    o_ref[...] = o_ref[...] * sa[:, None, :]


def _vmem_capacity_bytes():
    try:
        return int(pltpu.get_tpu_info().vmem_capacity_bytes)
    except Exception:
        return 64 << 20      # conservative default (v7x per-TensorCore VMEM)


def _pick_batch_block(B, C, HWL, vmem_bytes):
    """Images per grid step.  HBM-bound kernel -> biggest block that leaves
    comfortable double-buffering headroom in VMEM, while keeping >= 2 grid
    steps when possible so both v7x TensorCores get work."""
    bytes_per_image = C * HWL * 4
    cap = (6 << 20) if vmem_bytes <= (64 << 20) else (16 << 20)
    bb = max(1, cap // bytes_per_image)
    if B >= 2:
        bb = min(bb, (B + 1) // 2)        # leave >= 2 grid steps
    bb = min(bb, B)
    if bb >= 8:                            # sublane-dense spatial maps
        bb = (bb // 8) * 8
    return max(int(bb), 1)


def cbam_pallas(x, w1, b1, w2, b2, convw, convb):
    """x: (B, C, H, W) f32.  w1: (hid, C), b1: (hid,), w2: (C, hid), b2: (C,),
    convw: (1, 2, KS, KS), convb: (1,)."""
    B, C, H, W = x.shape
    hid = w1.shape[0]
    HW = H * W
    HWL = ((HW + 127) // 128) * 128       # lane-pad H*W to a multiple of 128
    OFF = PAD * W + PAD
    HWP = HWL + 2 * OFF

    vmem_bytes = _vmem_capacity_bytes()
    bb = _pick_batch_block(B, C, HWL, vmem_bytes)
    n_blocks = int(pl.cdiv(B, bb))
    B_pad = n_blocks * bb

    # Layout glue (plain JAX).  Zero-pad the lane dim (HW -> HWL) and the batch
    # (B -> B_pad); padded lanes/images are all-zero and are sliced off below.
    x2 = x.reshape(B, C, HW)
    if HWL != HW:
        x2 = jnp.pad(x2, ((0, 0), (0, 0), (0, HWL - HW)))
    if B_pad != B:
        x2 = jnp.pad(x2, ((0, B_pad - B), (0, 0), (0, 0)))

    w1t = w1.T                        # (C, hid)
    b1r = b1.reshape(1, hid)
    w2t = w2.T                        # (hid, C)
    b2r = b2.reshape(1, C)
    convw_flat = convw.reshape(-1)    # (2*KS*KS,)

    # Per-kw horizontal-validity masks for the flattened 7x7 "same" conv
    # (precomputed with numpy; lane-padded positions are masked out too).
    pos = np.arange(HWL)
    cols = pos % W
    valid = pos < HW
    colmask = np.stack(
        [((cols + (kw - PAD) >= 0) & (cols + (kw - PAD) < W) & valid)
         for kw in range(KS)]).astype(np.float32)              # (KS, HWL)
    colmask = jnp.asarray(colmask)

    block_bytes = bb * C * HWL * 4
    scratch_bytes = 2 * bb * HWP * 4
    vmem_limit = int(min(
        max(5 * block_bytes + scratch_bytes + (4 << 20), 16 << 20),
        vmem_bytes * 3 // 4))

    out2 = pl.pallas_call(
        functools.partial(cbam_kernel, W=W, HW=HW),
        out_shape=jax.ShapeDtypeStruct((B_pad, C, HWL), jnp.float32),
        grid=(B_pad // bb,),
        in_specs=[
            pl.BlockSpec((bb, C, HWL), lambda b: (b, 0, 0)),
            pl.BlockSpec((C, hid), lambda b: (0, 0)),
            pl.BlockSpec((1, hid), lambda b: (0, 0)),
            pl.BlockSpec((hid, C), lambda b: (0, 0)),
            pl.BlockSpec((1, C), lambda b: (0, 0)),
            pl.BlockSpec(memory_space=pltpu.MemorySpace.SMEM),
            pl.BlockSpec(memory_space=pltpu.MemorySpace.SMEM),
            pl.BlockSpec((KS, HWL), lambda b: (0, 0)),
        ],
        out_specs=pl.BlockSpec((bb, C, HWL), lambda b: (b, 0, 0)),
        scratch_shapes=[pltpu.VMEM((2, bb, HWP), jnp.float32)],
        compiler_params=pltpu.CompilerParams(
            dimension_semantics=("parallel",),
            vmem_limit_bytes=vmem_limit),
    )(x2, w1t, b1r, w2t, b2r, convw_flat, convb, colmask)

    return out2[:B, :, :HW].reshape(B, C, H, W)


def cbam_ref(x, w1, b1, w2, b2, convw, convb):
    """Pure-JAX reference mirroring the PyTorch module."""
    avg = x.mean(axis=(2, 3))                                # (B, C)
    mx = x.max(axis=(2, 3))                                  # (B, C)

    def fc(v):
        return jnp.maximum(v @ w1.T + b1, 0.0) @ w2.T + b2

    ca = jax.nn.sigmoid(fc(avg) + fc(mx))                    # (B, C)
    xc = x * ca[:, :, None, None]

    avg_map = xc.mean(axis=1, keepdims=True)
    max_map = xc.max(axis=1, keepdims=True)
    sp = jnp.concatenate([avg_map, max_map], axis=1)         # (B, 2, H, W)
    conv = lax.conv_general_dilated(
        sp, convw, window_strides=(1, 1), padding=((PAD, PAD), (PAD, PAD)),
        dimension_numbers=("NCHW", "OIHW", "NCHW"))
    sa = jax.nn.sigmoid(conv + convb.reshape(1, 1, 1, 1))
    return xc * sa


if __name__ == "__main__":
    # C must be >= reduction_ratio (=16) for the PyTorch module to be well-formed.
    # B=5 deliberately exercises the batched body (bb=3) and the ragged-batch pad.
    B, C, H, W = 5, 32, 16, 16
    reduction_ratio = 16
    hid = C // reduction_ratio

    key = jax.random.PRNGKey(0)
    ks = jax.random.split(key, 7)
    x = jax.random.normal(ks[0], (B, C, H, W), jnp.float32)
    w1 = jax.random.normal(ks[1], (hid, C), jnp.float32) * 0.2
    b1 = jax.random.normal(ks[2], (hid,), jnp.float32) * 0.1
    w2 = jax.random.normal(ks[3], (C, hid), jnp.float32) * 0.2
    b2 = jax.random.normal(ks[4], (C,), jnp.float32) * 0.1
    convw = jax.random.normal(ks[5], (1, 2, KS, KS), jnp.float32) * 0.1
    convb = jax.random.normal(ks[6], (1,), jnp.float32) * 0.1

    out = jax.block_until_ready(cbam_pallas(x, w1, b1, w2, b2, convw, convb))
    ref = jax.block_until_ready(cbam_ref(x, w1, b1, w2, b2, convw, convb))

    assert out.shape == (B, C, H, W)
    np.testing.assert_allclose(np.asarray(out), np.asarray(ref), rtol=1e-4, atol=1e-4)
    print("KERNEL_OK")
</pallas_src>

<mosaic_0001>
module attributes {stable_mosaic.version = 11 : i64} {
  func.func @cbam_kernel(%arg0: i32, %arg1: memref<3x32x256xf32, #tpu.memory_space<vmem>>, %arg2: memref<32x2xf32, #tpu.memory_space<vmem>>, %arg3: memref<1x2xf32, #tpu.memory_space<vmem>>, %arg4: memref<2x32xf32, #tpu.memory_space<vmem>>, %arg5: memref<1x32xf32, #tpu.memory_space<vmem>>, %arg6: memref<98xf32, #tpu.memory_space<smem>>, %arg7: memref<1xf32, #tpu.memory_space<smem>>, %arg8: memref<7x256xf32, #tpu.memory_space<vmem>>, %arg9: memref<3x32x256xf32, #tpu.memory_space<vmem>>, %arg10: memref<2x3x358xf32, #tpu.memory_space<vmem>>) attributes {dimension_semantics = [#tpu.dimension_semantics<parallel>], iteration_bounds = array<i64: 2>, scalar_prefetch = 0 : i64, scratch_operands = 1 : i64, tpu.core_type = #tpu.core_type<tc>, window_params = [{transform_indices = @transform_0, window_bounds = array<i64: 3, 32, 256>}, {pipeline_mode = #tpu.pipeline_mode<synchronous>, transform_indices = @transform_1, window_bounds = array<i64: 32, 2>}, {pipeline_mode = #tpu.pipeline_mode<synchronous>, transform_indices = @transform_2, window_bounds = array<i64: 1, 2>}, {pipeline_mode = #tpu.pipeline_mode<synchronous>, transform_indices = @transform_3, window_bounds = array<i64: 2, 32>}, {pipeline_mode = #tpu.pipeline_mode<synchronous>, transform_indices = @transform_4, window_bounds = array<i64: 1, 32>}, {transform_indices = @transform_5, window_bounds = array<i64: 98>}, {transform_indices = @transform_6, window_bounds = array<i64: 1>}, {pipeline_mode = #tpu.pipeline_mode<synchronous>, transform_indices = @transform_7, window_bounds = array<i64: 7, 256>}, {transform_indices = @transform_8, window_bounds = array<i64: 3, 32, 256>}]} {
    %c0 = arith.constant 0 : index
    %0 = memref.load %arg6[%c0] : memref<98xf32, #tpu.memory_space<smem>>
    %c1 = arith.constant 1 : index
    %1 = memref.load %arg6[%c1] : memref<98xf32, #tpu.memory_space<smem>>
    %c2 = arith.constant 2 : index
    %2 = memref.load %arg6[%c2] : memref<98xf32, #tpu.memory_space<smem>>
    %c3 = arith.constant 3 : index
    %3 = memref.load %arg6[%c3] : memref<98xf32, #tpu.memory_space<smem>>
    %c4 = arith.constant 4 : index
    %4 = memref.load %arg6[%c4] : memref<98xf32, #tpu.memory_space<smem>>
    %c5 = arith.constant 5 : index
    %5 = memref.load %arg6[%c5] : memref<98xf32, #tpu.memory_space<smem>>
    %c6 = arith.constant 6 : index
    %6 = memref.load %arg6[%c6] : memref<98xf32, #tpu.memory_space<smem>>
    %c7 = arith.constant 7 : index
    %7 = memref.load %arg6[%c7] : memref<98xf32, #tpu.memory_space<smem>>
    %c8 = arith.constant 8 : index
    %8 = memref.load %arg6[%c8] : memref<98xf32, #tpu.memory_space<smem>>
    %c9 = arith.constant 9 : index
    %9 = memref.load %arg6[%c9] : memref<98xf32, #tpu.memory_space<smem>>
    %c10 = arith.constant 10 : index
    %10 = memref.load %arg6[%c10] : memref<98xf32, #tpu.memory_space<smem>>
    %c11 = arith.constant 11 : index
    %11 = memref.load %arg6[%c11] : memref<98xf32, #tpu.memory_space<smem>>
    %c12 = arith.constant 12 : index
    %12 = memref.load %arg6[%c12] : memref<98xf32, #tpu.memory_space<smem>>
    %c13 = arith.constant 13 : index
    %13 = memref.load %arg6[%c13] : memref<98xf32, #tpu.memory_space<smem>>
    %c14 = arith.constant 14 : index
    %14 = memref.load %arg6[%c14] : memref<98xf32, #tpu.memory_space<smem>>
    %c15 = arith.constant 15 : index
    %15 = memref.load %arg6[%c15] : memref<98xf32, #tpu.memory_space<smem>>
    %c16 = arith.constant 16 : index
    %16 = memref.load %arg6[%c16] : memref<98xf32, #tpu.memory_space<smem>>
    %c17 = arith.constant 17 : index
    %17 = memref.load %arg6[%c17] : memref<98xf32, #tpu.memory_space<smem>>
    %c18 = arith.constant 18 : index
    %18 = memref.load %arg6[%c18] : memref<98xf32, #tpu.memory_space<smem>>
    %c19 = arith.constant 19 : index
    %19 = memref.load %arg6[%c19] : memref<98xf32, #tpu.memory_space<smem>>
    %c20 = arith.constant 20 : index
    %20 = memref.load %arg6[%c20] : memref<98xf32, #tpu.memory_space<smem>>
    %c21 = arith.constant 21 : index
    %21 = memref.load %arg6[%c21] : memref<98xf32, #tpu.memory_space<smem>>
    %c22 = arith.constant 22 : index
    %22 = memref.load %arg6[%c22] : memref<98xf32, #tpu.memory_space<smem>>
    %c23 = arith.constant 23 : index
    %23 = memref.load %arg6[%c23] : memref<98xf32, #tpu.memory_space<smem>>
    %c24 = arith.constant 24 : index
    %24 = memref.load %arg6[%c24] : memref<98xf32, #tpu.memory_space<smem>>
    %c25 = arith.constant 25 : index
    %25 = memref.load %arg6[%c25] : memref<98xf32, #tpu.memory_space<smem>>
    %c26 = arith.constant 26 : index
    %26 = memref.load %arg6[%c26] : memref<98xf32, #tpu.memory_space<smem>>
    %c27 = arith.constant 27 : index
    %27 = memref.load %arg6[%c27] : memref<98xf32, #tpu.memory_space<smem>>
    %c28 = arith.constant 28 : index
    %28 = memref.load %arg6[%c28] : memref<98xf32, #tpu.memory_space<smem>>
    %c29 = arith.constant 29 : index
    %29 = memref.load %arg6[%c29] : memref<98xf32, #tpu.memory_space<smem>>
    %c30 = arith.constant 30 : index
    %30 = memref.load %arg6[%c30] : memref<98xf32, #tpu.memory_space<smem>>
    %c31 = arith.constant 31 : index
    %31 = memref.load %arg6[%c31] : memref<98xf32, #tpu.memory_space<smem>>
    %c32 = arith.constant 32 : index
    %32 = memref.load %arg6[%c32] : memref<98xf32, #tpu.memory_space<smem>>
    %c33 = arith.constant 33 : index
    %33 = memref.load %arg6[%c33] : memref<98xf32, #tpu.memory_space<smem>>
    %c34 = arith.constant 34 : index
    %34 = memref.load %arg6[%c34] : memref<98xf32, #tpu.memory_space<smem>>
    %c35 = arith.constant 35 : index
    %35 = memref.load %arg6[%c35] : memref<98xf32, #tpu.memory_space<smem>>
    %c36 = arith.constant 36 : index
    %36 = memref.load %arg6[%c36] : memref<98xf32, #tpu.memory_space<smem>>
    %c37 = arith.constant 37 : index
    %37 = memref.load %arg6[%c37] : memref<98xf32, #tpu.memory_space<smem>>
    %c38 = arith.constant 38 : index
    %38 = memref.load %arg6[%c38] : memref<98xf32, #tpu.memory_space<smem>>
    %c39 = arith.constant 39 : index
    %39 = memref.load %arg6[%c39] : memref<98xf32, #tpu.memory_space<smem>>
    %c40 = arith.constant 40 : index
    %40 = memref.load %arg6[%c40] : memref<98xf32, #tpu.memory_space<smem>>
    %c41 = arith.constant 41 : index
    %41 = memref.load %arg6[%c41] : memref<98xf32, #tpu.memory_space<smem>>
    %c42 = arith.constant 42 : index
    %42 = memref.load %arg6[%c42] : memref<98xf32, #tpu.memory_space<smem>>
    %c43 = arith.constant 43 : index
    %43 = memref.load %arg6[%c43] : memref<98xf32, #tpu.memory_space<smem>>
    %c44 = arith.constant 44 : index
    %44 = memref.load %arg6[%c44] : memref<98xf32, #tpu.memory_space<smem>>
    %c45 = arith.constant 45 : index
    %45 = memref.load %arg6[%c45] : memref<98xf32, #tpu.memory_space<smem>>
    %c46 = arith.constant 46 : index
    %46 = memref.load %arg6[%c46] : memref<98xf32, #tpu.memory_space<smem>>
    %c47 = arith.constant 47 : index
    %47 = memref.load %arg6[%c47] : memref<98xf32, #tpu.memory_space<smem>>
    %c48 = arith.constant 48 : index
    %48 = memref.load %arg6[%c48] : memref<98xf32, #tpu.memory_space<smem>>
    %c49 = arith.constant 49 : index
    %49 = memref.load %arg6[%c49] : memref<98xf32, #tpu.memory_space<smem>>
    %c50 = arith.constant 50 : index
    %50 = memref.load %arg6[%c50] : memref<98xf32, #tpu.memory_space<smem>>
    %c51 = arith.constant 51 : index
    %51 = memref.load %arg6[%c51] : memref<98xf32, #tpu.memory_space<smem>>
    %c52 = arith.constant 52 : index
    %52 = memref.load %arg6[%c52] : memref<98xf32, #tpu.memory_space<smem>>
    %c53 = arith.constant 53 : index
    %53 = memref.load %arg6[%c53] : memref<98xf32, #tpu.memory_space<smem>>
    %c54 = arith.constant 54 : index
    %54 = memref.load %arg6[%c54] : memref<98xf32, #tpu.memory_space<smem>>
    %c55 = arith.constant 55 : index
    %55 = memref.load %arg6[%c55] : memref<98xf32, #tpu.memory_space<smem>>
    %c56 = arith.constant 56 : index
    %56 = memref.load %arg6[%c56] : memref<98xf32, #tpu.memory_space<smem>>
    %c57 = arith.constant 57 : index
    %57 = memref.load %arg6[%c57] : memref<98xf32, #tpu.memory_space<smem>>
    %c58 = arith.constant 58 : index
    %58 = memref.load %arg6[%c58] : memref<98xf32, #tpu.memory_space<smem>>
    %c59 = arith.constant 59 : index
    %59 = memref.load %arg6[%c59] : memref<98xf32, #tpu.memory_space<smem>>
    %c60 = arith.constant 60 : index
    %60 = memref.load %arg6[%c60] : memref<98xf32, #tpu.memory_space<smem>>
    %c61 = arith.constant 61 : index
    %61 = memref.load %arg6[%c61] : memref<98xf32, #tpu.memory_space<smem>>
    %c62 = arith.constant 62 : index
    %62 = memref.load %arg6[%c62] : memref<98xf32, #tpu.memory_space<smem>>
    %c63 = arith.constant 63 : index
    %63 = memref.load %arg6[%c63] : memref<98xf32, #tpu.memory_space<smem>>
    %c64 = arith.constant 64 : index
    %64 = memref.load %arg6[%c64] : memref<98xf32, #tpu.memory_space<smem>>
    %c65 = arith.constant 65 : index
    %65 = memref.load %arg6[%c65] : memref<98xf32, #tpu.memory_space<smem>>
    %c66 = arith.constant 66 : index
    %66 = memref.load %arg6[%c66] : memref<98xf32, #tpu.memory_space<smem>>
    %c67 = arith.constant 67 : index
    %67 = memref.load %arg6[%c67] : memref<98xf32, #tpu.memory_space<smem>>
    %c68 = arith.constant 68 : index
    %68 = memref.load %arg6[%c68] : memref<98xf32, #tpu.memory_space<smem>>
    %c69 = arith.constant 69 : index
    %69 = memref.load %arg6[%c69] : memref<98xf32, #tpu.memory_space<smem>>
    %c70 = arith.constant 70 : index
    %70 = memref.load %arg6[%c70] : memref<98xf32, #tpu.memory_space<smem>>
    %c71 = arith.constant 71 : index
    %71 = memref.load %arg6[%c71] : memref<98xf32, #tpu.memory_space<smem>>
    %c72 = arith.constant 72 : index
    %72 = memref.load %arg6[%c72] : memref<98xf32, #tpu.memory_space<smem>>
    %c73 = arith.constant 73 : index
    %73 = memref.load %arg6[%c73] : memref<98xf32, #tpu.memory_space<smem>>
    %c74 = arith.constant 74 : index
    %74 = memref.load %arg6[%c74] : memref<98xf32, #tpu.memory_space<smem>>
    %c75 = arith.constant 75 : index
    %75 = memref.load %arg6[%c75] : memref<98xf32, #tpu.memory_space<smem>>
    %c76 = arith.constant 76 : index
    %76 = memref.load %arg6[%c76] : memref<98xf32, #tpu.memory_space<smem>>
    %c77 = arith.constant 77 : index
    %77 = memref.load %arg6[%c77] : memref<98xf32, #tpu.memory_space<smem>>
    %c78 = arith.constant 78 : index
    %78 = memref.load %arg6[%c78] : memref<98xf32, #tpu.memory_space<smem>>
    %c79 = arith.constant 79 : index
    %79 = memref.load %arg6[%c79] : memref<98xf32, #tpu.memory_space<smem>>
    %c80 = arith.constant 80 : index
    %80 = memref.load %arg6[%c80] : memref<98xf32, #tpu.memory_space<smem>>
    %c81 = arith.constant 81 : index
    %81 = memref.load %arg6[%c81] : memref<98xf32, #tpu.memory_space<smem>>
    %c82 = arith.constant 82 : index
    %82 = memref.load %arg6[%c82] : memref<98xf32, #tpu.memory_space<smem>>
    %c83 = arith.constant 83 : index
    %83 = memref.load %arg6[%c83] : memref<98xf32, #tpu.memory_space<smem>>
    %c84 = arith.constant 84 : index
    %84 = memref.load %arg6[%c84] : memref<98xf32, #tpu.memory_space<smem>>
    %c85 = arith.constant 85 : index
    %85 = memref.load %arg6[%c85] : memref<98xf32, #tpu.memory_space<smem>>
    %c86 = arith.constant 86 : index
    %86 = memref.load %arg6[%c86] : memref<98xf32, #tpu.memory_space<smem>>
    %c87 = arith.constant 87 : index
    %87 = memref.load %arg6[%c87] : memref<98xf32, #tpu.memory_space<smem>>
    %c88 = arith.constant 88 : index
    %88 = memref.load %arg6[%c88] : memref<98xf32, #tpu.memory_space<smem>>
    %c89 = arith.constant 89 : index
    %89 = memref.load %arg6[%c89] : memref<98xf32, #tpu.memory_space<smem>>
    %c90 = arith.constant 90 : index
    %90 = memref.load %arg6[%c90] : memref<98xf32, #tpu.memory_space<smem>>
    %c91 = arith.constant 91 : index
    %91 = memref.load %arg6[%c91] : memref<98xf32, #tpu.memory_space<smem>>
    %c92 = arith.constant 92 : index
    %92 = memref.load %arg6[%c92] : memref<98xf32, #tpu.memory_space<smem>>
    %c93 = arith.constant 93 : index
    %93 = memref.load %arg6[%c93] : memref<98xf32, #tpu.memory_space<smem>>
    %c94 = arith.constant 94 : index
    %94 = memref.load %arg6[%c94] : memref<98xf32, #tpu.memory_space<smem>>
    %c95 = arith.constant 95 : index
    %95 = memref.load %arg6[%c95] : memref<98xf32, #tpu.memory_space<smem>>
    %c96 = arith.constant 96 : index
    %96 = memref.load %arg6[%c96] : memref<98xf32, #tpu.memory_space<smem>>
    %c97 = arith.constant 97 : index
    %97 = memref.load %arg6[%c97] : memref<98xf32, #tpu.memory_space<smem>>
    %c0_0 = arith.constant 0 : index
    %98 = memref.load %arg7[%c0_0] : memref<1xf32, #tpu.memory_space<smem>>
    %cst = arith.constant 0.000000e+00 : f32
    %99 = vector.broadcast %cst : f32 to vector<2x3x51xf32>
    %c0_1 = arith.constant 0 : index
    %c0_2 = arith.constant 0 : index
    %c0_3 = arith.constant 0 : index
    %100 = vector.load %arg10[%c0_1, %c0_2, %c0_3] : memref<2x3x358xf32, #tpu.memory_space<vmem>>, vector<2x3x51xf32>
    tpu.vector_store %arg10[%c0_1, %c0_2, %c0_3], %99 {strides = array<i32>} : memref<2x3x358xf32, #tpu.memory_space<vmem>>, vector<2x3x51xf32>,
    %c0_4 = arith.constant 0 : index
    %c0_5 = arith.constant 0 : index
    %c307 = arith.constant 307 : index
    %101 = vector.load %arg10[%c0_4, %c0_5, %c307] : memref<2x3x358xf32, #tpu.memory_space<vmem>>, vector<2x3x51xf32>
    tpu.vector_store %arg10[%c0_4, %c0_5, %c307], %99 {strides = array<i32>} : memref<2x3x358xf32, #tpu.memory_space<vmem>>, vector<2x3x51xf32>,
    %c0_6 = arith.constant 0 : index
    %c0_7 = arith.constant 0 : index
    %c0_8 = arith.constant 0 : index
    %102 = vector.load %arg1[%c0_6, %c0_7, %c0_8] : memref<3x32x256xf32, #tpu.memory_space<vmem>>, vector<3x32x256xf32>
    %cst_9 = arith.constant dense<0.000000e+00> : vector<3x32xf32>
    %103 = vector.multi_reduction <add>, %102, %cst_9 [2] : vector<3x32x256xf32> to vector<3x32xf32>
    %cst_10 = arith.constant 3.906250e-03 : f32
    %104 = vector.broadcast %cst_10 : f32 to vector<3x32xf32>
    %105 = arith.mulf %103, %104 : vector<3x32xf32>
    %c0_11 = arith.constant 0 : index
    %c0_12 = arith.constant 0 : index
    %c0_13 = arith.constant 0 : index
    %106 = vector.load %arg1[%c0_11, %c0_12, %c0_13] : memref<3x32x256xf32, #tpu.memory_space<vmem>>, vector<3x32x256xf32>
    %cst_14 = arith.constant dense<0xFF800000> : vector<3x32xf32>
    %107 = vector.multi_reduction <maximumf>, %106, %cst_14 [2] : vector<3x32x256xf32> to vector<3x32xf32>
    %108 = tpu.concatenate %105, %107 in 0 : vector<3x32xf32>, vector<3x32xf32> -> vector<6x32xf32>
    %109 = vector.shape_cast %108 : vector<6x32xf32> to vector<6x32x1xf32>
    %c0_15 = arith.constant 0 : index
    %c0_16 = arith.constant 0 : index
    %110 = vector.load %arg2[%c0_15, %c0_16] : memref<32x2xf32, #tpu.memory_space<vmem>>, vector<32x2xf32>
    %111 = vector.shape_cast %110 : vector<32x2xf32> to vector<1x32x2xf32>
    %112 = vector.broadcast %109 : vector<6x32x1xf32> to vector<6x32x2xf32>
    %113 = vector.broadcast %111 : vector<1x32x2xf32> to vector<6x32x2xf32>
    %114 = arith.mulf %112, %113 : vector<6x32x2xf32>
    %cst_17 = arith.constant dense<0.000000e+00> : vector<6x2xf32>
    %115 = vector.multi_reduction <add>, %114, %cst_17 [1] : vector<6x32x2xf32> to vector<6x2xf32>
    %c0_18 = arith.constant 0 : index
    %c0_19 = arith.constant 0 : index
    %116 = vector.load %arg3[%c0_18, %c0_19] : memref<1x2xf32, #tpu.memory_space<vmem>>, vector<1x2xf32>
    %117 = vector.broadcast %116 : vector<1x2xf32> to vector<6x2xf32>
    %118 = arith.addf %115, %117 : vector<6x2xf32>
    %cst_20 = arith.constant 0.000000e+00 : f32
    %119 = vector.broadcast %cst_20 : f32 to vector<6x2xf32>
    %120 = arith.maximumf %118, %119 : vector<6x2xf32>
    %121 = vector.shape_cast %120 : vector<6x2xf32> to vector<6x2x1xf32>
    %c0_21 = arith.constant 0 : index
    %c0_22 = arith.constant 0 : index
    %122 = vector.load %arg4[%c0_21, %c0_22] : memref<2x32xf32, #tpu.memory_space<vmem>>, vector<2x32xf32>
    %123 = vector.shape_cast %122 : vector<2x32xf32> to vector<1x2x32xf32>
    %124 = vector.broadcast %121 : vector<6x2x1xf32> to vector<6x2x32xf32>
    %125 = vector.broadcast %123 : vector<1x2x32xf32> to vector<6x2x32xf32>
    %126 = arith.mulf %124, %125 : vector<6x2x32xf32>
    %cst_23 = arith.constant dense<0.000000e+00> : vector<6x32xf32>
    %127 = vector.multi_reduction <add>, %126, %cst_23 [1] : vector<6x2x32xf32> to vector<6x32xf32>
    %c0_24 = arith.constant 0 : index
    %c0_25 = arith.constant 0 : index
    %128 = vector.load %arg5[%c0_24, %c0_25] : memref<1x32xf32, #tpu.memory_space<vmem>>, vector<1x32xf32>
    %129 = vector.broadcast %128 : vector<1x32xf32> to vector<6x32xf32>
    %130 = arith.addf %127, %129 : vector<6x32xf32>
    %131 = vector.extract_strided_slice %130 {offsets = [0, 0], sizes = [3, 32], strides = [1, 1]} : vector<6x32xf32> to vector<3x32xf32>
    %132 = vector.extract_strided_slice %130 {offsets = [3, 0], sizes = [3, 32], strides = [1, 1]} : vector<6x32xf32> to vector<3x32xf32>
    %133 = arith.addf %131, %132 : vector<3x32xf32>
    %134 = arith.negf %133 : vector<3x32xf32>
    %135 = math.exp %134 : vector<3x32xf32>
    %cst_26 = arith.constant 1.000000e+00 : f32
    %136 = vector.broadcast %cst_26 : f32 to vector<3x32xf32>
    %137 = arith.addf %136, %135 : vector<3x32xf32>
    %138 = arith.divf %136, %137 : vector<3x32xf32>
    %c0_27 = arith.constant 0 : index
    %c0_28 = arith.constant 0 : index
    %c0_29 = arith.constant 0 : index
    %139 = vector.load %arg1[%c0_27, %c0_28, %c0_29] : memref<3x32x256xf32, #tpu.memory_space<vmem>>, vector<3x32x256xf32>
    %140 = vector.shape_cast %138 : vector<3x32xf32> to vector<3x32x1xf32>
    %141 = vector.broadcast %140 : vector<3x32x1xf32> to vector<3x32x256xf32>
    %142 = arith.mulf %139, %141 : vector<3x32x256xf32>
    %c0_30 = arith.constant 0 : index
    %c0_31 = arith.constant 0 : index
    %c0_32 = arith.constant 0 : index
    %143 = vector.load %arg9[%c0_30, %c0_31, %c0_32] : memref<3x32x256xf32, #tpu.memory_space<vmem>>, vector<3x32x256xf32>
    tpu.vector_store %arg9[%c0_30, %c0_31, %c0_32], %142 {strides = array<i32>} : memref<3x32x256xf32, #tpu.memory_space<vmem>>, vector<3x32x256xf32>,
    %c0_33 = arith.constant 0 : index
    %c0_34 = arith.constant 0 : index
    %c0_35 = arith.constant 0 : index
    %144 = vector.load %arg9[%c0_33, %c0_34, %c0_35] : memref<3x32x256xf32, #tpu.memory_space<vmem>>, vector<3x32x256xf32>
    %cst_36 = arith.constant dense<0.000000e+00> : vector<3x256xf32>
    %145 = vector.multi_reduction <add>, %144, %cst_36 [1] : vector<3x32x256xf32> to vector<3x256xf32>
    %cst_37 = arith.constant 3.125000e-02 : f32
    %146 = vector.broadcast %cst_37 : f32 to vector<3x256xf32>
    %147 = arith.mulf %145, %146 : vector<3x256xf32>
    %c0_38 = arith.constant 0 : index
    %c0_39 = arith.constant 0 : index
    %c0_40 = arith.constant 0 : index
    %148 = vector.load %arg9[%c0_38, %c0_39, %c0_40] : memref<3x32x256xf32, #tpu.memory_space<vmem>>, vector<3x32x256xf32>
    %cst_41 = arith.constant dense<0xFF800000> : vector<3x256xf32>
    %149 = vector.multi_reduction <maximumf>, %148, %cst_41 [1] : vector<3x32x256xf32> to vector<3x256xf32>
    %c0_42 = arith.constant 0 : index
    %c0_43 = arith.constant 0 : index
    %c51_44 = arith.constant 51 : index
    %150 = vector.load %arg10[%c0_42, %c0_43, %c51_44] : memref<2x3x358xf32, #tpu.memory_space<vmem>>, vector<1x3x256xf32>
    %151 = vector.shape_cast %150 : vector<1x3x256xf32> to vector<3x256xf32>
    %152 = vector.shape_cast %147 : vector<3x256xf32> to vector<1x3x256xf32>
    tpu.vector_store %arg10[%c0_42, %c0_43, %c51_44], %152 {strides = array<i32>} : memref<2x3x358xf32, #tpu.memory_space<vmem>>, vector<1x3x256xf32>,
    %c1_45 = arith.constant 1 : index
    %c0_46 = arith.constant 0 : index
    %c51_47 = arith.constant 51 : index
    %153 = vector.load %arg10[%c1_45, %c0_46, %c51_47] : memref<2x3x358xf32, #tpu.memory_space<vmem>>, vector<1x3x256xf32>
    %154 = vector.shape_cast %153 : vector<1x3x256xf32> to vector<3x256xf32>
    %155 = vector.shape_cast %149 : vector<3x256xf32> to vector<1x3x256xf32>
    tpu.vector_store %arg10[%c1_45, %c0_46, %c51_47], %155 {strides = array<i32>} : memref<2x3x358xf32, #tpu.memory_space<vmem>>, vector<1x3x256xf32>,
    %c0_48 = arith.constant 0 : index
    %c0_49 = arith.constant 0 : index
    %c0_50 = arith.constant 0 : index
    %156 = vector.load %arg10[%c0_48, %c0_49, %c0_50] : memref<2x3x358xf32, #tpu.memory_space<vmem>>, vector<1x3x358xf32>
    %157 = vector.shape_cast %156 : vector<1x3x358xf32> to vector<3x358xf32>
    %c1_51 = arith.constant 1 : index
    %c0_52 = arith.constant 0 : index
    %c0_53 = arith.constant 0 : index
    %158 = vector.load %arg10[%c1_51, %c0_52, %c0_53] : memref<2x3x358xf32, #tpu.memory_space<vmem>>, vector<1x3x358xf32>
    %159 = vector.shape_cast %158 : vector<1x3x358xf32> to vector<3x358xf32>
    %cst_54 = arith.constant 0.000000e+00 : f32
    %160 = vector.broadcast %cst_54 : f32 to vector<3x256xf32>
    %cst_55 = arith.constant 0.000000e+00 : f32
    %161 = vector.broadcast %cst_55 : f32 to vector<3x256xf32>
    %162 = vector.extract_strided_slice %157 {offsets = [0, 0], sizes = [3, 256], strides = [1, 1]} : vector<3x358xf32> to vector<3x256xf32>
    %163 = vector.broadcast %0 : f32 to vector<3x256xf32>
    %164 = arith.mulf %163, %162 : vector<3x256xf32>
    %165 = arith.addf %161, %164 : vector<3x256xf32>
    %166 = vector.extract_strided_slice %157 {offsets = [0, 16], sizes = [3, 256], strides = [1, 1]} : vector<3x358xf32> to vector<3x256xf32>
    %167 = vector.broadcast %7 : f32 to vector<3x256xf32>
    %168 = arith.mulf %167, %166 : vector<3x256xf32>
    %169 = arith.addf %165, %168 : vector<3x256xf32>
    %170 = vector.extract_strided_slice %157 {offsets = [0, 32], sizes = [3, 256], strides = [1, 1]} : vector<3x358xf32> to vector<3x256xf32>
    %171 = vector.broadcast %14 : f32 to vector<3x256xf32>
    %172 = arith.mulf %171, %170 : vector<3x256xf32>
    %173 = arith.addf %169, %172 : vector<3x256xf32>
    %174 = vector.extract_strided_slice %157 {offsets = [0, 48], sizes = [3, 256], strides = [1, 1]} : vector<3x358xf32> to vector<3x256xf32>
    %175 = vector.broadcast %21 : f32 to vector<3x256xf32>
    %176 = arith.mulf %175, %174 : vector<3x256xf32>
    %177 = arith.addf %173, %176 : vector<3x256xf32>
    %178 = vector.extract_strided_slice %157 {offsets = [0, 64], sizes = [3, 256], strides = [1, 1]} : vector<3x358xf32> to vector<3x256xf32>
    %179 = vector.broadcast %28 : f32 to vector<3x256xf32>
    %180 = arith.mulf %179, %178 : vector<3x256xf32>
    %181 = arith.addf %177, %180 : vector<3x256xf32>
    %182 = vector.extract_strided_slice %157 {offsets = [0, 80], sizes = [3, 256], strides = [1, 1]} : vector<3x358xf32> to vector<3x256xf32>
    %183 = vector.broadcast %35 : f32 to vector<3x256xf32>
    %184 = arith.mulf %183, %182 : vector<3x256xf32>
    %185 = arith.addf %181, %184 : vector<3x256xf32>
    %186 = vector.extract_strided_slice %157 {offsets = [0, 96], sizes = [3, 256], strides = [1, 1]} : vector<3x358xf32> to vector<3x256xf32>
    %187 = vector.broadcast %42 : f32 to vector<3x256xf32>
    %188 = arith.mulf %187, %186 : vector<3x256xf32>
    %189 = arith.addf %185, %188 : vector<3x256xf32>
    %cst_56 = arith.constant 0.000000e+00 : f32
    %190 = vector.broadcast %cst_56 : f32 to vector<3x256xf32>
    %191 = vector.extract_strided_slice %159 {offsets = [0, 0], sizes = [3, 256], strides = [1, 1]} : vector<3x358xf32> to vector<3x256xf32>
    %192 = vector.broadcast %49 : f32 to vector<3x256xf32>
    %193 = arith.mulf %192, %191 : vector<3x256xf32>
    %194 = arith.addf %190, %193 : vector<3x256xf32>
    %195 = vector.extract_strided_slice %159 {offsets = [0, 16], sizes = [3, 256], strides = [1, 1]} : vector<3x358xf32> to vector<3x256xf32>
    %196 = vector.broadcast %56 : f32 to vector<3x256xf32>
    %197 = arith.mulf %196, %195 : vector<3x256xf32>
    %198 = arith.addf %194, %197 : vector<3x256xf32>
    %199 = vector.extract_strided_slice %159 {offsets = [0, 32], sizes = [3, 256], strides = [1, 1]} : vector<3x358xf32> to vector<3x256xf32>
    %200 = vector.broadcast %63 : f32 to vector<3x256xf32>
    %201 = arith.mulf %200, %199 : vector<3x256xf32>
    %202 = arith.addf %198, %201 : vector<3x256xf32>
    %203 = vector.extract_strided_slice %159 {offsets = [0, 48], sizes = [3, 256], strides = [1, 1]} : vector<3x358xf32> to vector<3x256xf32>
    %204 = vector.broadcast %70 : f32 to vector<3x256xf32>
    %205 = arith.mulf %204, %203 : vector<3x256xf32>
    %206 = arith.addf %202, %205 : vector<3x256xf32>
    %207 = vector.extract_strided_slice %159 {offsets = [0, 64], sizes = [3, 256], strides = [1, 1]} : vector<3x358xf32> to vector<3x256xf32>
    %208 = vector.broadcast %77 : f32 to vector<3x256xf32>
    %209 = arith.mulf %208, %207 : vector<3x256xf32>
    %210 = arith.addf %206, %209 : vector<3x256xf32>
    %211 = vector.extract_strided_slice %159 {offsets = [0, 80], sizes = [3, 256], strides = [1, 1]} : vector<3x358xf32> to vector<3x256xf32>
    %212 = vector.broadcast %84 : f32 to vector<3x256xf32>
    %213 = arith.mulf %212, %211 : vector<3x256xf32>
    %214 = arith.addf %210, %213 : vector<3x256xf32>
    %215 = vector.extract_strided_slice %159 {offsets = [0, 96], sizes = [3, 256], strides = [1, 1]} : vector<3x358xf32> to vector<3x256xf32>
    %216 = vector.broadcast %91 : f32 to vector<3x256xf32>
    %217 = arith.mulf %216, %215 : vector<3x256xf32>
    %218 = arith.addf %214, %217 : vector<3x256xf32>
    %c0_57 = arith.constant 0 : index
    %c0_58 = arith.constant 0 : index
    %219 = vector.load %arg8[%c0_57, %c0_58] : memref<7x256xf32, #tpu.memory_space<vmem>>, vector<1x256xf32>
    %220 = arith.addf %189, %218 : vector<3x256xf32>
    %221 = vector.broadcast %219 : vector<1x256xf32> to vector<3x256xf32>
    %222 = arith.mulf %221, %220 : vector<3x256xf32>
    %223 = arith.addf %160, %222 : vector<3x256xf32>
    %cst_59 = arith.constant 0.000000e+00 : f32
    %224 = vector.broadcast %cst_59 : f32 to vector<3x256xf32>
    %225 = vector.extract_strided_slice %157 {offsets = [0, 1], sizes = [3, 256], strides = [1, 1]} : vector<3x358xf32> to vector<3x256xf32>
    %226 = vector.broadcast %1 : f32 to vector<3x256xf32>
    %227 = arith.mulf %226, %225 : vector<3x256xf32>
    %228 = arith.addf %224, %227 : vector<3x256xf32>
    %229 = vector.extract_strided_slice %157 {offsets = [0, 17], sizes = [3, 256], strides = [1, 1]} : vector<3x358xf32> to vector<3x256xf32>
    %230 = vector.broadcast %8 : f32 to vector<3x256xf32>
    %231 = arith.mulf %230, %229 : vector<3x256xf32>
    %232 = arith.addf %228, %231 : vector<3x256xf32>
    %233 = vector.extract_strided_slice %157 {offsets = [0, 33], sizes = [3, 256], strides = [1, 1]} : vector<3x358xf32> to vector<3x256xf32>
    %234 = vector.broadcast %15 : f32 to vector<3x256xf32>
    %235 = arith.mulf %234, %233 : vector<3x256xf32>
    %236 = arith.addf %232, %235 : vector<3x256xf32>
    %237 = vector.extract_strided_slice %157 {offsets = [0, 49], sizes = [3, 256], strides = [1, 1]} : vector<3x358xf32> to vector<3x256xf32>
    %238 = vector.broadcast %22 : f32 to vector<3x256xf32>
    %239 = arith.mulf %238, %237 : vector<3x256xf32>
    %240 = arith.addf %236, %239 : vector<3x256xf32>
    %241 = vector.extract_strided_slice %157 {offsets = [0, 65], sizes = [3, 256], strides = [1, 1]} : vector<3x358xf32> to vector<3x256xf32>
    %242 = vector.broadcast %29 : f32 to vector<3x256xf32>
    %243 = arith.mulf %242, %241 : vector<3x256xf32>
    %244 = arith.addf %240, %243 : vector<3x256xf32>
    %245 = vector.extract_strided_slice %157 {offsets = [0, 81], sizes = [3, 256], strides = [1, 1]} : vector<3x358xf32> to vector<3x256xf32>
    %246 = vector.broadcast %36 : f32 to vector<3x256xf32>
    %247 = arith.mulf %246, %245 : vector<3x256xf32>
    %248 = arith.addf %244, %247 : vector<3x256xf32>
    %249 = vector.extract_strided_slice %157 {offsets = [0, 97], sizes = [3, 256], strides = [1, 1]} : vector<3x358xf32> to vector<3x256xf32>
    %250 = vector.broadcast %43 : f32 to vector<3x256xf32>
    %251 = arith.mulf %250, %249 : vector<3x256xf32>
    %252 = arith.addf %248, %251 : vector<3x256xf32>
    %cst_60 = arith.constant 0.000000e+00 : f32
    %253 = vector.broadcast %cst_60 : f32 to vector<3x256xf32>
    %254 = vector.extract_strided_slice %159 {offsets = [0, 1], sizes = [3, 256], strides = [1, 1]} : vector<3x358xf32> to vector<3x256xf32>
    %255 = vector.broadcast %50 : f32 to vector<3x256xf32>
    %256 = arith.mulf %255, %254 : vector<3x256xf32>
    %257 = arith.addf %253, %256 : vector<3x256xf32>
    %258 = vector.extract_strided_slice %159 {offsets = [0, 17], sizes = [3, 256], strides = [1, 1]} : vector<3x358xf32> to vector<3x256xf32>
    %259 = vector.broadcast %57 : f32 to vector<3x256xf32>
    %260 = arith.mulf %259, %258 : vector<3x256xf32>
    %261 = arith.addf %257, %260 : vector<3x256xf32>
    %262 = vector.extract_strided_slice %159 {offsets = [0, 33], sizes = [3, 256], strides = [1, 1]} : vector<3x358xf32> to vector<3x256xf32>
    %263 = vector.broadcast %64 : f32 to vector<3x256xf32>
    %264 = arith.mulf %263, %262 : vector<3x256xf32>
    %265 = arith.addf %261, %264 : vector<3x256xf32>
    %266 = vector.extract_strided_slice %159 {offsets = [0, 49], sizes = [3, 256], strides = [1, 1]} : vector<3x358xf32> to vector<3x256xf32>
    %267 = vector.broadcast %71 : f32 to vector<3x256xf32>
    %268 = arith.mulf %267, %266 : vector<3x256xf32>
    %269 = arith.addf %265, %268 : vector<3x256xf32>
    %270 = vector.extract_strided_slice %159 {offsets = [0, 65], sizes = [3, 256], strides = [1, 1]} : vector<3x358xf32> to vector<3x256xf32>
    %271 = vector.broadcast %78 : f32 to vector<3x256xf32>
    %272 = arith.mulf %271, %270 : vector<3x256xf32>
    %273 = arith.addf %269, %272 : vector<3x256xf32>
    %274 = vector.extract_strided_slice %159 {offsets = [0, 81], sizes = [3, 256], strides = [1, 1]} : vector<3x358xf32> to vector<3x256xf32>
    %275 = vector.broadcast %85 : f32 to vector<3x256xf32>
    %276 = arith.mulf %275, %274 : vector<3x256xf32>
    %277 = arith.addf %273, %276 : vector<3x256xf32>
    %278 = vector.extract_strided_slice %159 {offsets = [0, 97], sizes = [3, 256], strides = [1, 1]} : vector<3x358xf32> to vector<3x256xf32>
    %279 = vector.broadcast %92 : f32 to vector<3x256xf32>
    %280 = arith.mulf %279, %278 : vector<3x256xf32>
    %281 = arith.addf %277, %280 : vector<3x256xf32>
    %c1_61 = arith.constant 1 : index
    %c0_62 = arith.constant 0 : index
    %282 = vector.load %arg8[%c1_61, %c0_62] : memref<7x256xf32, #tpu.memory_space<vmem>>, vector<1x256xf32>
    %283 = arith.addf %252, %281 : vector<3x256xf32>
    %284 = vector.broadcast %282 : vector<1x256xf32> to vector<3x256xf32>
    %285 = arith.mulf %284, %283 : vector<3x256xf32>
    %286 = arith.addf %223, %285 : vector<3x256xf32>
    %cst_63 = arith.constant 0.000000e+00 : f32
    %287 = vector.broadcast %cst_63 : f32 to vector<3x256xf32>
    %288 = vector.extract_strided_slice %157 {offsets = [0, 2], sizes = [3, 256], strides = [1, 1]} : vector<3x358xf32> to vector<3x256xf32>
    %289 = vector.broadcast %2 : f32 to vector<3x256xf32>
    %290 = arith.mulf %289, %288 : vector<3x256xf32>
    %291 = arith.addf %287, %290 : vector<3x256xf32>
    %292 = vector.extract_strided_slice %157 {offsets = [0, 18], sizes = [3, 256], strides = [1, 1]} : vector<3x358xf32> to vector<3x256xf32>
    %293 = vector.broadcast %9 : f32 to vector<3x256xf32>
    %294 = arith.mulf %293, %292 : vector<3x256xf32>
    %295 = arith.addf %291, %294 : vector<3x256xf32>
    %296 = vector.extract_strided_slice %157 {offsets = [0, 34], sizes = [3, 256], strides = [1, 1]} : vector<3x358xf32> to vector<3x256xf32>
    %297 = vector.broadcast %16 : f32 to vector<3x256xf32>
    %298 = arith.mulf %297, %296 : vector<3x256xf32>
    %299 = arith.addf %295, %298 : vector<3x256xf32>
    %300 = vector.extract_strided_slice %157 {offsets = [0, 50], sizes = [3, 256], strides = [1, 1]} : vector<3x358xf32> to vector<3x256xf32>
    %301 = vector.broadcast %23 : f32 to vector<3x256xf32>
    %302 = arith.mulf %301, %300 : vector<3x256xf32>
    %303 = arith.addf %299, %302 : vector<3x256xf32>
    %304 = vector.extract_strided_slice %157 {offsets = [0, 66], sizes = [3, 256], strides = [1, 1]} : vector<3x358xf32> to vector<3x256xf32>
    %305 = vector.broadcast %30 : f32 to vector<3x256xf32>
    %306 = arith.mulf %305, %304 : vector<3x256xf32>
    %307 = arith.addf %303, %306 : vector<3x256xf32>
    %308 = vector.extract_strided_slice %157 {offsets = [0, 82], sizes = [3, 256], strides = [1, 1]} : vector<3x358xf32> to vector<3x256xf32>
    %309 = vector.broadcast %37 : f32 to vector<3x256xf32>
    %310 = arith.mulf %309, %308 : vector<3x256xf32>
    %311 = arith.addf %307, %310 : vector<3x256xf32>
    %312 = vector.extract_strided_slice %157 {offsets = [0, 98], sizes = [3, 256], strides = [1, 1]} : vector<3x358xf32> to vector<3x256xf32>
    %313 = vector.broadcast %44 : f32 to vector<3x256xf32>
    %314 = arith.mulf %313, %312 : vector<3x256xf32>
    %315 = arith.addf %311, %314 : vector<3x256xf32>
    %cst_64 = arith.constant 0.000000e+00 : f32
    %316 = vector.broadcast %cst_64 : f32 to vector<3x256xf32>
    %317 = vector.extract_strided_slice %159 {offsets = [0, 2], sizes = [3, 256], strides = [1, 1]} : vector<3x358xf32> to vector<3x256xf32>
    %318 = vector.broadcast %51 : f32 to vector<3x256xf32>
    %319 = arith.mulf %318, %317 : vector<3x256xf32>
    %320 = arith.addf %316, %319 : vector<3x256xf32>
    %321 = vector.extract_strided_slice %159 {offsets = [0, 18], sizes = [3, 256], strides = [1, 1]} : vector<3x358xf32> to vector<3x256xf32>
    %322 = vector.broadcast %58 : f32 to vector<3x256xf32>
    %323 = arith.mulf %322, %321 : vector<3x256xf32>
    %324 = arith.addf %320, %323 : vector<3x256xf32>
    %325 = vector.extract_strided_slice %159 {offsets = [0, 34], sizes = [3, 256], strides = [1, 1]} : vector<3x358xf32> to vector<3x256xf32>
    %326 = vector.broadcast %65 : f32 to vector<3x256xf32>
    %327 = arith.mulf %326, %325 : vector<3x256xf32>
    %328 = arith.addf %324, %327 : vector<3x256xf32>
    %329 = vector.extract_strided_slice %159 {offsets = [0, 50], sizes = [3, 256], strides = [1, 1]} : vector<3x358xf32> to vector<3x256xf32>
    %330 = vector.broadcast %72 : f32 to vector<3x256xf32>
    %331 = arith.mulf %330, %329 : vector<3x256xf32>
    %332 = arith.addf %328, %331 : vector<3x256xf32>
    %333 = vector.extract_strided_slice %159 {offsets = [0, 66], sizes = [3, 256], strides = [1, 1]} : vector<3x358xf32> to vector<3x256xf32>
    %334 = vector.broadcast %79 : f32 to vector<3x256xf32>
    %335 = arith.mulf %334, %333 : vector<3x256xf32>
    %336 = arith.addf %332, %335 : vector<3x256xf32>
    %337 = vector.extract_strided_slice %159 {offsets = [0, 82], sizes = [3, 256], strides = [1, 1]} : vector<3x358xf32> to vector<3x256xf32>
    %338 = vector.broadcast %86 : f32 to vector<3x256xf32>
    %339 = arith.mulf %338, %337 : vector<3x256xf32>
    %340 = arith.addf %336, %339 : vector<3x256xf32>
    %341 = vector.extract_strided_slice %159 {offsets = [0, 98], sizes = [3, 256], strides = [1, 1]} : vector<3x358xf32> to vector<3x256xf32>
    %342 = vector.broadcast %93 : f32 to vector<3x256xf32>
    %343 = arith.mulf %342, %341 : vector<3x256xf32>
    %344 = arith.addf %340, %343 : vector<3x256xf32>
    %c2_65 = arith.constant 2 : index
    %c0_66 = arith.constant 0 : index
    %345 = vector.load %arg8[%c2_65, %c0_66] : memref<7x256xf32, #tpu.memory_space<vmem>>, vector<1x256xf32>
    %346 = arith.addf %315, %344 : vector<3x256xf32>
    %347 = vector.broadcast %345 : vector<1x256xf32> to vector<3x256xf32>
    %348 = arith.mulf %347, %346 : vector<3x256xf32>
    %349 = arith.addf %286, %348 : vector<3x256xf32>
    %cst_67 = arith.constant 0.000000e+00 : f32
    %350 = vector.broadcast %cst_67 : f32 to vector<3x256xf32>
    %351 = vector.extract_strided_slice %157 {offsets = [0, 3], sizes = [3, 256], strides = [1, 1]} : vector<3x358xf32> to vector<3x256xf32>
    %352 = vector.broadcast %3 : f32 to vector<3x256xf32>
    %353 = arith.mulf %352, %351 : vector<3x256xf32>
    %354 = arith.addf %350, %353 : vector<3x256xf32>
    %355 = vector.extract_strided_slice %157 {offsets = [0, 19], sizes = [3, 256], strides = [1, 1]} : vector<3x358xf32> to vector<3x256xf32>
    %356 = vector.broadcast %10 : f32 to vector<3x256xf32>
    %357 = arith.mulf %356, %355 : vector<3x256xf32>
    %358 = arith.addf %354, %357 : vector<3x256xf32>
    %359 = vector.extract_strided_slice %157 {offsets = [0, 35], sizes = [3, 256], strides = [1, 1]} : vector<3x358xf32> to vector<3x256xf32>
    %360 = vector.broadcast %17 : f32 to vector<3x256xf32>
    %361 = arith.mulf %360, %359 : vector<3x256xf32>
    %362 = arith.addf %358, %361 : vector<3x256xf32>
    %363 = vector.extract_strided_slice %157 {offsets = [0, 51], sizes = [3, 256], strides = [1, 1]} : vector<3x358xf32> to vector<3x256xf32>
    %364 = vector.broadcast %24 : f32 to vector<3x256xf32>
    %365 = arith.mulf %364, %363 : vector<3x256xf32>
    %366 = arith.addf %362, %365 : vector<3x256xf32>
    %367 = vector.extract_strided_slice %157 {offsets = [0, 67], sizes = [3, 256], strides = [1, 1]} : vector<3x358xf32> to vector<3x256xf32>
    %368 = vector.broadcast %31 : f32 to vector<3x256xf32>
    %369 = arith.mulf %368, %367 : vector<3x256xf32>
    %370 = arith.addf %366, %369 : vector<3x256xf32>
    %371 = vector.extract_strided_slice %157 {offsets = [0, 83], sizes = [3, 256], strides = [1, 1]} : vector<3x358xf32> to vector<3x256xf32>
    %372 = vector.broadcast %38 : f32 to vector<3x256xf32>
    %373 = arith.mulf %372, %371 : vector<3x256xf32>
    %374 = arith.addf %370, %373 : vector<3x256xf32>
    %375 = vector.extract_strided_slice %157 {offsets = [0, 99], sizes = [3, 256], strides = [1, 1]} : vector<3x358xf32> to vector<3x256xf32>
    %376 = vector.broadcast %45 : f32 to vector<3x256xf32>
    %377 = arith.mulf %376, %375 : vector<3x256xf32>
    %378 = arith.addf %374, %377 : vector<3x256xf32>
    %cst_68 = arith.constant 0.000000e+00 : f32
    %379 = vector.broadcast %cst_68 : f32 to vector<3x256xf32>
    %380 = vector.extract_strided_slice %159 {offsets = [0, 3], sizes = [3, 256], strides = [1, 1]} : vector<3x358xf32> to vector<3x256xf32>
    %381 = vector.broadcast %52 : f32 to vector<3x256xf32>
    %382 = arith.mulf %381, %380 : vector<3x256xf32>
    %383 = arith.addf %379, %382 : vector<3x256xf32>
    %384 = vector.extract_strided_slice %159 {offsets = [0, 19], sizes = [3, 256], strides = [1, 1]} : vector<3x358xf32> to vector<3x256xf32>
    %385 = vector.broadcast %59 : f32 to vector<3x256xf32>
    %386 = arith.mulf %385, %384 : vector<3x256xf32>
    %387 = arith.addf %383, %386 : vector<3x256xf32>
    %388 = vector.extract_strided_slice %159 {offsets = [0, 35], sizes = [3, 256], strides = [1, 1]} : vector<3x358xf32> to vector<3x256xf32>
    %389 = vector.broadcast %66 : f32 to vector<3x256xf32>
    %390 = arith.mulf %389, %388 : vector<3x256xf32>
    %391 = arith.addf %387, %390 : vector<3x256xf32>
    %392 = vector.extract_strided_slice %159 {offsets = [0, 51], sizes = [3, 256], strides = [1, 1]} : vector<3x358xf32> to vector<3x256xf32>
    %393 = vector.broadcast %73 : f32 to vector<3x256xf32>
    %394 = arith.mulf %393, %392 : vector<3x256xf32>
    %395 = arith.addf %391, %394 : vector<3x256xf32>
    %396 = vector.extract_strided_slice %159 {offsets = [0, 67], sizes = [3, 256], strides = [1, 1]} : vector<3x358xf32> to vector<3x256xf32>
    %397 = vector.broadcast %80 : f32 to vector<3x256xf32>
    %398 = arith.mulf %397, %396 : vector<3x256xf32>
    %399 = arith.addf %395, %398 : vector<3x256xf32>
    %400 = vector.extract_strided_slice %159 {offsets = [0, 83], sizes = [3, 256], strides = [1, 1]} : vector<3x358xf32> to vector<3x256xf32>
    %401 = vector.broadcast %87 : f32 to vector<3x256xf32>
    %402 = arith.mulf %401, %400 : vector<3x256xf32>
    %403 = arith.addf %399, %402 : vector<3x256xf32>
    %404 = vector.extract_strided_slice %159 {offsets = [0, 99], sizes = [3, 256], strides = [1, 1]} : vector<3x358xf32> to vector<3x256xf32>
    %405 = vector.broadcast %94 : f32 to vector<3x256xf32>
    %406 = arith.mulf %405, %404 : vector<3x256xf32>
    %407 = arith.addf %403, %406 : vector<3x256xf32>
    %c3_69 = arith.constant 3 : index
    %c0_70 = arith.constant 0 : index
    %408 = vector.load %arg8[%c3_69, %c0_70] : memref<7x256xf32, #tpu.memory_space<vmem>>, vector<1x256xf32>
    %409 = arith.addf %378, %407 : vector<3x256xf32>
    %410 = vector.broadcast %408 : vector<1x256xf32> to vector<3x256xf32>
    %411 = arith.mulf %410, %409 : vector<3x256xf32>
    %412 = arith.addf %349, %411 : vector<3x256xf32>
    %cst_71 = arith.constant 0.000000e+00 : f32
    %413 = vector.broadcast %cst_71 : f32 to vector<3x256xf32>
    %414 = vector.extract_strided_slice %157 {offsets = [0, 4], sizes = [3, 256], strides = [1, 1]} : vector<3x358xf32> to vector<3x256xf32>
    %415 = vector.broadcast %4 : f32 to vector<3x256xf32>
    %416 = arith.mulf %415, %414 : vector<3x256xf32>
    %417 = arith.addf %413, %416 : vector<3x256xf32>
    %418 = vector.extract_strided_slice %157 {offsets = [0, 20], sizes = [3, 256], strides = [1, 1]} : vector<3x358xf32> to vector<3x256xf32>
    %419 = vector.broadcast %11 : f32 to vector<3x256xf32>
    %420 = arith.mulf %419, %418 : vector<3x256xf32>
    %421 = arith.addf %417, %420 : vector<3x256xf32>
    %422 = vector.extract_strided_slice %157 {offsets = [0, 36], sizes = [3, 256], strides = [1, 1]} : vector<3x358xf32> to vector<3x256xf32>
    %423 = vector.broadcast %18 : f32 to vector<3x256xf32>
    %424 = arith.mulf %423, %422 : vector<3x256xf32>
    %425 = arith.addf %421, %424 : vector<3x256xf32>
    %426 = vector.extract_strided_slice %157 {offsets = [0, 52], sizes = [3, 256], strides = [1, 1]} : vector<3x358xf32> to vector<3x256xf32>
    %427 = vector.broadcast %25 : f32 to vector<3x256xf32>
    %428 = arith.mulf %427, %426 : vector<3x256xf32>
    %429 = arith.addf %425, %428 : vector<3x256xf32>
    %430 = vector.extract_strided_slice %157 {offsets = [0, 68], sizes = [3, 256], strides = [1, 1]} : vector<3x358xf32> to vector<3x256xf32>
    %431 = vector.broadcast %32 : f32 to vector<3x256xf32>
    %432 = arith.mulf %431, %430 : vector<3x256xf32>
    %433 = arith.addf %429, %432 : vector<3x256xf32>
    %434 = vector.extract_strided_slice %157 {offsets = [0, 84], sizes = [3, 256], strides = [1, 1]} : vector<3x358xf32> to vector<3x256xf32>
    %435 = vector.broadcast %39 : f32 to vector<3x256xf32>
    %436 = arith.mulf %435, %434 : vector<3x256xf32>
    %437 = arith.addf %433, %436 : vector<3x256xf32>
    %438 = vector.extract_strided_slice %157 {offsets = [0, 100], sizes = [3, 256], strides = [1, 1]} : vector<3x358xf32> to vector<3x256xf32>
    %439 = vector.broadcast %46 : f32 to vector<3x256xf32>
    %440 = arith.mulf %439, %438 : vector<3x256xf32>
    %441 = arith.addf %437, %440 : vector<3x256xf32>
    %cst_72 = arith.constant 0.000000e+00 : f32
    %442 = vector.broadcast %cst_72 : f32 to vector<3x256xf32>
    %443 = vector.extract_strided_slice %159 {offsets = [0, 4], sizes = [3, 256], strides = [1, 1]} : vector<3x358xf32> to vector<3x256xf32>
    %444 = vector.broadcast %53 : f32 to vector<3x256xf32>
    %445 = arith.mulf %444, %443 : vector<3x256xf32>
    %446 = arith.addf %442, %445 : vector<3x256xf32>
    %447 = vector.extract_strided_slice %159 {offsets = [0, 20], sizes = [3, 256], strides = [1, 1]} : vector<3x358xf32> to vector<3x256xf32>
    %448 = vector.broadcast %60 : f32 to vector<3x256xf32>
    %449 = arith.mulf %448, %447 : vector<3x256xf32>
    %450 = arith.addf %446, %449 : vector<3x256xf32>
    %451 = vector.extract_strided_slice %159 {offsets = [0, 36], sizes = [3, 256], strides = [1, 1]} : vector<3x358xf32> to vector<3x256xf32>
    %452 = vector.broadcast %67 : f32 to vector<3x256xf32>
    %453 = arith.mulf %452, %451 : vector<3x256xf32>
    %454 = arith.addf %450, %453 : vector<3x256xf32>
    %455 = vector.extract_strided_slice %159 {offsets = [0, 52], sizes = [3, 256], strides = [1, 1]} : vector<3x358xf32> to vector<3x256xf32>
    %456 = vector.broadcast %74 : f32 to vector<3x256xf32>
    %457 = arith.mulf %456, %455 : vector<3x256xf32>
    %458 = arith.addf %454, %457 : vector<3x256xf32>
    %459 = vector.extract_strided_slice %159 {offsets = [0, 68], sizes = [3, 256], strides = [1, 1]} : vector<3x358xf32> to vector<3x256xf32>
    %460 = vector.broadcast %81 : f32 to vector<3x256xf32>
    %461 = arith.mulf %460, %459 : vector<3x256xf32>
    %462 = arith.addf %458, %461 : vector<3x256xf32>
    %463 = vector.extract_strided_slice %159 {offsets = [0, 84], sizes = [3, 256], strides = [1, 1]} : vector<3x358xf32> to vector<3x256xf32>
    %464 = vector.broadcast %88 : f32 to vector<3x256xf32>
    %465 = arith.mulf %464, %463 : vector<3x256xf32>
    %466 = arith.addf %462, %465 : vector<3x256xf32>
    %467 = vector.extract_strided_slice %159 {offsets = [0, 100], sizes = [3, 256], strides = [1, 1]} : vector<3x358xf32> to vector<3x256xf32>
    %468 = vector.broadcast %95 : f32 to vector<3x256xf32>
    %469 = arith.mulf %468, %467 : vector<3x256xf32>
    %470 = arith.addf %466, %469 : vector<3x256xf32>
    %c4_73 = arith.constant 4 : index
    %c0_74 = arith.constant 0 : index
    %471 = vector.load %arg8[%c4_73, %c0_74] : memref<7x256xf32, #tpu.memory_space<vmem>>, vector<1x256xf32>
    %472 = arith.addf %441, %470 : vector<3x256xf32>
    %473 = vector.broadcast %471 : vector<1x256xf32> to vector<3x256xf32>
    %474 = arith.mulf %473, %472 : vector<3x256xf32>
    %475 = arith.addf %412, %474 : vector<3x256xf32>
    %cst_75 = arith.constant 0.000000e+00 : f32
    %476 = vector.broadcast %cst_75 : f32 to vector<3x256xf32>
    %477 = vector.extract_strided_slice %157 {offsets = [0, 5], sizes = [3, 256], strides = [1, 1]} : vector<3x358xf32> to vector<3x256xf32>
    %478 = vector.broadcast %5 : f32 to vector<3x256xf32>
    %479 = arith.mulf %478, %477 : vector<3x256xf32>
    %480 = arith.addf %476, %479 : vector<3x256xf32>
    %481 = vector.extract_strided_slice %157 {offsets = [0, 21], sizes = [3, 256], strides = [1, 1]} : vector<3x358xf32> to vector<3x256xf32>
    %482 = vector.broadcast %12 : f32 to vector<3x256xf32>
    %483 = arith.mulf %482, %481 : vector<3x256xf32>
    %484 = arith.addf %480, %483 : vector<3x256xf32>
    %485 = vector.extract_strided_slice %157 {offsets = [0, 37], sizes = [3, 256], strides = [1, 1]} : vector<3x358xf32> to vector<3x256xf32>
    %486 = vector.broadcast %19 : f32 to vector<3x256xf32>
    %487 = arith.mulf %486, %485 : vector<3x256xf32>
    %488 = arith.addf %484, %487 : vector<3x256xf32>
    %489 = vector.extract_strided_slice %157 {offsets = [0, 53], sizes = [3, 256], strides = [1, 1]} : vector<3x358xf32> to vector<3x256xf32>
    %490 = vector.broadcast %26 : f32 to vector<3x256xf32>
    %491 = arith.mulf %490, %489 : vector<3x256xf32>
    %492 = arith.addf %488, %491 : vector<3x256xf32>
    %493 = vector.extract_strided_slice %157 {offsets = [0, 69], sizes = [3, 256], strides = [1, 1]} : vector<3x358xf32> to vector<3x256xf32>
    %494 = vector.broadcast %33 : f32 to vector<3x256xf32>
    %495 = arith.mulf %494, %493 : vector<3x256xf32>
    %496 = arith.addf %492, %495 : vector<3x256xf32>
    %497 = vector.extract_strided_slice %157 {offsets = [0, 85], sizes = [3, 256], strides = [1, 1]} : vector<3x358xf32> to vector<3x256xf32>
    %498 = vector.broadcast %40 : f32 to vector<3x256xf32>
    %499 = arith.mulf %498, %497 : vector<3x256xf32>
    %500 = arith.addf %496, %499 : vector<3x256xf32>
    %501 = vector.extract_strided_slice %157 {offsets = [0, 101], sizes = [3, 256], strides = [1, 1]} : vector<3x358xf32> to vector<3x256xf32>
    %502 = vector.broadcast %47 : f32 to vector<3x256xf32>
    %503 = arith.mulf %502, %501 : vector<3x256xf32>
    %504 = arith.addf %500, %503 : vector<3x256xf32>
    %cst_76 = arith.constant 0.000000e+00 : f32
    %505 = vector.broadcast %cst_76 : f32 to vector<3x256xf32>
    %506 = vector.extract_strided_slice %159 {offsets = [0, 5], sizes = [3, 256], strides = [1, 1]} : vector<3x358xf32> to vector<3x256xf32>
    %507 = vector.broadcast %54 : f32 to vector<3x256xf32>
    %508 = arith.mulf %507, %506 : vector<3x256xf32>
    %509 = arith.addf %505, %508 : vector<3x256xf32>
    %510 = vector.extract_strided_slice %159 {offsets = [0, 21], sizes = [3, 256], strides = [1, 1]} : vector<3x358xf32> to vector<3x256xf32>
    %511 = vector.broadcast %61 : f32 to vector<3x256xf32>
    %512 = arith.mulf %511, %510 : vector<3x256xf32>
    %513 = arith.addf %509, %512 : vector<3x256xf32>
    %514 = vector.extract_strided_slice %159 {offsets = [0, 37], sizes = [3, 256], strides = [1, 1]} : vector<3x358xf32> to vector<3x256xf32>
    %515 = vector.broadcast %68 : f32 to vector<3x256xf32>
    %516 = arith.mulf %515, %514 : vector<3x256xf32>
    %517 = arith.addf %513, %516 : vector<3x256xf32>
    %518 = vector.extract_strided_slice %159 {offsets = [0, 53], sizes = [3, 256], strides = [1, 1]} : vector<3x358xf32> to vector<3x256xf32>
    %519 = vector.broadcast %75 : f32 to vector<3x256xf32>
    %520 = arith.mulf %519, %518 : vector<3x256xf32>
    %521 = arith.addf %517, %520 : vector<3x256xf32>
    %522 = vector.extract_strided_slice %159 {offsets = [0, 69], sizes = [3, 256], strides = [1, 1]} : vector<3x358xf32> to vector<3x256xf32>
    %523 = vector.broadcast %82 : f32 to vector<3x256xf32>
    %524 = arith.mulf %523, %522 : vector<3x256xf32>
    %525 = arith.addf %521, %524 : vector<3x256xf32>
    %526 = vector.extract_strided_slice %159 {offsets = [0, 85], sizes = [3, 256], strides = [1, 1]} : vector<3x358xf32> to vector<3x256xf32>
    %527 = vector.broadcast %89 : f32 to vector<3x256xf32>
    %528 = arith.mulf %527, %526 : vector<3x256xf32>
    %529 = arith.addf %525, %528 : vector<3x256xf32>
    %530 = vector.extract_strided_slice %159 {offsets = [0, 101], sizes = [3, 256], strides = [1, 1]} : vector<3x358xf32> to vector<3x256xf32>
    %531 = vector.broadcast %96 : f32 to vector<3x256xf32>
    %532 = arith.mulf %531, %530 : vector<3x256xf32>
    %533 = arith.addf %529, %532 : vector<3x256xf32>
    %c5_77 = arith.constant 5 : index
    %c0_78 = arith.constant 0 : index
    %534 = vector.load %arg8[%c5_77, %c0_78] : memref<7x256xf32, #tpu.memory_space<vmem>>, vector<1x256xf32>
    %535 = arith.addf %504, %533 : vector<3x256xf32>
    %536 = vector.broadcast %534 : vector<1x256xf32> to vector<3x256xf32>
    %537 = arith.mulf %536, %535 : vector<3x256xf32>
    %538 = arith.addf %475, %537 : vector<3x256xf32>
    %cst_79 = arith.constant 0.000000e+00 : f32
    %539 = vector.broadcast %cst_79 : f32 to vector<3x256xf32>
    %540 = vector.extract_strided_slice %157 {offsets = [0, 6], sizes = [3, 256], strides = [1, 1]} : vector<3x358xf32> to vector<3x256xf32>
    %541 = vector.broadcast %6 : f32 to vector<3x256xf32>
    %542 = arith.mulf %541, %540 : vector<3x256xf32>
    %543 = arith.addf %539, %542 : vector<3x256xf32>
    %544 = vector.extract_strided_slice %157 {offsets = [0, 22], sizes = [3, 256], strides = [1, 1]} : vector<3x358xf32> to vector<3x256xf32>
    %545 = vector.broadcast %13 : f32 to vector<3x256xf32>
    %546 = arith.mulf %545, %544 : vector<3x256xf32>
    %547 = arith.addf %543, %546 : vector<3x256xf32>
    %548 = vector.extract_strided_slice %157 {offsets = [0, 38], sizes = [3, 256], strides = [1, 1]} : vector<3x358xf32> to vector<3x256xf32>
    %549 = vector.broadcast %20 : f32 to vector<3x256xf32>
    %550 = arith.mulf %549, %548 : vector<3x256xf32>
    %551 = arith.addf %547, %550 : vector<3x256xf32>
    %552 = vector.extract_strided_slice %157 {offsets = [0, 54], sizes = [3, 256], strides = [1, 1]} : vector<3x358xf32> to vector<3x256xf32>
    %553 = vector.broadcast %27 : f32 to vector<3x256xf32>
    %554 = arith.mulf %553, %552 : vector<3x256xf32>
    %555 = arith.addf %551, %554 : vector<3x256xf32>
    %556 = vector.extract_strided_slice %157 {offsets = [0, 70], sizes = [3, 256], strides = [1, 1]} : vector<3x358xf32> to vector<3x256xf32>
    %557 = vector.broadcast %34 : f32 to vector<3x256xf32>
    %558 = arith.mulf %557, %556 : vector<3x256xf32>
    %559 = arith.addf %555, %558 : vector<3x256xf32>
    %560 = vector.extract_strided_slice %157 {offsets = [0, 86], sizes = [3, 256], strides = [1, 1]} : vector<3x358xf32> to vector<3x256xf32>
    %561 = vector.broadcast %41 : f32 to vector<3x256xf32>
    %562 = arith.mulf %561, %560 : vector<3x256xf32>
    %563 = arith.addf %559, %562 : vector<3x256xf32>
    %564 = vector.extract_strided_slice %157 {offsets = [0, 102], sizes = [3, 256], strides = [1, 1]} : vector<3x358xf32> to vector<3x256xf32>
    %565 = vector.broadcast %48 : f32 to vector<3x256xf32>
    %566 = arith.mulf %565, %564 : vector<3x256xf32>
    %567 = arith.addf %563, %566 : vector<3x256xf32>
    %cst_80 = arith.constant 0.000000e+00 : f32
    %568 = vector.broadcast %cst_80 : f32 to vector<3x256xf32>
    %569 = vector.extract_strided_slice %159 {offsets = [0, 6], sizes = [3, 256], strides = [1, 1]} : vector<3x358xf32> to vector<3x256xf32>
    %570 = vector.broadcast %55 : f32 to vector<3x256xf32>
    %571 = arith.mulf %570, %569 : vector<3x256xf32>
    %572 = arith.addf %568, %571 : vector<3x256xf32>
    %573 = vector.extract_strided_slice %159 {offsets = [0, 22], sizes = [3, 256], strides = [1, 1]} : vector<3x358xf32> to vector<3x256xf32>
    %574 = vector.broadcast %62 : f32 to vector<3x256xf32>
    %575 = arith.mulf %574, %573 : vector<3x256xf32>
    %576 = arith.addf %572, %575 : vector<3x256xf32>
    %577 = vector.extract_strided_slice %159 {offsets = [0, 38], sizes = [3, 256], strides = [1, 1]} : vector<3x358xf32> to vector<3x256xf32>
    %578 = vector.broadcast %69 : f32 to vector<3x256xf32>
    %579 = arith.mulf %578, %577 : vector<3x256xf32>
    %580 = arith.addf %576, %579 : vector<3x256xf32>
    %581 = vector.extract_strided_slice %159 {offsets = [0, 54], sizes = [3, 256], strides = [1, 1]} : vector<3x358xf32> to vector<3x256xf32>
    %582 = vector.broadcast %76 : f32 to vector<3x256xf32>
    %583 = arith.mulf %582, %581 : vector<3x256xf32>
    %584 = arith.addf %580, %583 : vector<3x256xf32>
    %585 = vector.extract_strided_slice %159 {offsets = [0, 70], sizes = [3, 256], strides = [1, 1]} : vector<3x358xf32> to vector<3x256xf32>
    %586 = vector.broadcast %83 : f32 to vector<3x256xf32>
    %587 = arith.mulf %586, %585 : vector<3x256xf32>
    %588 = arith.addf %584, %587 : vector<3x256xf32>
    %589 = vector.extract_strided_slice %159 {offsets = [0, 86], sizes = [3, 256], strides = [1, 1]} : vector<3x358xf32> to vector<3x256xf32>
    %590 = vector.broadcast %90 : f32 to vector<3x256xf32>
    %591 = arith.mulf %590, %589 : vector<3x256xf32>
    %592 = arith.addf %588, %591 : vector<3x256xf32>
    %593 = vector.extract_strided_slice %159 {offsets = [0, 102], sizes = [3, 256], strides = [1, 1]} : vector<3x358xf32> to vector<3x256xf32>
    %594 = vector.broadcast %97 : f32 to vector<3x256xf32>
    %595 = arith.mulf %594, %593 : vector<3x256xf32>
    %596 = arith.addf %592, %595 : vector<3x256xf32>
    %c6_81 = arith.constant 6 : index
    %c0_82 = arith.constant 0 : index
    %597 = vector.load %arg8[%c6_81, %c0_82] : memref<7x256xf32, #tpu.memory_space<vmem>>, vector<1x256xf32>
    %598 = arith.addf %567, %596 : vector<3x256xf32>
    %599 = vector.broadcast %597 : vector<1x256xf32> to vector<3x256xf32>
    %600 = arith.mulf %599, %598 : vector<3x256xf32>
    %601 = arith.addf %538, %600 : vector<3x256xf32>
    %602 = vector.broadcast %98 : f32 to vector<3x256xf32>
    %603 = arith.addf %601, %602 : vector<3x256xf32>
    %604 = arith.negf %603 : vector<3x256xf32>
    %605 = math.exp %604 : vector<3x256xf32>
    %cst_83 = arith.constant 1.000000e+00 : f32
    %606 = vector.broadcast %cst_83 : f32 to vector<3x256xf32>
    %607 = arith.addf %606, %605 : vector<3x256xf32>
    %608 = arith.divf %606, %607 : vector<3x256xf32>
    %c0_84 = arith.constant 0 : index
    %c0_85 = arith.constant 0 : index
    %c0_86 = arith.constant 0 : index
    %609 = vector.load %arg9[%c0_84, %c0_85, %c0_86] : memref<3x32x256xf32, #tpu.memory_space<vmem>>, vector<3x32x256xf32>
    %610 = vector.shape_cast %608 : vector<3x256xf32> to vector<3x1x256xf32>
    %611 = vector.broadcast %610 : vector<3x1x256xf32> to vector<3x32x256xf32>
    %612 = arith.mulf %609, %611 : vector<3x32x256xf32>
    %c0_87 = arith.constant 0 : index
    %c0_88 = arith.constant 0 : index
    %c0_89 = arith.constant 0 : index
    %613 = vector.load %arg9[%c0_87, %c0_88, %c0_89] : memref<3x32x256xf32, #tpu.memory_space<vmem>>, vector<3x32x256xf32>
    tpu.vector_store %arg9[%c0_87, %c0_88, %c0_89], %612 {strides = array<i32>} : memref<3x32x256xf32, #tpu.memory_space<vmem>>, vector<3x32x256xf32>,
    return
  }
  func.func @transform_0(%arg0: i32) -> (i32, i32, i32) {
    %c0_i32 = arith.constant 0 : i32
    %c0_i32_0 = arith.constant 0 : i32
    %c0_i32_1 = arith.constant 0 : i32
    return %arg0, %c0_i32, %c0_i32_0 : i32, i32, i32
  }
  func.func @transform_1(%arg0: i32) -> (i32, i32) {
    %c0_i32 = arith.constant 0 : i32
    %c0_i32_0 = arith.constant 0 : i32
    %c0_i32_1 = arith.constant 0 : i32
    return %c0_i32, %c0_i32_0 : i32, i32
  }
  func.func @transform_2(%arg0: i32) -> (i32, i32) {
    %c0_i32 = arith.constant 0 : i32
    %c0_i32_0 = arith.constant 0 : i32
    %c0_i32_1 = arith.constant 0 : i32
    return %c0_i32, %c0_i32_0 : i32, i32
  }
  func.func @transform_3(%arg0: i32) -> (i32, i32) {
    %c0_i32 = arith.constant 0 : i32
    %c0_i32_0 = arith.constant 0 : i32
    %c0_i32_1 = arith.constant 0 : i32
    return %c0_i32, %c0_i32_0 : i32, i32
  }
  func.func @transform_4(%arg0: i32) -> (i32, i32) {
    %c0_i32 = arith.constant 0 : i32
    %c0_i32_0 = arith.constant 0 : i32
    %c0_i32_1 = arith.constant 0 : i32
    return %c0_i32, %c0_i32_0 : i32, i32
  }
  func.func @transform_5(%arg0: i32) -> i32 {
    %c0_i32 = arith.constant 0 : i32
    %c0_i32_0 = arith.constant 0 : i32
    return %c0_i32 : i32
  }
  func.func @transform_6(%arg0: i32) -> i32 {
    %c0_i32 = arith.constant 0 : i32
    %c0_i32_0 = arith.constant 0 : i32
    return %c0_i32 : i32
  }
  func.func @transform_7(%arg0: i32) -> (i32, i32) {
    %c0_i32 = arith.constant 0 : i32
    %c0_i32_0 = arith.constant 0 : i32
    %c0_i32_1 = arith.constant 0 : i32
    return %c0_i32, %c0_i32_0 : i32, i32
  }
  func.func @transform_8(%arg0: i32) -> (i32, i32, i32) {
    %c0_i32 = arith.constant 0 : i32
    %c0_i32_0 = arith.constant 0 : i32
    %c0_i32_1 = arith.constant 0 : i32
    return %arg0, %c0_i32, %c0_i32_0 : i32, i32, i32
  }
}

</mosaic_0001>

<bundles_post_ra>
// kernel: tpu_custom_call.1
= control target key start
LH: loop header
LB: loop body
LE: loop exit
PB: predicated region body
PF: predicated region fallthrough
CT: control target
= control target key end

     0   :  { %s6408_s0 = inlined_call_operand.hbm [shape: f32[6,32,256], index: 0, kind: input, shape index: {}]   ;;  %s6409_s1 = inlined_call_operand.vmem [shape: f32[32,2], index: 1, kind: input, shape index: {}]   ;;  %s6410_s2 = inlined_call_operand.vmem [shape: f32[1,2], index: 2, kind: input, shape index: {}]   ;;  %s6411_s3 = inlined_call_operand.vmem [shape: f32[2,32], index: 3, kind: input, shape index: {}]   ;;  %s6412_s4 = inlined_call_operand.vmem [shape: f32[1,32], index: 4, kind: input, shape index: {}]   ;;  %s6413_s5 = inlined_call_operand.vmem [shape: f32[98], index: 5, kind: input, shape index: {}]   ;;  %s6414_s6 = inlined_call_operand.<no memory space> [shape: f32[1], index: 6, kind: input, shape index: {}]   ;;  %s6415_s7 = inlined_call_operand.vmem [shape: f32[7,256], index: 7, kind: input, shape index: {}]   ;;  %s6416_s8 = inlined_call_operand.hbm [shape: f32[6,32,256], index: 8, kind: output, shape index: {}]  }
   0x1   :  { %6694 = sst [smem:[#allocation183_spill]] %s6408_s0 }
   0x2   :  { %6695 = sst [smem:[#allocation184_spill]] %s6409_s1 }
   0x3   :  { %6696 = sst [smem:[#allocation185_spill]] %s6410_s2 }
   0x4   :  { %6697 = sst [smem:[#allocation186_spill]] %s6411_s3 }
   0x5   :  { %6698 = sst [smem:[#allocation187_spill]] %s6412_s4 }
   0x6   :  { %6699 = sst [smem:[#allocation188_spill]] %s6413_s5 }
   0x7   :  { %6700 = sst [smem:[#allocation189_spill]] %s6415_s7 }
   0x8   :  { %6701 = sst [smem:[#allocation190_spill]] %s6416_s8 }
   0x9   :  { %13 = sst [smem:[#allocation3]] %s6414_s6 }
   0xa   :  { %14 = vsyncpa [#allocation5], 0 }
   0xb   :  { %16 = vsyncpa [#allocation5 + $0x1], 0 }
   0xc   :  { %17 = vsyncpa [#allocation7], 0 }
   0xd   :  { %18 = vsyncpa [#allocation6], 0 }
   0xe   :  { %20 = vsyncpa [#allocation6 + $0x1], 0  ;;  %s3728_s29 = smov 0   ;;  %s3730_s30 = smov 0  }
   0xf   :  { %s3732_s9 = smov 0   ;;  %s3734_s10 = smov 0  }
  0x10 LB: > { %6702 = sst [smem:[#allocation13_spill]] %s3644_s29  ;;  %s3749_s6 = sadd.s32 4294967295, %s3656_s10   ;;  %s3656_s10 = sphi %s3734_s10, %s7226_s10   ;;  %s3652_s9 = sphi %s3732_s9, %s7229_s9   ;;  %s3648_s30 = sphi %s3730_s30, %s7228_s30   ;;  %s3644_s29 = sphi %s3728_s29, %s7227_s29  }
  0x11   : > { %6703 = sst [smem:[#allocation14_spill]] %s3648_s30  ;;  %s3316_s11 = sadd.s32 4294967294, %s3656_s10  }
  0x12   : > { %6704 = sst [smem:[#allocation15_spill]] %s3652_s9  ;;  %s3753_s12 = sadd.s32 1, %s3656_s10  }
  0x13   : > { %6705 = sst [smem:[#allocation16_spill]] %s3656_s10  ;;  %s33_s13 = sadd.s32 1, %s3652_s9 }
  0x14   : > { %6706 = sst [smem:[#allocation17_spill]] %s3749_s6  ;;  %s30_s14 = ssub.s32 %s3656_s10, %s3753_s12 }
  0x15   : > { %6707 = sst [smem:[#allocation18_spill]] %s3753_s12  ;;  %p40_p0 = scmp.ne.s32.totalorder %s3652_s9, %s3648_s30 }
  0x16   : > { %p31_p1 = scmp.eq.s32.totalorder %s30_s14, 0  ;;  %p41_p2 = scmp.eq.s32.totalorder %s3656_s10, 0 }
  0x17   : > { %p46_p3 = scmp.ne.s32.totalorder %s3648_s30, %s3644_s29  ;;  %p6418_p4 = scmp.eq.s32.totalorder %s3749_s6, 0 }
  0x18   : > { %s3765_s15 = scalar_select %p31_p1, %s3652_s9, %s33_s13  }
  0x19   : > { %p3767_p5 = por %p41_p2, %p40_p0  ;;  %p3773_p6 = por %p6418_p4, %p46_p3 }
  0x1a   : > { %6708 = sst [smem:[#allocation19_spill]] %s3765_s15  ;;  %p217_p7 = scmp.eq.s32.totalorder %s3749_s6, 1 }
  0x1b   : > { %s6710_s17 = scalar_select %p3773_p6, 1, 0 }
  0x1c   : > { %p223_p8 = scmp.eq.s32.totalorder %s3316_s11, 1  ;;  %p3317_p9 = scmp.ge.s32.totalorder %s3656_s10, 1 }
  0x1d   : > { %p230_p10 = scmp.lt.s32.totalorder %s3656_s10, 3  ;;  %p3780_p11 = por %p217_p7, %p40_p0 }
  0x1e   : > { %p3784_p12 = por %p223_p8, %p46_p3  ;;  %s6716_s5 = sld [smem:[#allocation188_spill]] }
  0x1f   : > { %s6711_s18 = scalar_select %p3780_p11, 1, 0 }
  0x20   : > { %s6713_s19 = scalar_select %p3784_p12, 1, 0 }
  0x21   : > { %6712 = sst [smem:[#allocation20_spill]] %s6711_s18  ;;  %p3788_p13 = pnand %p3317_p9, %p230_p10 }
  0x22   : > { %6714 = sst [smem:[#allocation21_spill]] %s6713_s19  ;;  %p3467_p2 = scmp.lt.s32.totalorder %s3656_s10, 2 }
  0x23   : > { %s6715_s20 = scalar_select %p3788_p13, 1, 0 }
  0x24   : > { %s255_s23 = sshll.u32 %s6716_s5, 4  ;;  %p3454_p1 = pneg %p3788_p13  ;;  %s256_s23 = int_to_ptr.vmem [resolvable:$true] %s255_s23 }
  0x25   : > { %s272_s25 = sand.u32 1, %s3652_s9   ;;  %p3808_p3 = pnand %p3467_p2, %p3767_p5 }
  0x26   : > { %p3801_p7 = pnand %p3454_p1, %p6418_p4  ;;  %s3444_s27 = smul.u32 192, %s272_s25 }
  0x27   : > { %s3545_s28 = scalar_lea.vmem %s256_s23, 16  ;;  %p3553_p12 = scmp.lt.s32.totalorder %s256_s23, %s256_s23 }
  0x28   : > { %p3546_p8 = scmp.ne.s32.totalorder %s256_s23, %s3545_s28  ;;  %p3547_p9 = pneg %p3801_p7 }
  0x29   : > { %p3554_p11 = scmp.lt.s32.totalorder %s3545_s28, %s3545_s28 }
  0x2a   : > { %p3548_p10 = pnand %p3547_p9, %p3546_p8 }
  0x2b   : > { %p3555_p1 = por %p3554_p11, %p3553_p12 }
  0x2c   : > { %p3549_p0 = pneg %p3548_p10 }
  0x2e   : > { %p3556_p4 = pnand %p3555_p1, %p3549_p0 }
  0x30   : > { %3559 = shalt.err (!%p3556_p4)
}
  0x31   : > { %s3658_s11 = smov [#allocation8]   ;;  %s3442_s13 = smul.u32 3072, %s3656_s10 }
  0x32   : > { %3457 = dma.vmem_to_smem (!%p3801_p7), %s256_s23, 16, %s3658_s11, [#allocation7]  }
  0x33   : > { %s276_s14 = scalar_lea.vmem [#allocation4], %s3444_s27  ;;  %s6719_s0 = sld [smem:[#allocation183_spill]] }
  0x34   : > { %s284_s16 = sshll.u32 %s276_s14, 4  ;;  %s3824_s28 = scalar_lea.sflag [#allocation5], %s272_s25  ;;  %s3817_s16 = int_to_ptr.vmem [resolvable:$true] %s284_s16 }
  0x35   : > { %p3562_p5 = pneg %p3808_p3 }
  0x39   : > { %s3822_s5 = scalar_lea.hbm %s6719_s0, %s3442_s13  ;;  %s3565_s27 = scalar_lea.hbm %s6719_s0, 6144 }
  0x3a   : > { %s3560_s15 = scalar_lea.hbm %s3822_s5, 3072  ;;  %p3566_p0 = scmp.lt.s32.totalorder %s3822_s5, %s6719_s0 }
  0x3b   : > { %p3561_p4 = scmp.ne.s32.totalorder %s3822_s5, %s3560_s15  ;;  %p3567_p2 = scmp.lt.s32.totalorder %s3565_s27, %s3560_s15 }
  0x3d   : > { %p3563_p11 = pnand %p3562_p5, %p3561_p4  ;;  %p3568_p7 = por %p3567_p2, %p3566_p0 }
  0x3f   : > { %p3564_p12 = pneg %p3563_p11 }
  0x41   : > { %p3569_p8 = pnand %p3568_p7, %p3564_p12 }
  0x43   : > { %3572 = shalt.err (!%p3569_p8)
}
  0x44   : > { %s3573_s25 = scalar_lea.vmem %s3817_s16, 3072  ;;  %s3659_s13 = smov [#allocation4]  }
  0x45   : > { %p3574_p9 = scmp.ne.s32.totalorder %s3817_s16, %s3573_s25  ;;  %s3578_s21 = sshll.u32 %s3659_s13, 4  ;;  %s3579_s21 = int_to_ptr.vmem [resolvable:$false] %s3578_s21 }
  0x46   : > { %s3580_s22 = scalar_lea.vmem %s3579_s21, 6144  ;;  %p3581_p4 = scmp.lt.s32.totalorder %s3817_s16, %s3579_s21 }
  0x47   : > { %p3576_p10 = pnand %p3574_p9, %p3562_p5  ;;  %p3582_p11 = scmp.lt.s32.totalorder %s3580_s22, %s3573_s25 }
  0x49   : > { %p3577_p1 = pneg %p3576_p10  ;;  %p3583_p6 = por %p3582_p11, %p3581_p4 }
  0x4b   : > { %p3584_p13 = pnand %p3583_p6, %p3577_p1 }
  0x4d   : > { %3587 = shalt.err (!%p3584_p13)
}
  0x4e   : > { %s3660_s15 = smov 256   ;;  %s3661_s23 = smov 16  }
  0x4f   : > { %3461 = dma.hbm_to_vmem [thread:$0]  (!%p3808_p3), %s3822_s5, 3072, %s3817_s16, %s3824_s28, %s3660_s15, %s3660_s15, %s3661_s23  }
  0x50   : > { %p6720_p5 = scmp.ne.s32.totalorder %s6715_s20, 0 }
  0x52   : > { %296 = sbr.rel (%p6720_p5) target bundleno = 1595 (0x63b), region = 52 }
  0x57   : > { %s3848_s24 = sand.u32 1, %s3648_s30   ;;  %p6722_p6 = scmp.ne.s32.totalorder %s6710_s17, 0 }
  0x58   : > { %6721 = sst [smem:[#allocation22_spill]] %s3848_s24  ;;  %s6421_s27 = smul.u32 192, %s3848_s24 }
  0x59   : > { %s299_s11 = scalar_lea.sflag [#allocation5], %s3848_s24 }
  0x5a   : > { %s3854_s14 = scalar_lea.vmem [#allocation4], %s6421_s27 }
  0x5b   : > { %3631 = dma.done.wait (%p6722_p6), %s299_s11, 3072  }
  0x5c   : > { %3633 = vsyncadd (%p6722_p6), %s299_s11, 4294964224  ;;  %p6723_p13 = scmp.eq.s32.totalorder %s3749_s6, 0 }
  0x5e   : > { %3635 = dma.done.wait (%p6723_p13), [#allocation7], 16   ;;  %p6724_p3 = pmov %p6723_p13 }
  0x60   : > { %3637 = vsyncadd (%p6724_p3), [#allocation7], 4294967280 }
  0x61   : > { %311 = sfence }
  0x62   : > { %v3865_v0 = vld [vmem:[%s3854_s14 + $0x40] sm:$0xff]  ;;  %v3868_v1 = vld [vmem:[%s3854_s14 + $0x48] sm:$0xff]  ;;  %v3879_v5 = vld [vmem:[%s3854_s14 + $0x50] sm:$0xff]  ;;  %v567_v58 = vlaneseq  ;;  %vm578_vm0 = vcmask 130112   ;;  %vm585_vm1 = vcmask 195712   ;;  %vm592_vm2 = vcmask 261312  }
  0x63   : > { %v3871_v2 = vld [vmem:[%s3854_s14] sm:$0xff]  ;;  %v483_v3 = vadd.f32 %v3868_v1, %v3865_v0  ;;  %v3876_v4 = vld [vmem:[%s3854_s14 + $0x8] sm:$0xff]  ;;  %v3882_v6 = vld [vmem:[%s3854_s14 + $0x58] sm:$0xff]  ;;  %v531_v34 = vmax.f32 %v3865_v0, %v3868_v1  ;;  %vm632_vm3 = vcmask 1041409   ;;  %vm706_vm4 = vcmask 1044484   ;;  %s6728_s1 = sld [smem:[#allocation184_spill]] }
  0x64   : > { %v471_v7 = vadd.f32 %v3876_v4, %v3871_v2  ;;  %v3887_v8 = vld [vmem:[%s3854_s14 + $0x10] sm:$0xff]  ;;  %v3890_v9 = vld [vmem:[%s3854_s14 + $0x18] sm:$0xff]  ;;  %v486_v10 = vadd.f32 %v3882_v6, %v3879_v5  ;;  %v3897_v12 = vld [vmem:[%s3854_s14 + $0x60] sm:$0xff]  ;;  %v519_v32 = vmax.f32 %v3871_v2, %v3876_v4  ;;  %v534_v39 = vmax.f32 %v3879_v5, %v3882_v6  ;;  %s6729_s2 = sld [smem:[#allocation185_spill]]  ;;  %s3663_s5 = smov 51  }
  0x65   : > { %484 = vadd.xlane.f32.xlu1 %v483_v3  ;;  %v474_v11 = vadd.f32 %v3890_v9, %v3887_v8  ;;  %v3900_v13 = vld [vmem:[%s3854_s14 + $0x68] sm:$0xff]  ;;  %v3903_v14 = vld [vmem:[%s3854_s14 + $0x20] sm:$0xff]  ;;  %v3913_v18 = vld [vmem:[%s3854_s14 + $0x90] sm:$0xff]  ;;  %v522_v35 = vmax.f32 %v3887_v8, %v3890_v9  ;;  %v568_v61 = vand.u32 127, %v567_v58  ;;  %vm634_vm5 = vcmask 1042434   ;;  %s6730_s3 = sld [smem:[#allocation186_spill]] }
  0x66   : > { %472 = vadd.xlane.f32.xlu0 %v471_v7  ;;  %v3906_v15 = vld [vmem:[%s3854_s14 + $0x28] sm:$0xff]  ;;  %v489_v16 = vadd.f32 %v3900_v13, %v3897_v12  ;;  %v3916_v19 = vld [vmem:[%s3854_s14 + $0x98] sm:$0xff]  ;;  %v3919_v20 = vld [vmem:[%s3854_s14 + $0x80] sm:$0xff]  ;;  %v537_v40 = vmax.f32 %v3897_v12, %v3900_v13  ;;  %vm708_vm6 = vcmask 1045509   ;;  %vm711_vm7 = vcmask 1042432   ;;  %s6731_s4 = sld [smem:[#allocation187_spill]] }
  0x67   : > { %v477_v17 = vadd.f32 %v3906_v15, %v3903_v14  ;;  %v3922_v21 = vld [vmem:[%s3854_s14 + $0x88] sm:$0xff]  ;;  %v498_v22 = vadd.f32 %v3916_v19, %v3913_v18  ;;  %v3929_v24 = vld [vmem:[%s3854_s14 + $0x70] sm:$0xff]  ;;  %v3932_v25 = vld [vmem:[%s3854_s14 + $0x78] sm:$0xff]  ;;  %v525_v41 = vmax.f32 %v3903_v14, %v3906_v15  ;;  %v546_v42 = vmax.f32 %v3913_v18, %v3916_v19  ;;  %s4274_s17 = sld [smem:[#allocation8 + $0x38]]  ;;  %s6430_s30 = smov 96  }
  0x68   : > { %v495_v23 = vadd.f32 %v3922_v21, %v3919_v20  ;;  %v3935_v26 = vld [vmem:[%s3854_s14 + $0x30] sm:$0xff]  ;;  %v3938_v27 = vld [vmem:[%s3854_s14 + $0x38] sm:$0xff]  ;;  %v492_v28 = vadd.f32 %v3932_v25, %v3929_v24  ;;  %v3945_v30 = vld [vmem:[%s3854_s14 + $0xa0] sm:$0xff]  ;;  %v543_v43 = vmax.f32 %v3919_v20, %v3922_v21  ;;  %v540_v44 = vmax.f32 %v3929_v24, %v3932_v25  ;;  %s4276_s20 = sld [smem:[#allocation8 + $0x3a]]  ;;  %s6444_s24 = smov 64  }
  0x69   : > { %487 = vadd.xlane.f32.xlu1 %v486_v10  ;;  %v480_v29 = vadd.f32 %v3938_v27, %v3935_v26  ;;  %v3948_v31 = vld [vmem:[%s3854_s14 + $0xa8] sm:$0xff]  ;;  %v3959_v36 = vld [vmem:[%s3854_s14 + $0xb0] sm:$0xff]  ;;  %v3962_v37 = vld [vmem:[%s3854_s14 + $0xb8] sm:$0xff]  ;;  %v528_v45 = vmax.f32 %v3935_v26, %v3938_v27  ;;  %v573_v3 = vadd.s32 4294967288, %v568_v61  ;;  %v580_v7 = vadd.s32 4294967280, %v568_v61  ;;  %s4278_s26 = sld [smem:[#allocation8 + $0x3f]] }
  0x6a   : > { %475 = vadd.xlane.f32.xlu0 %v474_v11  ;;  %v501_v33 = vadd.f32 %v3948_v31, %v3945_v30  ;;  %v504_v38 = vadd.f32 %v3962_v37, %v3959_v36  ;;  %v552_v46 = vmax.f32 %v3959_v36, %v3962_v37  ;;  %v549_v47 = vmax.f32 %v3945_v30, %v3948_v31  ;;  %s4280_s16 = sld [smem:[#allocation8 + $0x41]] }
  0x6b   : > { %v3990_v10 = vshrl.u32 %v567_v58, 7  ;;  %vm855_vm8 = vcmask 15360   ;;  %vm1002_vm9 = vcmask 254976   ;;  %vm441_vm10 = vcmask 411648   ;;  %s4286_s28 = sld [smem:[#allocation8 + $0x46]] }
  0x6c   : > { %vm444_vm11 = vcmask 829848   ;;  %vm1336_vm12 = vcmask 1046534   ;;  %vm1345_vm13 = vcmask 1042840   ;;  %vm1346_vm14 = vcmask 1046532   ;;  %s4288_s25 = sld [smem:[#allocation8 + $0x48]] }
  0x6d   : > { %490 = vadd.xlane.f32.xlu1 %v489_v16  ;;  %6725 = vst [vmem:[#allocation23_spill] sm:$0xff] %v3990_v10  ;;  %6756 = sst [smem:[#allocation50_spill]] %s4274_s17  ;;  %vm1341_vm15 = vcmask 416768  }
  0x6e   : > { %478 = vadd.xlane.f32.xlu0 %v477_v17  ;;  %v3993_v17 = vsub.s32 %v573_v3, %v3990_v10  ;;  %6757 = sst [smem:[#allocation51_spill]] %s4276_s20 }
  0x6f   : > { %6758 = sst [smem:[#allocation52_spill]] %s4278_s26 }
  0x70   : > { %6759 = sst [smem:[#allocation53_spill]] %s4280_s16 }
  0x71   : > { %499 = vadd.xlane.f32.xlu1 %v498_v22  ;;  %6762 = sst [smem:[#allocation54_spill]] %s4286_s28 }
  0x72   : > { %496 = vadd.xlane.f32.xlu0 %v495_v23  ;;  %6763 = sst [smem:[#allocation55_spill]] %s4288_s25 }
  0x73   : > { %s4292_s13 = sld [smem:[#allocation8 + $0x4d]] }
  0x74   : > { %s4296_s21 = sld [smem:[#allocation8 + $0x4f]] }
  0x75   : > { %493 = vadd.xlane.f32.xlu1 %v492_v28  ;;  %v3996_v28 = vsub.s32 %v580_v7, %v3990_v10  ;;  %s4298_s22 = sld [smem:[#allocation8 + $0x54]] }
  0x76   : > { %481 = vadd.xlane.f32.xlu0 %v480_v29  ;;  %s4300_s15 = sld [smem:[#allocation8 + $0x56]] }
  0x77   : > { %s4302_s23 = sld [smem:[#allocation8 + $0x5b]] }
  0x78   : > { %s4306_s11 = sld [smem:[#allocation8 + $0x5d]] }
  0x79   : > { %520 = vmax.xlane.f32.xlu1 %v519_v32  ;;  %v587_v32 = vadd.s32 4294967272, %v568_v61  ;;  %6764 = sst [smem:[#allocation56_spill]] %s4292_s13 }
  0x7a   : > { %502 = vadd.xlane.f32.xlu0 %v501_v33  ;;  %v3999_v33 = vsub.s32 %v568_v61, %v3990_v10  ;;  %6765 = sst [smem:[#allocation57_spill]] %s4296_s21 }
  0x7b   : > { %6766 = sst [smem:[#allocation58_spill]] %s4298_s22 }
  0x7c   : > { %6767 = sst [smem:[#allocation59_spill]] %s4300_s15 }
  0x7d   : > { %532 = vmax.xlane.f32.xlu1 %v531_v34  ;;  %6768 = sst [smem:[#allocation60_spill]] %s4302_s23 }
  0x7e   : > { %523 = vmax.xlane.f32.xlu0 %v522_v35  ;;  %6769 = sst [smem:[#allocation61_spill]] %s4306_s11 }
  0x7f   : > { %s4308_s14 = sld [smem:[#allocation8 + $0x39]] }
  0x80   : > { %s4320_s27 = sld [smem:[#allocation8 + $0x40]] }
  0x81   : > { %505 = vadd.xlane.f32.xlu1 %v504_v38  ;;  %s4326_s0 = sld [smem:[#allocation8 + $0x42]] }
  0x82   : > { %535 = vmax.xlane.f32.xlu0 %v534_v39  ;;  %s4346_s9 = sld [smem:[#allocation8 + $0x57]] }
  0x83   : > { %s4352_s12 = sld [smem:[#allocation8 + $0x51]] }
  0x84   : > { %s4360_s10 = sld [smem:[#allocation8 + $0x53]] }
  0x85   : > { %538 = vmax.xlane.f32.xlu1 %v537_v40  ;;  %6770 = sst [smem:[#allocation62_spill]] %s4308_s14 }
  0x86   : > { %526 = vmax.xlane.f32.xlu0 %v525_v41  ;;  %6772 = sst [smem:[#allocation64_spill]] %s4320_s27 }
  0x87   : > { %6773 = sst [smem:[#allocation65_spill]] %s4326_s0 }
  0x88   : > { %s4364_s19 = sld [smem:[#allocation8 + $0x4b]] }
  0x89   : > { %547 = vmax.xlane.f32.xlu1 %v546_v42  ;;  %s4368_s29 = sld [smem:[#allocation8 + $0x60]] }
  0x8a   : > { %544 = vmax.xlane.f32.xlu0 %v543_v43  ;;  %s4370_s18 = sld [smem:[#allocation8 + $0x45]] }
  0x8b   : > { %s4378_s8 = sld [smem:[#allocation8 + $0x5a]] }
  0x8c   : > { %s4389_s6 = sld [smem:[#allocation8 + $0x4e]] }
  0x8d   : > { %541 = vmax.xlane.f32.xlu1 %v540_v44  ;;  %s4392_s7 = sld [smem:[#allocation8 + $0x49]] }
  0x8e   : > { %529 = vmax.xlane.f32.xlu0 %v528_v45  ;;  %v590_v45 = vsub.s32 %v587_v32, %v3990_v10  ;;  %6775 = sst [smem:[#allocation67_spill]] %s4364_s19 }
  0x8f   : > { %6776 = sst [smem:[#allocation68_spill]] %s4368_s29 }
  0x90   : > { %6777 = sst [smem:[#allocation69_spill]] %s4370_s18 }
  0x91   : > { %553 = vmax.xlane.f32.xlu1 %v552_v46  ;;  %6778 = sst [smem:[#allocation70_spill]] %s4378_s8 }
  0x92   : > { %550 = vmax.xlane.f32.xlu0 %v549_v47  ;;  %6780 = sst [smem:[#allocation72_spill]] %s4389_s6 }
  0x93   : > { %6781 = sst [smem:[#allocation73_spill]] %s4392_s7 }
  0xee   : > { %v485_v48 = vpop.xlane.xlu1 %484 }
  0xef   : > { %v473_v49 = vpop.xlane.xlu0 %472  ;;  %v511_v34 = vmul.f32 0.00390625, %v485_v48 }
  0xf0   : > { %v507_v35 = vmul.f32 0.00390625, %v473_v49 }
  0xf1   : > { %v597_v46 = vrot.slane %v511_v34, %v3999_v33 }
  0xf2   : > { %v488_v50 = vpop.xlane.xlu1 %487  ;;  %v572_v47 = vrot.slane %v507_v35, %v3999_v33 }
  0xf3   : > { %v476_v51 = vpop.xlane.xlu0 %475  ;;  %v512_v22 = vmul.f32 0.00390625, %v488_v50 }
  0xf4   : > { %v508_v23 = vmul.f32 0.00390625, %v476_v51 }
  0xf5   : > { %v601_v40 = vrot.slane %v512_v22, %v3993_v17 }
  0xf6   : > { %v491_v52 = vpop.xlane.xlu1 %490  ;;  %v577_v41 = vrot.slane %v508_v23, %v3993_v17 }
  0xf7   : > { %v479_v53 = vpop.xlane.xlu0 %478  ;;  %v513_v29 = vmul.f32 0.00390625, %v491_v52  ;;  %v602_v58 = vsel %vm578_vm0, %v601_v40, %v597_v46 }
  0xf8   : > { %v509_v43 = vmul.f32 0.00390625, %v479_v53  ;;  %v579_v61 = vsel %vm578_vm0, %v577_v41, %v572_v47 }
  0xf9   : > { %v606_v42 = vrot.slane %v513_v29, %v3996_v28 }
  0xfa   : > { %v500_v54 = vpop.xlane.xlu1 %499 }
  0xfb   : > { %v497_v55 = vpop.xlane.xlu0 %496  ;;  %v516_v44 = vmul.f32 0.00390625, %v500_v54  ;;  %v607_v53 = vsel %vm585_vm1, %v606_v42, %v602_v58  ;;  %v584_v54 = vrot.slane %v509_v43, %v3996_v28 }
  0xfc   : > { %v515_v48 = vmul.f32 0.00390625, %v497_v55 }
  0xfd   : > { %v620_v7 = vrot.slane %v516_v44, %v3993_v17 }
  0xfe   : > { %v494_v56 = vpop.xlane.xlu1 %493  ;;  %v616_v55 = vrot.slane %v515_v48, %v3999_v33 }
  0xff   : > { %v482_v57 = vpop.xlane.xlu0 %481  ;;  %v514_v49 = vmul.f32 0.00390625, %v494_v56 }
 0x100   : > { %v510_v51 = vmul.f32 0.00390625, %v482_v57 }
 0x101   : > { %v611_v56 = vrot.slane %v514_v49, %v590_v45 }
 0x102   : > { %v3984_v59 = vpop.xlane.xlu1 %520  ;;  %v591_v32 = vrot.slane %v510_v51, %v590_v45 }
 0x103   : > { %v503_v60 = vpop.xlane.xlu0 %502 }
 0x104   : > { %v517_v3 = vmul.f32 0.00390625, %v503_v60  ;;  %v652_v60 = vrot.slane %v3984_v59, %v3999_v33  ;;  %v621_v59 = vsel %vm578_vm0, %v620_v7, %v616_v55  ;;  %v4041_v7 = vsub.s32 1, %v3990_v10 }
 0x106   : > { %v3986_v62 = vpop.xlane.xlu1 %532  ;;  %6726 = vst [vmem:[#allocation24_spill] sm:$0xff] %v4041_v7 }
 0x107   : > { %v3988_v63 = vpop.xlane.xlu0 %523  ;;  %v671_v41 = vrot.slane %v3986_v62, %v3999_v33 }
 0x108   : > { %v656_v57 = vrot.slane %v3988_v63, %v3993_v17  ;;  %v586_v63 = vsel %vm585_vm1, %v584_v54, %v579_v61 }
 0x109   : > { %v593_v62 = vsel %vm592_vm2, %v591_v32, %v586_v63  ;;  %v791_v32 = vsub.s32 4, %v3990_v10 }
 0x10a   : > { %v506_v11 = vpop.xlane.xlu1 %505 }
 0x10b   : > { %v536_v16 = vpop.xlane.xlu0 %535  ;;  %v518_v22 = vmul.f32 0.00390625, %v506_v11  ;;  %v625_v11 = vrot.slane %v517_v3, %v3996_v28 }
 0x10c   : > { %v675_v23 = vrot.slane %v536_v16, %v3993_v17 }
 0x10d   : > { %v630_v16 = vrot.slane %v518_v22, %v590_v45 }
 0x10e   : > { %v539_v38 = vpop.xlane.xlu1 %538  ;;  %v676_v47 = vsel %vm578_vm0, %v675_v23, %v671_v41  ;;  %v4049_v23 = vsub.s32 0, %v3990_v10 }
 0x10f   : > { %v527_v39 = vpop.xlane.xlu0 %526  ;;  %v680_v34 = vrot.slane %v539_v38, %v3996_v28  ;;  %v612_v38 = vsel %vm592_vm2, %v611_v56, %v607_v53 }
 0x110   : > { %v661_v35 = vrot.slane %v527_v39, %v3996_v28  ;;  %v657_v39 = vsel %vm578_vm0, %v656_v57, %v652_v60  ;;  %6727 = vst [vmem:[#allocation25_spill] sm:$0xff] %v4049_v23 }
 0x111   : > { %v681_v49 = vsel %vm585_vm1, %v680_v34, %v676_v47 }
 0x112   : > { %v548_v50 = vpop.xlane.xlu1 %547  ;;  %v662_v51 = vsel %vm585_vm1, %v661_v35, %v657_v39  ;;  %v753_v35 = vsub.s32 2, %v3990_v10 }
 0x113   : > { %v545_v52 = vpop.xlane.xlu0 %544  ;;  %v694_v44 = vrot.slane %v548_v50, %v3993_v17  ;;  %v626_v17 = vsel %vm585_vm1, %v625_v11, %v621_v59  ;;  %v772_v11 = vsub.s32 3, %v3990_v10 }
 0x114   : > { %v690_v46 = vrot.slane %v545_v52, %v3999_v33  ;;  %v631_v3 = vsel %vm592_vm2, %v630_v16, %v626_v17  ;;  %v4070_v17 = vld [vmem:[%s6728_s1 + $0x10] sm:$0xff] }
 0x116   : > { %v542_v29 = vpop.xlane.xlu1 %541  ;;  %v695_v53 = vsel %vm578_vm0, %v694_v44, %v690_v46  ;;  %vm4282_vm0 = vmor %vm1346_vm14, %vm1345_vm13  ;;  %vm2817_vm13 = vcmask 1006592  }
 0x117   : > { %v530_v40 = vpop.xlane.xlu0 %529  ;;  %v685_v42 = vrot.slane %v542_v29, %v590_v45 }
 0x118   : > { %v666_v43 = vrot.slane %v530_v40, %v590_v45 }
 0x119   : > { %v686_v33 = vsel %vm592_vm2, %v685_v42, %v681_v49  ;;  %v810_v42 = vsub.s32 5, %v3990_v10 }
 0x11a   : > { %v554_v48 = vpop.xlane.xlu1 %553  ;;  %v667_v50 = vsel %vm592_vm2, %v666_v43, %v662_v51 }
 0x11b   : > { %v551_v58 = vpop.xlane.xlu0 %550  ;;  %v704_v61 = vrot.slane %v554_v48, %v590_v45  ;;  %v633_v45 = vsel %vm632_vm3, %v612_v38, %v593_v62  ;;  %v707_v22 = vsel %vm706_vm4, %v686_v33, %v667_v50  ;;  %vm1426_vm4 = vcmask 654336  }
 0x11c   : > { %v699_v52 = vrot.slane %v551_v58, %v3996_v28  ;;  %v635_v28 = vsel %vm634_vm5, %v631_v3, %v633_v45  ;;  %v828_v58 = vld [vmem:[%s6728_s1 + $0x8] sm:$0xff] }
 0x11e   : > { %v700_v54 = vsel %vm585_vm1, %v699_v52, %v695_v53  ;;  %vm1392_vm1 = vcmask 1043456  }
 0x11f   : > { %v705_v55 = vsel %vm592_vm2, %v704_v61, %v700_v54  ;;  %v4065_v61 = vld [vmem:[%s6728_s1] sm:$0xff]  ;;  %vm1394_vm2 = vcmask 916480  }
 0x120   : > { %v709_v56 = vsel %vm708_vm6, %v705_v55, %v707_v22 }
 0x121   : > { %v712_v57 = vsel %vm711_vm7, %v635_v28, %v709_v56  ;;  %vm1474_vm7 = vcmask 261120  }
 0x122   : > { %v735_v29 = vrot.slane %v712_v57, %v4041_v7  ;;  %v792_v60 = vrot.slane %v712_v57, %v791_v32  ;;  %v716_v34 = vrot.slane %v712_v57, %v4049_v23  ;;  %v754_v40 = vrot.slane %v712_v57, %v753_v35 }
 0x123   : > { %v773_v41 = vrot.slane %v712_v57, %v772_v11  ;;  %v811_v43 = vrot.slane %v712_v57, %v810_v42 }
 0x124   : > { %741 = vbcast.lane.b32.xlu1 %v735_v29, 264  ;;  %737 = vbcast.lane.b32.xlu0 %v735_v29, 256 }
 0x128   : > { %794 = vbcast.lane.b32.xlu1 %v792_v60, 256  ;;  %718 = vbcast.lane.b32.xlu0 %v716_v34, 256 }
 0x12c   : > { %798 = vbcast.lane.b32.xlu1 %v792_v60, 264  ;;  %745 = vbcast.lane.b32.xlu0 %v735_v29, 272 }
 0x130   : > { %722 = vbcast.lane.b32.xlu1 %v716_v34, 264  ;;  %760 = vbcast.lane.b32.xlu0 %v754_v40, 264 }
 0x134   : > { %756 = vbcast.lane.b32.xlu1 %v754_v40, 256  ;;  %779 = vbcast.lane.b32.xlu0 %v773_v41, 264 }
 0x138   : > { %775 = vbcast.lane.b32.xlu1 %v773_v41, 256  ;;  %813 = vbcast.lane.b32.xlu0 %v811_v43, 256 }
 0x13c   : > { %802 = vbcast.lane.b32.xlu1 %v792_v60, 272  ;;  %726 = vbcast.lane.b32.xlu0 %v716_v34, 272 }
 0x140   : > { %817 = vbcast.lane.b32.xlu1 %v811_v43, 264  ;;  %764 = vbcast.lane.b32.xlu0 %v754_v40, 272 }
 0x144   : > { %749 = vbcast.lane.b32.xlu1 %v735_v29, 280  ;;  %806 = vbcast.lane.b32.xlu0 %v792_v60, 280 }
 0x148   : > { %783 = vbcast.lane.b32.xlu1 %v773_v41, 272  ;;  %730 = vbcast.lane.b32.xlu0 %v716_v34, 280  ;;  %v4083_v34 = vld [vmem:[%s6728_s1 + $0x18] sm:$0xff]  ;;  %s6424_s1 = smov 112  }
 0x14c   : > { %821 = vbcast.lane.b32.xlu1 %v811_v43, 272  ;;  %787 = vbcast.lane.b32.xlu0 %v773_v41, 280 }
 0x150   : > { %768 = vbcast.lane.b32.xlu1 %v754_v40, 280 }
 0x154   : > { %825 = vbcast.lane.b32.xlu1 %v811_v43, 280 }
 0x196   : > { %v742_v63 = vpop.permute.xlu1 %741  ;;  %v738_v16 = vpop.permute.xlu0 %737 }
 0x197   : > { %v836_v52 = vmul.f32 %v828_v58, %v742_v63  ;;  %v835_v3 = vmul.f32 %v4065_v61, %v738_v16 }
 0x199   : > { %v870_v56 = vsel %vm855_vm8, %v836_v52, 0.0  ;;  %v869_v57 = vsel %vm855_vm8, %v835_v3, 0.0 }
 0x19a   : > { %v795_v44 = vpop.permute.xlu1 %794  ;;  %v719_v46 = vpop.permute.xlu0 %718  ;;  %v871_v42 = vadd.f32 %v870_v56, %v869_v57 }
 0x19b   : > { %v847_v54 = vmul.f32 %v4065_v61, %v795_v44  ;;  %v831_v60 = vmul.f32 %v4065_v61, %v719_v46 }
 0x19d   : > { %v908_v35 = vsel %vm855_vm8, %v847_v54, 0.0 }
 0x19e   : > { %v799_v59 = vpop.permute.xlu1 %798  ;;  %v746_v38 = vpop.permute.xlu0 %745 }
 0x19f   : > { %v848_v53 = vmul.f32 %v828_v58, %v799_v59  ;;  %v837_v45 = vmul.f32 %v4070_v17, %v746_v38 }
 0x1a1   : > { %v909_v29 = vsel %vm855_vm8, %v848_v53, 0.0  ;;  %v872_v40 = vsel %vm855_vm8, %v837_v45, 0.0 }
 0x1a2   : > { %v723_v39 = vpop.permute.xlu1 %722  ;;  %v761_v47 = vpop.permute.xlu0 %760  ;;  %v910_v43 = vadd.f32 %v909_v29, %v908_v35  ;;  %v873_v52 = vadd.f32 %v872_v40, %v871_v42 }
 0x1a3   : > { %v832_v32 = vmul.f32 %v828_v58, %v723_v39  ;;  %v840_v59 = vmul.f32 %v828_v58, %v761_v47 }
 0x1a5   : > { %v857_v46 = vsel %vm855_vm8, %v832_v32, 0.0 }
 0x1a6   : > { %v757_v48 = vpop.permute.xlu1 %756  ;;  %v780_v62 = vpop.permute.xlu0 %779 }
 0x1a7   : > { %v844_v3 = vmul.f32 %v828_v58, %v780_v62 }
 0x1a9   : > { %v896_v40 = vsel %vm855_vm8, %v844_v3, 0.0 }
 0x1aa   : > { %v776_v49 = vpop.permute.xlu1 %775  ;;  %v4057_v51 = vpop.permute.xlu0 %813 }
 0x1ab   : > { %v843_v63 = vmul.f32 %v4065_v61, %v776_v49 }
 0x1ad   : > { %v895_v47 = vsel %vm855_vm8, %v843_v63, 0.0 }
 0x1ae   : > { %v803_v33 = vpop.permute.xlu1 %802  ;;  %v727_v50 = vpop.permute.xlu0 %726  ;;  %v897_v63 = vadd.f32 %v896_v40, %v895_v47 }
 0x1af   : > { %v849_v22 = vmul.f32 %v4070_v17, %v803_v33  ;;  %v833_v41 = vmul.f32 %v4070_v17, %v727_v50  ;;  %v856_v33 = vsel %vm855_vm8, %v831_v60, 0.0  ;;  %v839_v50 = vmul.f32 %v4065_v61, %v757_v48 }
 0x1b0   : > { %v883_v60 = vsel %vm855_vm8, %v840_v59, 0.0 }
 0x1b1   : > { %v911_v11 = vsel %vm855_vm8, %v849_v22, 0.0  ;;  %v859_v54 = vsel %vm855_vm8, %v833_v41, 0.0  ;;  %v858_v22 = vadd.f32 %v857_v46, %v856_v33 }
 0x1b2   : > { %v818_v55 = vpop.permute.xlu1 %817  ;;  %v765_v28 = vpop.permute.xlu0 %764  ;;  %v912_v53 = vadd.f32 %v911_v11, %v910_v43  ;;  %v882_v43 = vsel %vm855_vm8, %v839_v50, 0.0 }
 0x1b3   : > { %v841_v62 = vmul.f32 %v4070_v17, %v765_v28  ;;  %v860_v11 = vadd.f32 %v859_v54, %v858_v22  ;;  %v852_v46 = vmul.f32 %v828_v58, %v818_v55  ;;  %v884_v47 = vadd.f32 %v883_v60, %v882_v43 }
 0x1b5   : > { %v885_v3 = vsel %vm855_vm8, %v841_v62, 0.0  ;;  %v922_v55 = vsel %vm855_vm8, %v852_v46, 0.0 }
 0x1b6   : > { %v750_v16 = vpop.permute.xlu1 %749  ;;  %v807_v44 = vpop.permute.xlu0 %806 }
 0x1b7   : > { %v838_v38 = vmul.f32 %v4083_v34, %v750_v16  ;;  %v850_v39 = vmul.f32 %v4083_v34, %v807_v44 }
 0x1b9   : > { %v874_v49 = vsel %vm855_vm8, %v838_v38, 0.0  ;;  %v913_v45 = vsel %vm855_vm8, %v850_v39, 0.0 }
 0x1ba   : > { %v875_v56 = vadd.f32 %v874_v49, %v873_v52  ;;  %v914_v57 = vadd.f32 %v913_v45, %v912_v53  ;;  %v784_v29 = vpop.permute.xlu1 %783  ;;  %v731_v32 = vpop.permute.xlu0 %730  ;;  %v851_v52 = vmul.f32 %v4065_v61, %v4057_v51  ;;  %v886_v61 = vadd.f32 %v885_v3, %v884_v47 }
 0x1bb   : > { %v845_v35 = vmul.f32 %v4070_v17, %v784_v29  ;;  %v834_v48 = vmul.f32 %v4083_v34, %v731_v32 }
 0x1bc   : > { %v876_v41 = vrot.slane %v875_v56, 4  ;;  %v915_v42 = vrot.slane %v914_v57, 4  ;;  %v921_v51 = vsel %vm855_vm8, %v851_v52, 0.0 }
 0x1bd   : > { %v898_v16 = vsel %vm855_vm8, %v845_v35, 0.0  ;;  %v861_v44 = vsel %vm855_vm8, %v834_v48, 0.0  ;;  %v923_v60 = vadd.f32 %v922_v55, %v921_v51 }
 0x1be   : > { %v877_v59 = vadd.f32 %v876_v41, %v875_v56  ;;  %v916_v38 = vadd.f32 %v915_v42, %v914_v57  ;;  %v862_v28 = vadd.f32 %v861_v44, %v860_v11  ;;  %v822_v39 = vpop.permute.xlu1 %821  ;;  %v788_v33 = vpop.permute.xlu0 %787  ;;  %v899_v53 = vadd.f32 %v898_v16, %v897_v63  ;;  %v3421_v42 = vld [vmem:[%s6729_s2] ss:$0 sm:$0xff]  ;;  %s4332_s2 = sld [smem:[#allocation8 + $0x47]] }
 0x1bf   : > { %v846_v54 = vmul.f32 %v4083_v34, %v788_v33  ;;  %v853_v22 = vmul.f32 %v4070_v17, %v822_v39 }
 0x1c0   : > { %v878_v50 = vrot.slane %v877_v59, 2  ;;  %v917_v49 = vrot.slane %v916_v38, 2  ;;  %v863_v45 = vrot.slane %v862_v28, 4 }
 0x1c1   : > { %v900_v58 = vsel %vm855_vm8, %v846_v54, 0.0  ;;  %v924_v40 = vsel %vm855_vm8, %v853_v22, 0.0 }
 0x1c2   : > { %v864_v56 = vadd.f32 %v863_v45, %v862_v28  ;;  %v901_v57 = vadd.f32 %v900_v58, %v899_v53  ;;  %v769_v29 = vpop.permute.xlu1 %768  ;;  %v879_v32 = vadd.f32 %v878_v50, %v877_v59  ;;  %v918_v35 = vadd.f32 %v917_v49, %v916_v38 }
 0x1c3   : > { %v842_v62 = vmul.f32 %v4083_v34, %v769_v29  ;;  %v925_v28 = vadd.f32 %v924_v40, %v923_v60 }
 0x1c4   : > { %v865_v48 = vrot.slane %v864_v56, 2  ;;  %v902_v11 = vrot.slane %v901_v57, 4  ;;  %v880_v17 = vrot.slane %v879_v32, 1  ;;  %v919_v43 = vrot.slane %v918_v35, 1  ;;  %6774 = sst [smem:[#allocation66_spill]] %s4332_s2 }
 0x1c5   : > { %v887_v41 = vsel %vm855_vm8, %v842_v62, 0.0 }
 0x1c6   : > { %v903_v63 = vadd.f32 %v902_v11, %v901_v57  ;;  %v888_v16 = vadd.f32 %v887_v41, %v886_v61  ;;  %v826_v44 = vpop.permute.xlu1 %825  ;;  %v881_v46 = vadd.f32 %v880_v17, %v879_v32  ;;  %v866_v59 = vadd.f32 %v865_v48, %v864_v56 }
 0x1c7   : > { %v854_v38 = vmul.f32 %v4083_v34, %v826_v44  ;;  %v920_v39 = vadd.f32 %v919_v43, %v918_v35 }
 0x1c8   : > { %v904_v33 = vrot.slane %v903_v63, 2  ;;  %v889_v52 = vrot.slane %v888_v16, 4  ;;  %v942_v3 = vadd.f32 %v3421_v42, %v881_v46  ;;  %v867_v53 = vrot.slane %v866_v59, 1 }
 0x1c9   : > { %v926_v54 = vsel %vm855_vm8, %v854_v38, 0.0  ;;  %v945_v50 = vadd.f32 %v3421_v42, %v920_v39  ;;  %vm2076_vm8 = vcmask 1031168  }
 0x1ca   : > { %v890_v49 = vadd.f32 %v889_v52, %v888_v16  ;;  %v927_v45 = vadd.f32 %v926_v54, %v925_v28  ;;  %v948_v22 = vmax.f32 %v942_v3, 0.0  ;;  %v868_v47 = vadd.f32 %v867_v53, %v866_v59  ;;  %v995_v3 = vld [vmem:[%s6730_s3] sm:$0x3]  ;;  %s4334_s3 = sld [smem:[#allocation8 + $0x3e]] }
 0x1cb   : > { %v951_v58 = vmax.f32 %v945_v50, 0.0  ;;  %v905_v55 = vadd.f32 %v904_v33, %v903_v63 }
 0x1cc   : > { %v891_v57 = vrot.slane %v890_v49, 2  ;;  %v928_v29 = vrot.slane %v927_v45, 4  ;;  %v963_v56 = vrot.slane %v948_v22, %v4049_v23  ;;  %v941_v32 = vadd.f32 %v3421_v42, %v868_v47 }
 0x1cd   : > { %v984_v34 = vrot.slane %v951_v58, %v4049_v23  ;;  %v906_v51 = vrot.slane %v905_v55, 1 }
 0x1ce   : > { %v929_v61 = vadd.f32 %v928_v29, %v927_v45  ;;  %965 = vbcast.lane.b32.xlu0 %v963_v56, 256  ;;  %v947_v62 = vmax.f32 %v941_v32, 0.0  ;;  %v892_v35 = vadd.f32 %v891_v57, %v890_v49 }
 0x1cf   : > { %986 = vbcast.lane.b32.xlu1 %v984_v34, 256  ;;  %v907_v48 = vadd.f32 %v906_v51, %v905_v55 }
 0x1d0   : > { %v930_v40 = vrot.slane %v929_v61, 2  ;;  %v956_v11 = vrot.slane %v947_v62, %v4049_v23  ;;  %v893_v17 = vrot.slane %v892_v35, 1 }
 0x1d1   : > { %v944_v60 = vadd.f32 %v3421_v42, %v907_v48 }
 0x1d2   : > { %958 = vbcast.lane.b32.xlu0 %v956_v11, 256  ;;  %v894_v41 = vadd.f32 %v893_v17, %v892_v35  ;;  %v931_v43 = vadd.f32 %v930_v40, %v929_v61 }
 0x1d3   : > { %v950_v63 = vmax.f32 %v944_v60, 0.0 }
 0x1d4   : > { %v943_v16 = vadd.f32 %v3421_v42, %v894_v41  ;;  %v932_v44 = vrot.slane %v931_v43, 1 }
 0x1d5   : > { %v977_v46 = vrot.slane %v950_v63, %v4049_v23 }
 0x1d6   : > { %v949_v59 = vmax.f32 %v943_v16, 0.0  ;;  %v933_v28 = vadd.f32 %v932_v44, %v931_v43 }
 0x1d7   : > { %979 = vbcast.lane.b32.xlu0 %v977_v46, 256 }
 0x1d8   : > { %v970_v38 = vrot.slane %v949_v59, %v4049_v23  ;;  %v946_v39 = vadd.f32 %v3421_v42, %v933_v28 }
 0x1da   : > { %972 = vbcast.lane.b32.xlu1 %v970_v38, 256  ;;  %v952_v33 = vmax.f32 %v946_v39, 0.0 }
 0x1dc   : > { %v991_v52 = vrot.slane %v952_v33, %v4049_v23 }
 0x1de   : > { %993 = vbcast.lane.b32.xlu1 %v991_v52, 256 }
 0x240   : > { %v966_v53 = vpop.permute.xlu0 %965 }
 0x241   : > { %v987_v54 = vpop.permute.xlu1 %986  ;;  %v997_v50 = vmul.f32 %v995_v3, %v966_v53 }
 0x242   : > { %v1000_v49 = vmul.f32 %v995_v3, %v987_v54 }
 0x243   : > { %v1010_v45 = vsel %vm1002_vm9, %v997_v50, 0.0  ;;  %v3422_v50 = vld [vmem:[%s6731_s4] ss:$0 sm:$0xff]  ;;  %s4342_s4 = sld [smem:[#allocation8 + $0x5f]] }
 0x244   : > { %v1031_v22 = vsel %vm1002_vm9, %v1000_v49, 0.0  ;;  %v1011_v47 = vrot.slane %v1010_v45, 4  ;;  %v959_v42 = vpop.permute.xlu0 %958 }
 0x245   : > { %v1032_v58 = vrot.slane %v1031_v22, 4  ;;  %v996_v55 = vmul.f32 %v995_v3, %v959_v42 }
 0x246   : > { %v1012_v57 = vadd.f32 %v1011_v47, %v1010_v45 }
 0x247   : > { %v1033_v29 = vadd.f32 %v1032_v58, %v1031_v22  ;;  %v1003_v56 = vsel %vm1002_vm9, %v996_v55, 0.0 }
 0x248   : > { %v1013_v32 = vrot.slane %v1012_v57, 2  ;;  %v1004_v34 = vrot.slane %v1003_v56, 4 }
 0x249   : > { %v1034_v51 = vrot.slane %v1033_v29, 2  ;;  %v980_v61 = vpop.permute.xlu0 %979 }
 0x24a   : > { %v1014_v62 = vadd.f32 %v1013_v32, %v1012_v57  ;;  %v1005_v35 = vadd.f32 %v1004_v34, %v1003_v56  ;;  %v999_v48 = vmul.f32 %v995_v3, %v980_v61 }
 0x24b   : > { %v1035_v40 = vadd.f32 %v1034_v51, %v1033_v29 }
 0x24c   : > { %v1015_v11 = vrot.slane %v1014_v62, 1  ;;  %v1006_v17 = vrot.slane %v1005_v35, 2  ;;  %v1024_v60 = vsel %vm1002_vm9, %v999_v48, 0.0  ;;  %v973_v41 = vpop.permute.xlu1 %972 }
 0x24d   : > { %v1036_v43 = vrot.slane %v1035_v40, 1  ;;  %v1025_v63 = vrot.slane %v1024_v60, 4  ;;  %v998_v16 = vmul.f32 %v995_v3, %v973_v41 }
 0x24e   : > { %v1007_v44 = vadd.f32 %v1006_v17, %v1005_v35  ;;  %v1016_v28 = vadd.f32 %v1015_v11, %v1014_v62 }
 0x24f   : > { %v1026_v46 = vadd.f32 %v1025_v63, %v1024_v60  ;;  %v1017_v59 = vsel %vm1002_vm9, %v998_v16, 0.0  ;;  %v1037_v33 = vadd.f32 %v1036_v43, %v1035_v40 }
 0x250   : > { %v1018_v38 = vrot.slane %v1017_v59, 4  ;;  %v994_v39 = vpop.permute.xlu1 %993  ;;  %v1008_v52 = vrot.slane %v1007_v44, 1  ;;  %v1053_v55 = vadd.f32 %v3422_v50, %v1016_v28 }
 0x251   : > { %v1027_v53 = vrot.slane %v1026_v46, 2  ;;  %v1001_v54 = vmul.f32 %v995_v3, %v994_v39  ;;  %v1056_v58 = vadd.f32 %v3422_v50, %v1037_v33 }
 0x252   : > { %v1019_v49 = vadd.f32 %v1018_v38, %v1017_v59  ;;  %v1009_v57 = vadd.f32 %v1008_v52, %v1007_v44 }
 0x253   : > { %v1028_v45 = vadd.f32 %v1027_v53, %v1026_v46  ;;  %v1038_v22 = vsel %vm1002_vm9, %v1001_v54, 0.0  ;;  %v1059_v3 = vadd.f32 %v1056_v58, %v1053_v55  ;;  %vm1829_vm9 = vcmask 1039360  }
 0x254   : > { %v1020_v47 = vrot.slane %v1019_v49, 2  ;;  %v1039_v42 = vrot.slane %v1038_v22, 4  ;;  %v1052_v62 = vadd.f32 %v3422_v50, %v1009_v57 }
 0x255   : > { %v1029_v29 = vrot.slane %v1028_v45, 1  ;;  %v3424_v60 = vmul.f32 -1.442695, %v1059_v3 }
 0x256   : > { %v1021_v56 = vadd.f32 %v1020_v47, %v1019_v49  ;;  %v1040_v32 = vadd.f32 %v1039_v42, %v1038_v22  ;;  %v3662_v47 = vmov 0.0  }
 0x257   : > { %v1030_v34 = vadd.f32 %v1029_v29, %v1028_v45  ;;  %443 = vst.msk [vmem:[#allocation2 + $0xc] sm:$0x7] %vm441_vm10, %v3662_v47  ;;  %442 = vst.msk [vmem:[#allocation2] sm:$0x7] %vm441_vm10, %v3662_v47 }
 0x258   : > { %v1022_v51 = vrot.slane %v1021_v56, 1  ;;  %v1041_v61 = vrot.slane %v1040_v32, 2  ;;  %446 = vst.msk [vmem:[#allocation2 + $0x14] sm:$0x7] %vm444_vm11, %v3662_v47  ;;  %445 = vst.msk [vmem:[#allocation2 + $0x8] sm:$0x7] %vm444_vm11, %v3662_v47 }
 0x259   : > { %v1055_v35 = vadd.f32 %v3422_v50, %v1030_v34  ;;  %vm2323_vm11 = vcmask 1022976  }
 0x25a   : > { %v1042_v48 = vadd.f32 %v1041_v61, %v1040_v32  ;;  %v1023_v11 = vadd.f32 %v1022_v51, %v1021_v56 }
 0x25b   : > { %v1058_v40 = vadd.f32 %v1055_v35, %v1052_v62 }
 0x25c   : > { %v1043_v17 = vrot.slane %v1042_v48, 1  ;;  %v1054_v63 = vadd.f32 %v3422_v50, %v1023_v11 }
 0x25d   : > { %v3423_v41 = vmul.f32 -1.442695, %v1058_v40 }
 0x25e   : > { %v1044_v43 = vadd.f32 %v1043_v17, %v1042_v48 }
 0x25f   : > { %3522 = vpow2.f32 %v3423_v41 }
 0x260   : > { %v1057_v16 = vadd.f32 %v3422_v50, %v1044_v43  ;;  %3524 = vpow2.f32 %v3424_v60 }
 0x262   : > { %v1060_v44 = vadd.f32 %v1057_v16, %v1054_v63 }
 0x264   : > { %v3425_v46 = vmul.f32 -1.442695, %v1060_v44 }
 0x266   : > { %3526 = vpow2.f32 %v3425_v46 }
 0x26c   : > { %v3523_v59 = vpop.eup %3522 }
 0x26d   : > { %v1070_v28 = vadd.f32 1.0, %v3523_v59  ;;  %v3525_v38 = vpop.eup %3524 }
 0x26e   : > { %v1071_v39 = vadd.f32 1.0, %v3525_v38 }
 0x26f   : > { %3528 = vrcp.f32 %v1070_v28 }
 0x270   : > { %3530 = vrcp.f32 %v1071_v39 }
 0x273   : > { %v3527_v33 = vpop.eup %3526 }
 0x274   : > { %v1072_v52 = vadd.f32 1.0, %v3527_v33 }
 0x276   : > { %3532 = vrcp.f32 %v1072_v52 }
 0x27c   : > { %v3529_v53 = vpop.eup %3528 }
 0x27d   : > { %v1082_v54 = vrot.slane %v3529_v53, %v4049_v23  ;;  %v3531_v49 = vpop.eup %3530 }
 0x27e   : > { %v1101_v50 = vrot.slane %v3531_v49, %v4049_v23 }
 0x27f   : > { %1088 = vbcast.lane.b32.xlu1 %v1082_v54, 264  ;;  %1084 = vbcast.lane.b32.xlu0 %v1082_v54, 256 }
 0x283   : > { %1096 = vbcast.lane.b32.xlu1 %v1082_v54, 280  ;;  %1092 = vbcast.lane.b32.xlu0 %v1082_v54, 272  ;;  %v3533_v45 = vpop.eup %3532 }
 0x284   : > { %v1120_v22 = vrot.slane %v3533_v45, %v4049_v23 }
 0x287   : > { %1107 = vbcast.lane.b32.xlu1 %v1101_v50, 264  ;;  %1103 = vbcast.lane.b32.xlu0 %v1101_v50, 256 }
 0x28b   : > { %1115 = vbcast.lane.b32.xlu1 %v1101_v50, 280  ;;  %1111 = vbcast.lane.b32.xlu0 %v1101_v50, 272 }
 0x28f   : > { %1126 = vbcast.lane.b32.xlu1 %v1120_v22, 264  ;;  %1122 = vbcast.lane.b32.xlu0 %v1120_v22, 256 }
 0x293   : > { %1134 = vbcast.lane.b32.xlu1 %v1120_v22, 280  ;;  %1130 = vbcast.lane.b32.xlu0 %v1120_v22, 272 }
 0x2f1   : > { %v1089_v42 = vpop.permute.xlu1 %1088  ;;  %v1085_v58 = vpop.permute.xlu0 %1084 }
 0x2f2   : > { %v4147_v55 = vmul.f32 %v1089_v42, %v3887_v8  ;;  %v4150_v57 = vmul.f32 %v1089_v42, %v3890_v9  ;;  %v4153_v29 = vmul.f32 %v1085_v58, %v3871_v2  ;;  %v4156_v56 = vmul.f32 %v1085_v58, %v3876_v4 }
 0x2f4   : > { %6732 = vst [vmem:[#allocation26_spill] sm:$0xff] %v4147_v55  ;;  %6733 = vst [vmem:[#allocation27_spill] sm:$0xff] %v4150_v57  ;;  %v1268_v51 = vmax.f32 %v4153_v29, %v4147_v55  ;;  %v1277_v61 = vmax.f32 %v4156_v56, %v4150_v57  ;;  %v1208_v2 = vadd.f32 %v4147_v55, %v4153_v29 }
 0x2f5   : > { %6734 = vst [vmem:[#allocation28_spill] sm:$0xff] %v4153_v29  ;;  %6735 = vst [vmem:[#allocation29_spill] sm:$0xff] %v4156_v56  ;;  %v1097_v32 = vpop.permute.xlu1 %1096  ;;  %v1093_v34 = vpop.permute.xlu0 %1092  ;;  %v1217_v4 = vadd.f32 %v4150_v57, %v4156_v56 }
 0x2f6   : > { %v4163_v8 = vmul.f32 %v1093_v34, %v3903_v14  ;;  %v4166_v9 = vmul.f32 %v1093_v34, %v3906_v15  ;;  %v4177_v14 = vmul.f32 %v1097_v32, %v3935_v26  ;;  %v4180_v15 = vmul.f32 %v1097_v32, %v3938_v27 }
 0x2f8   : > { %6736 = vst [vmem:[#allocation30_spill] sm:$0xff] %v4163_v8  ;;  %6737 = vst [vmem:[#allocation31_spill] sm:$0xff] %v4166_v9  ;;  %v1269_v3 = vmax.f32 %v1268_v51, %v4163_v8  ;;  %v1278_v62 = vmax.f32 %v1277_v61, %v4166_v9  ;;  %v1209_v35 = vadd.f32 %v1208_v2, %v4163_v8 }
 0x2f9   : > { %v1218_v48 = vadd.f32 %v1217_v4, %v4166_v9  ;;  %6738 = vst [vmem:[#allocation32_spill] sm:$0xff] %v4177_v14  ;;  %6739 = vst [vmem:[#allocation33_spill] sm:$0xff] %v4180_v15  ;;  %v1108_v40 = vpop.permute.xlu1 %1107  ;;  %v1104_v11 = vpop.permute.xlu0 %1103 }
 0x2fa   : > { %v4183_v17 = vmul.f32 %v1108_v40, %v3879_v5  ;;  %v4186_v60 = vmul.f32 %v1108_v40, %v3882_v6  ;;  %v4189_v41 = vmul.f32 %v1104_v11, %v3865_v0  ;;  %v4192_v43 = vmul.f32 %v1104_v11, %v3868_v1 }
 0x2fb   : > { %v1270_v26 = vmax.f32 %v1269_v3, %v4177_v14  ;;  %v1279_v63 = vmax.f32 %v1278_v62, %v4180_v15  ;;  %v1210_v27 = vadd.f32 %v1209_v35, %v4177_v14  ;;  %v1219_v16 = vadd.f32 %v1218_v48, %v4180_v15 }
 0x2fc   : > { %6740 = vst [vmem:[#allocation34_spill] sm:$0xff] %v4183_v17  ;;  %6741 = vst [vmem:[#allocation35_spill] sm:$0xff] %v4186_v60  ;;  %v1286_v38 = vmax.f32 %v4189_v41, %v4183_v17  ;;  %v1295_v39 = vmax.f32 %v4192_v43, %v4186_v60  ;;  %v1226_v54 = vadd.f32 %v4183_v17, %v4189_v41 }
 0x2fd   : > { %6742 = vst [vmem:[#allocation36_spill] sm:$0xff] %v4189_v41  ;;  %6743 = vst [vmem:[#allocation37_spill] sm:$0xff] %v4192_v43  ;;  %v1116_v44 = vpop.permute.xlu1 %1115  ;;  %v1112_v5 = vpop.permute.xlu0 %1111  ;;  %v1271_v46 = vrot.slane %v1270_v26, 4  ;;  %v1280_v59 = vrot.slane %v1279_v63, 4  ;;  %v1211_v6 = vrot.slane %v1210_v27, 4  ;;  %v1220_v28 = vrot.slane %v1219_v16, 4 }
 0x2fe   : > { %v4199_v0 = vmul.f32 %v1112_v5, %v3897_v12  ;;  %v4202_v1 = vmul.f32 %v1112_v5, %v3900_v13  ;;  %v4211_v49 = vmul.f32 %v1116_v44, %v3929_v24  ;;  %v4216_v45 = vmul.f32 %v1116_v44, %v3932_v25 }
 0x2ff   : > { %v1272_v33 = vmax.f32 %v1270_v26, %v1271_v46  ;;  %v1281_v52 = vmax.f32 %v1279_v63, %v1280_v59  ;;  %v1212_v53 = vadd.f32 %v1211_v6, %v1210_v27  ;;  %v1221_v50 = vadd.f32 %v1220_v28, %v1219_v16 }
 0x300   : > { %6744 = vst [vmem:[#allocation38_spill] sm:$0xff] %v4199_v0  ;;  %6745 = vst [vmem:[#allocation39_spill] sm:$0xff] %v4202_v1  ;;  %v1287_v12 = vmax.f32 %v1286_v38, %v4199_v0  ;;  %v1296_v13 = vmax.f32 %v1295_v39, %v4202_v1  ;;  %v1227_v35 = vadd.f32 %v1226_v54, %v4199_v0 }
 0x301   : > { %6746 = vst [vmem:[#allocation40_spill] sm:$0xff] %v4211_v49  ;;  %6747 = vst [vmem:[#allocation41_spill] sm:$0xff] %v4216_v45  ;;  %v1127_v22 = vpop.permute.xlu1 %1126  ;;  %v1123_v47 = vpop.permute.xlu0 %1122  ;;  %v1273_v42 = vrot.slane %v1272_v33, 2  ;;  %v1282_v58 = vrot.slane %v1281_v52, 2  ;;  %v1213_v32 = vrot.slane %v1212_v53, 2  ;;  %v1222_v62 = vrot.slane %v1221_v50, 2 }
 0x302   : > { %v4219_v34 = vmul.f32 %v1127_v22, %v3913_v18  ;;  %v4222_v51 = vmul.f32 %v1127_v22, %v3916_v19  ;;  %v4225_v24 = vmul.f32 %v1123_v47, %v3919_v20  ;;  %v4228_v61 = vmul.f32 %v1123_v47, %v3922_v21 }
 0x303   : > { %v1274_v2 = vmax.f32 %v1272_v33, %v1273_v42  ;;  %v1283_v25 = vmax.f32 %v1281_v52, %v1282_v58  ;;  %v1288_v4 = vmax.f32 %v1287_v12, %v4211_v49  ;;  %v1297_v3 = vmax.f32 %v1296_v13, %v4216_v45 }
 0x304   : > { %6748 = vst [vmem:[#allocation42_spill] sm:$0xff] %v4219_v34  ;;  %6749 = vst [vmem:[#allocation43_spill] sm:$0xff] %v4222_v51  ;;  %v1235_v18 = vadd.f32 %v4186_v60, %v4192_v43  ;;  %v1304_v21 = vmax.f32 %v4225_v24, %v4219_v34  ;;  %v1313_v11 = vmax.f32 %v4228_v61, %v4222_v51 }
 0x305   : > { %6750 = vst [vmem:[#allocation44_spill] sm:$0xff] %v4225_v24  ;;  %6751 = vst [vmem:[#allocation45_spill] sm:$0xff] %v4228_v61  ;;  %v1135_v19 = vpop.permute.xlu1 %1134  ;;  %v1131_v48 = vpop.permute.xlu0 %1130  ;;  %v1289_v40 = vrot.slane %v1288_v4, 4  ;;  %v1298_v20 = vrot.slane %v1297_v3, 4  ;;  %v1275_v27 = vrot.slane %v1274_v2, 1  ;;  %v1284_v16 = vrot.slane %v1283_v25, 1 }
 0x306   : > { %v4240_v26 = vmul.f32 %v1131_v48, %v3945_v30  ;;  %v4243_v63 = vmul.f32 %v1131_v48, %v3948_v31  ;;  %v1214_v46 = vadd.f32 %v1213_v32, %v1212_v53  ;;  %v1236_v59 = vadd.f32 %v1235_v18, %v4202_v1 }
 0x307   : > { %v1290_v44 = vmax.f32 %v1288_v4, %v1289_v40  ;;  %v1299_v5 = vmax.f32 %v1297_v3, %v1298_v20  ;;  %v4247_v6 = vmul.f32 %v1135_v19, %v3959_v36  ;;  %v4250_v28 = vmul.f32 %v1135_v19, %v3962_v37 }
 0x308   : > { %6752 = vst [vmem:[#allocation46_spill] sm:$0xff] %v4240_v26  ;;  %6753 = vst [vmem:[#allocation47_spill] sm:$0xff] %v4243_v63  ;;  %v1305_v38 = vmax.f32 %v1304_v21, %v4240_v26  ;;  %v1314_v30 = vmax.f32 %v1313_v11, %v4243_v63  ;;  %v1223_v33 = vadd.f32 %v1222_v62, %v1221_v50 }
 0x309   : > { %6754 = vst [vmem:[#allocation48_spill] sm:$0xff] %v4247_v6  ;;  %6755 = vst [vmem:[#allocation49_spill] sm:$0xff] %v4250_v28  ;;  %v1291_v39 = vrot.slane %v1290_v44, 2  ;;  %v1300_v31 = vrot.slane %v1299_v5, 2  ;;  %v1228_v52 = vadd.f32 %v1227_v35, %v4211_v49  ;;  %v1276_v54 = vmax.f32 %v1274_v2, %v1275_v27 }
 0x30a   : > { %v1285_v12 = vmax.f32 %v1283_v25, %v1284_v16  ;;  %v1306_v53 = vmax.f32 %v1305_v38, %v4247_v6  ;;  %v1315_v13 = vmax.f32 %v1314_v30, %v4250_v28  ;;  %v1237_v37 = vadd.f32 %v1236_v59, %v4216_v45 }
 0x30b   : > { %v1292_v36 = vmax.f32 %v1290_v44, %v1291_v39  ;;  %v1301_v22 = vmax.f32 %v1299_v5, %v1300_v31  ;;  %v1229_v47 = vrot.slane %v1228_v52, 4  ;;  %v1244_v32 = vadd.f32 %v4219_v34, %v4225_v24 }
 0x30c   : > { %v1307_v42 = vrot.slane %v1306_v53, 4  ;;  %v1316_v58 = vrot.slane %v1315_v13, 4  ;;  %v1253_v50 = vadd.f32 %v4222_v51, %v4228_v61  ;;  %v1238_v3 = vrot.slane %v1237_v37, 4 }
 0x30d   : > { %v1293_v4 = vrot.slane %v1292_v36, 1  ;;  %v1302_v2 = vrot.slane %v1301_v22, 1  ;;  %v1230_v25 = vadd.f32 %v1229_v47, %v1228_v52  ;;  %v1245_v18 = vadd.f32 %v1244_v32, %v4240_v26 }
 0x30e   : > { %v1308_v62 = vmax.f32 %v1306_v53, %v1307_v42  ;;  %v1317_v35 = vmax.f32 %v1315_v13, %v1316_v58  ;;  %v1254_v19 = vadd.f32 %v1253_v50, %v4243_v63  ;;  %v1239_v21 = vadd.f32 %v1238_v3, %v1237_v37 }
 0x30f   : > { %v1294_v48 = vmax.f32 %v1292_v36, %v1293_v4  ;;  %v1303_v40 = vmax.f32 %v1301_v22, %v1302_v2  ;;  %v1231_v20 = vrot.slane %v1230_v25, 2  ;;  %v1246_v16 = vadd.f32 %v1245_v18, %v4247_v6 }
 0x310   : > { %v1309_v11 = vrot.slane %v1308_v62, 2  ;;  %v1318_v27 = vrot.slane %v1317_v35, 2  ;;  %v1255_v44 = vadd.f32 %v1254_v19, %v4250_v28  ;;  %v1215_v59 = vrot.slane %v1214_v46, 1 }
 0x311   : > { %v1357_v5 = vcombine.low %v1294_v48, %v1303_v40  ;;  %v1232_v38 = vadd.f32 %v1231_v20, %v1230_v25  ;;  %v1240_v30 = vrot.slane %v1239_v21, 2  ;;  %v1247_v52 = vrot.slane %v1246_v16, 4 }
 0x312   : > { %v1310_v39 = vmax.f32 %v1308_v62, %v1309_v11  ;;  %v1319_v31 = vmax.f32 %v1317_v35, %v1318_v27  ;;  %v1256_v53 = vrot.slane %v1255_v44, 4  ;;  %v1224_v47 = vrot.slane %v1223_v33, 1 }
 0x313   : > { %v1359_v13 = vrot.slane %v1357_v5, 7  ;;  %v1233_v36 = vrot.slane %v1232_v38, 1  ;;  %v1241_v22 = vadd.f32 %v1240_v30, %v1239_v21  ;;  %v1248_v58 = vadd.f32 %v1247_v52, %v1246_v16 }
 0x314   : > { %v1311_v42 = vrot.slane %v1310_v39, 1  ;;  %v1320_v37 = vrot.slane %v1319_v31, 1  ;;  %v1257_v32 = vadd.f32 %v1256_v53, %v1255_v44  ;;  %v1356_v50 = vcombine.low %v1276_v54, %v1285_v12 }
 0x315   : > { %v1234_v4 = vadd.f32 %v1233_v36, %v1232_v38  ;;  %v1242_v2 = vrot.slane %v1241_v22, 1  ;;  %v1216_v19 = vadd.f32 %v1215_v59, %v1214_v46  ;;  %v1249_v25 = vrot.slane %v1248_v58, 2 }
 0x316   : > { %v1312_v3 = vmax.f32 %v1310_v39, %v1311_v42  ;;  %v1321_v18 = vmax.f32 %v1319_v31, %v1320_v37  ;;  %v1225_v48 = vadd.f32 %v1224_v47, %v1223_v33  ;;  %v1258_v35 = vrot.slane %v1257_v32, 2 }
 0x317   : > { %v1243_v62 = vadd.f32 %v1242_v2, %v1241_v22  ;;  %v1264_v40 = vmul.f32 0.03125, %v1234_v4  ;;  %v1360_v11 = vsel %vm632_vm3, %v1359_v13, %v1356_v50  ;;  %v1250_v27 = vadd.f32 %v1249_v25, %v1248_v58 }
 0x318   : > { %v1358_v20 = vcombine.low %v1312_v3, %v1321_v18  ;;  %v1259_v21 = vadd.f32 %v1258_v35, %v1257_v32  ;;  %v1262_v54 = vmul.f32 0.03125, %v1216_v19  ;;  %v1361_v12 = vsel %vm708_vm6, %v1359_v13, %v1360_v11 }
 0x319   : > { %v1265_v5 = vmul.f32 0.03125, %v1243_v62  ;;  %v1251_v44 = vrot.slane %v1250_v27, 1  ;;  %v1263_v30 = vmul.f32 0.03125, %v1225_v48  ;;  %v6505_v18 = vstv %s4274_s17  ;;  %s4539_s17 = sld [smem:[#allocation8 + $0x13]] }
 0x31a   : > { %v1362_v16 = vrot.slane %v1358_v20, 6  ;;  %v1260_v38 = vrot.slane %v1259_v21, 1  ;;  %v6499_v19 = vstv %s4276_s20  ;;  %v6498_v11 = vstv %s4278_s26  ;;  %s6788_s26 = smov 112   ;;  %s4513_s20 = sld [smem:[#allocation8 + $0xb]] }
 0x31b   : > { %v1329_v46 = vcombine.low %v1264_v40, %v1265_v5  ;;  %v1252_v59 = vadd.f32 %v1251_v44, %v1250_v27  ;;  %v1328_v36 = vcombine.low %v1262_v54, %v1263_v30  ;;  %v6481_v27 = vstv %s4280_s16  ;;  %s4498_s16 = sld [smem:[#allocation8 + $0x50]] }
 0x31c   : > { %v1363_v33 = vsel %vm634_vm5, %v1362_v16, %v1361_v12  ;;  %v1261_v31 = vadd.f32 %v1260_v38, %v1259_v21  ;;  %v6477_v44 = vstv %s4288_s25  ;;  %v6469_v38 = vstv %s4292_s13  ;;  %s4421_s13 = sld [smem:[#allocation8 + $0x5c]] }
 0x31d   : > { %v1364_v39 = vsel %vm1336_vm12, %v1362_v16, %v1363_v33  ;;  %v1331_v52 = vrot.slane %v1329_v46, 7  ;;  %v1266_v53 = vmul.f32 0.03125, %v1252_v59  ;;  %v6479_v16 = vstv %s4286_s28  ;;  %s4440_s25 = sld [smem:[#allocation8 + $0x34]] }
 0x31e   : > { %1365 = vrot.lane.b32.xlu1 %v1364_v39, %s3663_s5  ;;  %v1267_v47 = vmul.f32 0.03125, %v1261_v31  ;;  %v6468_v30 = vstv %s4296_s21  ;;  %v6461_v39 = vstv %s4298_s22  ;;  %v6459_v31 = vstv %s4300_s15  ;;  %s4401_s21 = sld [smem:[#allocation8 + $0x55]]  ;;  %s6449_s15 = smov 48  }
 0x31f   : > { %v1332_v42 = vsel %vm632_vm3, %v1331_v52, %v1328_v36  ;;  %s4416_s22 = sld [smem:[#allocation8 + $0x43]]  ;;  %v6509_v4 = vstv %s4360_s10  ;;  %vm1410_vm3 = vcmask 785408  }
 0x320   : > { %v1330_v22 = vcombine.low %v1266_v53, %v1267_v47  ;;  %v1333_v13 = vsel %vm708_vm6, %v1331_v52, %v1332_v42  ;;  %v6526_v52 = vstv %s4334_s3  ;;  %v6458_v53 = vstv %s4302_s23  ;;  %s4464_s23 = sld [smem:[#allocation8 + $0x35]] }
 0x321   : > { %s4476_s28 = sld [smem:[#allocation8 + $0x5e]]  ;;  %v6899_v23 = vstv %s4513_s20  ;;  %vm1458_vm6 = vcmask 392192  }
 0x322   : > { %v1334_v37 = vrot.slane %v1330_v22, 6  ;;  %v6455_v22 = vstv %s4306_s11  ;;  %s6456_s11 = smov 32  }
 0x323   : > { %6785 = sst [smem:[#allocation77_spill]] %s4440_s25 }
 0x324   : > { %v1335_v58 = vsel %vm634_vm5, %v1334_v37, %v1333_v13  ;;  %6782 = sst [smem:[#allocation74_spill]] %s4401_s21  ;;  %v6522_v13 = vstv %s4342_s4  ;;  %vm1442_vm5 = vcmask 523264  }
 0x325   : > { %v1337_v32 = vsel %vm1336_vm12, %v1334_v37, %v1335_v58  ;;  %v6466_v37 = vstv %s4308_s14  ;;  %v6521_v58 = vstv %s4346_s9  ;;  %6784 = sst [smem:[#allocation76_spill]] %s4416_s22  ;;  %vm3064_vm12 = vcmask 998400  }
 0x326   : > { %1338 = vrot.lane.b32.xlu0 %v1337_v32, %s3663_s5  ;;  %s4312_s5 = sld [smem:[#allocation8 + $0x3b]] }
 0x327   : > { %6786 = sst [smem:[#allocation78_spill]] %s4464_s23 }
 0x328   : > { %s4503_s14 = sld [smem:[#allocation8 + $0x58]] }
 0x32c   : > { %6771 = sst [smem:[#allocation63_spill]] %s4312_s5 }
 0x32e   : > { %v6878_v24 = vstv %s4503_s14 }
 0x390   : > { %v1366_v50 = vpop.permute.xlu1 %1365 }
 0x391   : > { %v1367_v2 = vrot.slane %v1366_v50, 4 }
 0x393   : > { %v1368_v3 = vsel %vm1341_vm15, %v1367_v2, %v1366_v50  ;;  %1373 = vst.msk [vmem:[#allocation2 + $0x14] sm:$0x7] %vm441_vm10, %v1367_v2  ;;  %v6512_v50 = vstv %s4352_s12  ;;  %v6465_v2 = vstv %s4312_s5  ;;  %s4505_s5 = sld [smem:[#allocation8 + $0x2c]] }
 0x394   : > { %1372 = vst.msk [vmem:[#allocation2 + $0xc] sm:$0x77] %vm4282_vm0, %v1368_v3  ;;  %v6508_v3 = vstv %s4364_s19  ;;  %s4595_s19 = sld [smem:[#allocation8 + $0x3]] }
 0x398   : > { %v1339_v25 = vpop.permute.xlu0 %1338 }
 0x399   : > { %v1340_v62 = vrot.slane %v1339_v25, 4  ;;  %6789 = sst [smem:[#allocation80_spill]] %s4505_s5 }
 0x39a   : > { %v4310_v48 = vld [vmem:[#allocation2 + $0x14] sm:$0x7]  ;;  %6805 = sst [smem:[#allocation93_spill]] %s4595_s19 }
 0x39b   : > { %v1483_v35 = vmul.f32 %v6505_v18, %v4310_v48  ;;  %v1952_v40 = vmul.f32 %v6499_v19, %v4310_v48  ;;  %v1342_v20 = vsel %vm1341_vm15, %v1340_v62, %v1339_v25  ;;  %1349 = vst.msk [vmem:[#allocation2 + $0x8] sm:$0x7] %vm441_vm10, %v1340_v62  ;;  %v1498_v21 = vmul.f32 %v6498_v11, %v4310_v48  ;;  %v4380_v59 = vld [vmem:[#allocation2 + $0xc] sm:$0x77] }
 0x39c   : > { %1348 = vst.msk [vmem:[#allocation2] sm:$0x77] %vm4282_vm0, %v1342_v20  ;;  %v1969_v5 = vmul.f32 %v6481_v27, %v4310_v48  ;;  %v1513_v54 = vmul.f32 %v6479_v16, %v4310_v48  ;;  %v1986_v12 = vmul.f32 %v6477_v44, %v4310_v48  ;;  %v1528_v46 = vmul.f32 %v6469_v38, %v4310_v48 }
 0x39d   : > { %1488 = vrot.lane.b32.xlu1 %v1483_v35, %s6424_s1  ;;  %1957 = vrot.lane.b32.xlu0 %v1952_v40, %s6424_s1  ;;  %s4350_s1 = sld [smem:[#allocation8 + $0x59]]  ;;  %v2003_v33 = vmul.f32 %v6468_v30, %v4310_v48  ;;  %v1543_v47 = vmul.f32 %v6461_v39, %v4310_v48  ;;  %v2020_v36 = vmul.f32 %v6459_v31, %v4310_v48  ;;  %v6507_v25 = vstv %s4368_s29 }
 0x39e   : > { %v4406_v42 = vmul.f32 %v6526_v52, %v4380_v59  ;;  %v6506_v62 = vstv %s4370_s18  ;;  %v1558_v35 = vmul.f32 %v6458_v53, %v4310_v48  ;;  %v2037_v40 = vmul.f32 %v6455_v22, %v4310_v48  ;;  %s4548_s18 = sld [smem:[#allocation8 + $0xd]] }
 0x39f   : > { %v6500_v20 = vstv %s4378_s8  ;;  %v2199_v22 = vmul.f32 %v6465_v2, %v4310_v48  ;;  %v6476_v53 = vstv %s4320_s27  ;;  %v6472_v31 = vstv %s4326_s0  ;;  %s4523_s8 = sld [smem:[#allocation8 + $0x12]]  ;;  %s6792_s27 = smov 96  }
 0x3a0   : > { %v1722_v2 = vmul.f32 %v6476_v53, %v4310_v48  ;;  %v6485_v38 = vstv %s4440_s25  ;;  %s4528_s0 = sld [smem:[#allocation8 + $0xc]]  ;;  %v6493_v16 = vstv %s4392_s7  ;;  %v6516_v11 = vstv %s4421_s13 }
 0x3a1   : > { %1503 = vrot.lane.b32.xlu1 %v1498_v21, %s6430_s30  ;;  %1974 = vrot.lane.b32.xlu0 %v1969_v5, %s6430_s30  ;;  %s6436_s30 = smov 80   ;;  %v4438_v21 = vmul.f32 %v6522_v13, %v4380_v59  ;;  %v4445_v5 = vmul.f32 %v6521_v58, %v4380_v59  ;;  %s4559_s25 = sld [smem:[#allocation8 + $0x1a]]  ;;  %v6524_v18 = vstv %s4539_s17  ;;  %v2513_v45 = vmul.f32 %v6878_v24, %v4380_v59 }
 0x3a2   : > { %s4576_s29 = sld [smem:[#allocation8 + $0x2]]  ;;  %vm2570_vm10 = vcmask 1014784  }
 0x3a3   : > { %v6518_v32 = vstv %s4350_s1  ;;  %s4585_s7 = sld [smem:[#allocation8 + $0x5]] }
 0x3a5   : > { %1518 = vrot.lane.b32.xlu1 %v1513_v54, %s6436_s30  ;;  %1991 = vrot.lane.b32.xlu0 %v1986_v12, %s6436_s30  ;;  %s4384_s30 = sld [smem:[#allocation8 + $0x3c]]  ;;  %v4450_v54 = vmul.f32 %v6518_v32, %v4380_v59  ;;  %v4455_v12 = vmul.f32 %v6512_v50, %v4380_v59 }
 0x3a6   : > { %6791 = sst [smem:[#allocation82_spill]] %s4523_s8 }
 0x3a7   : > { %6793 = sst [smem:[#allocation83_spill]] %s4528_s0  ;;  %v6529_v50 = vstv %s4559_s25 }
 0x3a8   : > { %6798 = sst [smem:[#allocation87_spill]] %s4559_s25 }
 0x3a9   : > { %1533 = vrot.lane.b32.xlu1 %v1528_v46, %s6444_s24  ;;  %2008 = vrot.lane.b32.xlu0 %v2003_v33, %s6444_s24  ;;  %s4412_s24 = sld [smem:[#allocation8 + $0x33]]  ;;  %v4460_v46 = vmul.f32 %v6509_v4, %v4380_v59  ;;  %v4469_v33 = vmul.f32 %v6508_v3, %v4380_v59  ;;  %v6812_v13 = vstv %s4585_s7 }
 0x3aa   : > { %6801 = sst [smem:[#allocation90_spill]] %s4576_s29 }
 0x3ab   : > { %6779 = sst [smem:[#allocation71_spill]] %s4384_s30  ;;  %v6488_v30 = vstv %s4384_s30 }
 0x3ac   : > { %v2446_v53 = vmul.f32 %v6488_v30, %v4310_v48  ;;  %s4557_s30 = sld [smem:[#allocation8 + $0x20]]  ;;  %v6504_v30 = vstv %s4416_s22  ;;  %s6806_s22 = smov 48  }
 0x3ad   : > { %1548 = vrot.lane.b32.xlu1 %v1543_v47, %s6449_s15  ;;  %2025 = vrot.lane.b32.xlu0 %v2020_v36, %s6449_s15  ;;  %s4432_s15 = sld [smem:[#allocation8 + $0x3d]]  ;;  %v4474_v47 = vmul.f32 %v6507_v25, %v4380_v59  ;;  %v4481_v36 = vmul.f32 %v6506_v62, %v4380_v59  ;;  %v6525_v25 = vstv %s4548_s18 }
 0x3ae   : > { %6804 = sst [smem:[#allocation92_spill]] %s4585_s7 }
 0x3af   : > { %6783 = sst [smem:[#allocation75_spill]] %s4412_s24  ;;  %v6475_v39 = vstv %s4412_s24 }
 0x3b0   : > { %s4530_s24 = sld [smem:[#allocation8 + $0x19]] }
 0x3b1   : > { %1563 = vrot.lane.b32.xlu1 %v1558_v35, %s6456_s11  ;;  %2042 = vrot.lane.b32.xlu0 %v2037_v40, %s6456_s11  ;;  %v4486_v35 = vmul.f32 %v6500_v20, %v4380_v59  ;;  %v1705_v40 = vmul.f32 %v6466_v37, %v4310_v48  ;;  %s4494_s11 = sld [smem:[#allocation8 + $0x36]]  ;;  %v2216_v37 = vmul.f32 %v6472_v31, %v4310_v48  ;;  %v6486_v31 = vstv %s4464_s23 }
 0x3b2   : > { %v4553_v27 = vmul.f32 %v6486_v31, %v4380_v59  ;;  %6797 = sst [smem:[#allocation86_spill]] %s4557_s30  ;;  %v6532_v20 = vstv %s4476_s28  ;;  %v6527_v3 = vstv %s4557_s30 }
 0x3b3   : > { %s4572_s23 = sld [smem:[#allocation8 + $0x14]]  ;;  %v6517_v19 = vstv %s4432_s15  ;;  %v6875_v34 = vstv %s4432_s15 }
 0x3b4   : > { %6795 = vst [vmem:[#allocation85_spill] sm:$0xff] %v4553_v27  ;;  %s4686_s25 = sld [smem:[#allocation8 + $0x4c]] }
 0x3b5   : > { %1710 = vrot.lane.b32.xlu1 %v1705_v40, %s6788_s26  ;;  %2204 = vrot.lane.b32.xlu0 %v2199_v22, %s6788_s26  ;;  %v4518_v22 = vmul.f32 %v6475_v39, %v4380_v59  ;;  %v6496_v40 = vstv %s4332_s2  ;;  %s6796_s2 = smov 80   ;;  %s6818_s7 = sld [smem:[#allocation68_spill]] }
 0x3b6   : > { %v1739_v39 = vmul.f32 %v6496_v40, %v4310_v48  ;;  %v6514_v40 = vstv %s4523_s8  ;;  %s4639_s8 = sld [smem:[#allocation8 + $0x44]] }
 0x3b7   : > { %6787 = sst [smem:[#allocation79_spill]] %s4494_s11  ;;  %6790 = vst [vmem:[#allocation81_spill] sm:$0xff] %v4518_v22  ;;  %v6492_v44 = vstv %s4494_s11  ;;  %s6802_s11 = smov 64  }
 0x3b8   : > { %s6827_s30 = sld [smem:[#allocation52_spill]] }
 0x3b9   : > { %1727 = vrot.lane.b32.xlu1 %v1722_v2, %s6792_s27  ;;  %2221 = vrot.lane.b32.xlu0 %v2216_v37, %s6792_s27  ;;  %v4544_v37 = vmul.f32 %v6485_v38, %v4380_v59  ;;  %v6495_v2 = vstv %s4389_s6  ;;  %v4564_v38 = vmul.f32 %v6492_v44, %v4380_v59  ;;  %6800 = sst [smem:[#allocation89_spill]] %s4572_s23  ;;  %v4582_v44 = vld [vmem:[#allocation2] sm:$0x77] }
 0x3ba   : > { %v1756_v31 = vmul.f32 %v6495_v2, %v4310_v48  ;;  %s4580_s6 = sld [smem:[#allocation8 + $0x4]]  ;;  %v4650_v32 = vmul.f32 %v6524_v18, %v4582_v44  ;;  %v4658_v58 = vmul.f32 %v6525_v25, %v4582_v44  ;;  %v4665_v18 = vmul.f32 %v6527_v3, %v4582_v44 }
 0x3bb   : > { %6794 = vst [vmem:[#allocation84_spill] sm:$0xff] %v4544_v37  ;;  %6799 = vst [vmem:[#allocation88_spill] sm:$0xff] %v4564_v38  ;;  %v4708_v3 = vmul.f32 %v6812_v13, %v4582_v44  ;;  %s4991_s15 = sld [smem:[#allocation8 + $0x1e]]  ;;  %v6909_v37 = vstv %s4539_s17 }
 0x3bc   : > { %v6541_v63 = vstv %s4639_s8  ;;  %v6881_v24 = vstv %s4639_s8  ;;  %s4945_s8 = sld [smem:[#allocation8 + $0x9]] }
 0x3bd   : > { %1744 = vrot.lane.b32.xlu1 %v1739_v39, %s6796_s2  ;;  %2451 = vrot.lane.b32.xlu0 %v2446_v53, %s6788_s26  ;;  %v2233_v39 = vmul.f32 %v6493_v16, %v4310_v48  ;;  %v6502_v53 = vstv %s4401_s21  ;;  %v6510_v16 = vstv %s4505_s5  ;;  %s4600_s21 = sld [smem:[#allocation8 + $0x4a]]  ;;  %6813 = vst [vmem:[#allocation97_spill] sm:$0xff] %v4708_v3  ;;  %v2709_v60 = vmul.f32 %v6881_v24, %v4380_v59 }
 0x3be   : > { %v1773_v2 = vmul.f32 %v6502_v53, %v4310_v48  ;;  %v6520_v53 = vstv %s4528_s0  ;;  %v4610_v62 = vmul.f32 %v6510_v16, %v4582_v44  ;;  %v2693_v16 = vmul.f32 %v6517_v19, %v4310_v48  ;;  %s4630_s5 = sld [smem:[#allocation8 + $0x52]]  ;;  %s6807_s0 = smov 32  }
 0x3bf   : > { %s6913_s17 = sld [smem:[#allocation87_spill]] }
 0x3c0   : > { %6803 = sst [smem:[#allocation91_spill]] %s4580_s6 }
 0x3c1   : > { %1761 = vrot.lane.b32.xlu1 %v1756_v31, %s6802_s11  ;;  %2238 = vrot.lane.b32.xlu0 %v2233_v39, %s6796_s2  ;;  %v2463_v31 = vmul.f32 %v6504_v30, %v4310_v48  ;;  %v6513_v39 = vstv %s4513_s20  ;;  %v6523_v30 = vstv %s4530_s24  ;;  %s5105_s20 = sld [smem:[#allocation8 + $0x24]] }
 0x3c2   : > { %v4617_v4 = vmul.f32 %v6513_v39, %v4582_v44  ;;  %v4636_v39 = vmul.f32 %v6520_v53, %v4582_v44  ;;  %v4645_v19 = vmul.f32 %v6523_v30, %v4582_v44  ;;  %v6533_v53 = vstv %s4576_s29  ;;  %s6822_s29 = sld [smem:[#allocation50_spill]] }
 0x3c3   : > { %v6540_v30 = vstv %s4595_s19  ;;  %s6816_s19 = sld [smem:[#allocation67_spill]]  ;;  %v6573_v8 = vstv %s4991_s15 }
 0x3c4   : > { %v6542_v6 = vstv %s4630_s5 }
 0x3c5   : > { %1778 = vrot.lane.b32.xlu1 %v1773_v2, %s6806_s22  ;;  %2468 = vrot.lane.b32.xlu0 %v2463_v31, %s6792_s27  ;;  %v4622_v2 = vmul.f32 %v6514_v40, %v4582_v44  ;;  %v1790_v31 = vmul.f32 %v6516_v11, %v4310_v48  ;;  %v6531_v40 = vstv %s4498_s16  ;;  %v6530_v11 = vstv %s4572_s23  ;;  %s6823_s23 = sld [smem:[#allocation70_spill]] }
 0x3c6   : > { %v2250_v25 = vmul.f32 %v6531_v40, %v4310_v48  ;;  %v4681_v52 = vmul.f32 %v6530_v11, %v4582_v44  ;;  %v4698_v11 = vmul.f32 %v6540_v30, %v4582_v44  ;;  %v6810_v40 = vstv %s4580_s6  ;;  %s6819_s6 = sld [smem:[#allocation69_spill]] }
 0x3c7   : > { %v2744_v13 = vmul.f32 %v6542_v6, %v4310_v48  ;;  %v6820_v30 = vstv %s4342_s4  ;;  %v6821_v6 = vstv %s4346_s9  ;;  %s6830_s4 = sld [smem:[#allocation53_spill]] }
 0x3c8   : > { %6809 = vst [vmem:[#allocation95_spill] sm:$0xff] %v4698_v11  ;;  %s6831_s9 = sld [smem:[#allocation54_spill]]  ;;  %v6589_v11 = vstv %s5105_s20 }
 0x3c9   : > { %1795 = vrot.lane.b32.xlu1 %v1790_v31, %s6807_s0  ;;  %2698 = vrot.lane.b32.xlu0 %v2693_v16, %s6788_s26  ;;  %v4670_v16 = vmul.f32 %v6529_v50, %v4582_v44  ;;  %v2284_v31 = vmul.f32 %v6532_v20, %v4310_v48  ;;  %v4693_v50 = vmul.f32 %v6533_v53, %v4582_v44  ;;  %v6815_v53 = vstv %s4600_s21 }
 0x3ca   : > { %v4703_v20 = vmul.f32 %v6810_v40, %v4582_v44  ;;  %v2480_v28 = vmul.f32 %v6815_v53, %v4310_v48  ;;  %v2710_v40 = vmul.f32 %v6541_v63, %v4310_v48  ;;  %v2531_v63 = vmul.f32 %v6820_v30, %v4310_v48 }
 0x3cb   : > { %6808 = vst [vmem:[#allocation94_spill] sm:$0xff] %v4693_v50  ;;  %v6828_v30 = vstv %s4360_s10  ;;  %s6838_s10 = sld [smem:[#allocation57_spill]] }
 0x3cc   : > { %6811 = vst [vmem:[#allocation96_spill] sm:$0xff] %v4703_v20 }
 0x3cd   : > { %2289 = vrot.lane.b32.xlu1 %v2284_v31, %s6807_s0  ;;  %2255 = vrot.lane.b32.xlu0 %v2250_v25, %s6802_s11  ;;  %v6814_v25 = vstv %s4503_s14  ;;  %s4995_s14 = sld [smem:[#allocation8 + $0x1c]] }
 0x3ce   : > { %v2514_v31 = vmul.f32 %v6814_v25, %v4310_v48  ;;  %v6545_v25 = vstv %s4686_s25 }
 0x3cf   : > { %v2974_v53 = vmul.f32 %v6545_v25, %v4310_v48  ;;  %v6825_v25 = vstv %s4352_s12  ;;  %s6835_s12 = sld [smem:[#allocation56_spill]] }
 0x3d1   : > { %2519 = vrot.lane.b32.xlu1 %v2514_v31, %s6806_s22  ;;  %2485 = vrot.lane.b32.xlu0 %v2480_v28, %s6796_s2  ;;  %v6817_v31 = vstv %s4334_s3  ;;  %s6826_s3 = sld [smem:[#allocation51_spill]] }
 0x3d2   : > { %v2940_v28 = vmul.f32 %v6817_v31, %v4310_v48 }
 0x3d3   : > { %v6574_v57 = vstv %s4995_s14 }
 0x3d5   : > { %2749 = vrot.lane.b32.xlu1 %v2744_v13, %s6802_s11  ;;  %2715 = vrot.lane.b32.xlu0 %v2710_v40, %s6792_s27  ;;  %v2267_v13 = vmul.f32 %v6821_v6, %v4310_v48  ;;  %v6824_v40 = vstv %s4350_s1  ;;  %v2991_v6 = vmul.f32 %v6828_v30, %v4310_v48  ;;  %s6834_s1 = sld [smem:[#allocation55_spill]] }
 0x3d6   : > { %v2761_v31 = vmul.f32 %v6824_v40, %v4310_v48  ;;  %v6833_v40 = vstv %s6819_s6  ;;  %s6843_s6 = sld [smem:[#allocation60_spill]] }
 0x3d9   : > { %2979 = vrot.lane.b32.xlu1 %v2974_v53, %s6796_s2  ;;  %2945 = vrot.lane.b32.xlu0 %v2940_v28, %s6788_s26  ;;  %v2497_v53 = vmul.f32 %v6825_v25, %v4310_v48  ;;  %v6829_v28 = vstv %s6816_s19  ;;  %s6839_s19 = sld [smem:[#allocation58_spill]] }
 0x3dd   : > { %2536 = vrot.lane.b32.xlu1 %v2531_v63, %s6807_s0  ;;  %2272 = vrot.lane.b32.xlu0 %v2267_v13, %s6806_s22  ;;  %v2727_v63 = vmul.f32 %v6829_v28, %v4310_v48  ;;  %v6832_v13 = vstv %s6818_s7  ;;  %v6837_v28 = vstv %s6823_s23  ;;  %s6842_s7 = sld [smem:[#allocation59_spill]] }
 0x3de   : > { %v2778_v25 = vmul.f32 %v6832_v13, %v4310_v48  ;;  %s6847_s23 = sld [smem:[#allocation62_spill]] }
 0x3e1   : > { %2766 = vrot.lane.b32.xlu1 %v2761_v31, %s6806_s22  ;;  %2502 = vrot.lane.b32.xlu0 %v2497_v53, %s6802_s11  ;;  %v2957_v31 = vmul.f32 %v6833_v40, %v4310_v48  ;;  %v6836_v53 = vstv %s6822_s29  ;;  %v6841_v40 = vstv %s6827_s30  ;;  %s6846_s29 = sld [smem:[#allocation61_spill]] }
 0x3e2   : > { %v1482_v30 = vmul.f32 %v6836_v53, %v4380_v59  ;;  %v6845_v53 = vstv %s6831_s9  ;;  %s6850_s30 = sld [smem:[#allocation63_spill]] }
 0x3e3   : > { %s6855_s9 = sld [smem:[#allocation66_spill]] }
 0x3e5   : > { %2996 = vrot.lane.b32.xlu1 %v2991_v6, %s6802_s11  ;;  %2732 = vrot.lane.b32.xlu0 %v2727_v63, %s6796_s2  ;;  %v3008_v6 = vmul.f32 %v6837_v28, %v4310_v48  ;;  %v6840_v63 = vstv %s6826_s3  ;;  %v1512_v28 = vmul.f32 %v6845_v53, %v4380_v59  ;;  %s6851_s3 = sld [smem:[#allocation64_spill]]  ;;  %v6856_v53 = vstv %s6842_s7 }
 0x3e6   : > { %v1951_v13 = vmul.f32 %v6840_v63, %v4380_v59  ;;  %v6849_v63 = vstv %s6835_s12  ;;  %s6859_s12 = sld [smem:[#allocation72_spill]] }
 0x3e7   : > { %s6868_s7 = sld [smem:[#allocation76_spill]] }
 0x3e9   : > { %2783 = vrot.lane.b32.xlu1 %v2778_v25, %s6807_s0  ;;  %2962 = vrot.lane.b32.xlu0 %v2957_v31, %s6792_s27  ;;  %v1497_v25 = vmul.f32 %v6841_v40, %v4380_v59  ;;  %v6844_v31 = vstv %s6830_s4  ;;  %v6852_v40 = vstv %s6838_s10  ;;  %s6854_s4 = sld [smem:[#allocation65_spill]] }
 0x3ea   : > { %v1968_v48 = vmul.f32 %v6844_v31, %v4380_v59  ;;  %v6853_v31 = vstv %s6839_s19  ;;  %s6862_s10 = sld [smem:[#allocation73_spill]] }
 0x3eb   : > { %s6864_s19 = sld [smem:[#allocation74_spill]] }
 0x3ed   : > { %3013 = vrot.lane.b32.xlu1 %v3008_v6, %s6806_s22  ;;  %1486 = vrot.lane.b32.xlu0 %v1482_v30, %s6788_s26  ;;  %v6848_v30 = vstv %s6834_s1  ;;  %s6858_s1 = sld [smem:[#allocation71_spill]] }
 0x3ee   : > { %v1985_v6 = vmul.f32 %v6848_v30, %v4380_v59  ;;  %v6857_v30 = vstv %s6843_s6  ;;  %s5013_s6 = sld [smem:[#allocation8 + $0x23]] }
 0x3f1   : > { %1955 = vrot.lane.b32.xlu1 %v1951_v13, %s6788_s26  ;;  %1501 = vrot.lane.b32.xlu0 %v1497_v25, %s6792_s27  ;;  %v1527_v13 = vmul.f32 %v6849_v63, %v4380_v59  ;;  %v2002_v25 = vmul.f32 %v6852_v40, %v4380_v59  ;;  %v6860_v63 = vstv %s6846_s29  ;;  %v6861_v40 = vstv %s6847_s23  ;;  %s5029_s29 = sld [smem:[#allocation8 + $0x2a]] }
 0x3f2   : > { %s6891_s23 = sld [smem:[#allocation80_spill]] }
 0x3f4   : > { %v6578_v56 = vstv %s5013_s6 }
 0x3f5   : > { %1972 = vrot.lane.b32.xlu1 %v1968_v48, %s6792_s27  ;;  %1516 = vrot.lane.b32.xlu0 %v1512_v28, %s6796_s2  ;;  %v1542_v48 = vmul.f32 %v6853_v31, %v4380_v59  ;;  %v2019_v28 = vmul.f32 %v6856_v53, %v4380_v59  ;;  %v6863_v31 = vstv %s6850_s30  ;;  %v6865_v53 = vstv %s6851_s3  ;;  %s5045_s30 = sld [smem:[#allocation8 + $0x8]] }
 0x3f6   : > { %s5060_s3 = sld [smem:[#allocation8 + $0xf]] }
 0x3f7   : > { %v6583_v29 = vstv %s5029_s29 }
 0x3f8   : > { %v6895_v10 = vstv %s6891_s23  ;;  %s5165_s23 = sld [smem:[#allocation8 + $0x18]] }
 0x3f9   : > { %1989 = vrot.lane.b32.xlu1 %v1985_v6, %s6796_s2  ;;  %1531 = vrot.lane.b32.xlu0 %v1527_v13, %s6802_s11  ;;  %v1557_v6 = vmul.f32 %v6857_v30, %v4380_v59  ;;  %v2036_v13 = vmul.f32 %v6860_v63, %v4380_v59  ;;  %v6866_v30 = vstv %s6854_s4  ;;  %v6867_v63 = vstv %s6855_s9  ;;  %s6896_s4 = sld [smem:[#allocation82_spill]] }
 0x3fa   : > { %s5075_s9 = sld [smem:[#allocation8 + $0x16]] }
 0x3fb   : > { %v6584_v7 = vstv %s5045_s30 }
 0x3fc   : > { %v6585_v3 = vstv %s5060_s3 }
 0x3fd   : > { %2006 = vrot.lane.b32.xlu1 %v2002_v25, %s6802_s11  ;;  %1546 = vrot.lane.b32.xlu0 %v1542_v48, %s6806_s22  ;;  %v1704_v25 = vmul.f32 %v6861_v40, %v4380_v59  ;;  %v2198_v48 = vmul.f32 %v6863_v31, %v4380_v59  ;;  %v6869_v40 = vstv %s6858_s1  ;;  %v6870_v31 = vstv %s6859_s12  ;;  %s6900_s1 = sld [smem:[#allocation83_spill]] }
 0x3fe   : > { %s5090_s12 = sld [smem:[#allocation8 + $0x1d]] }
 0x3ff   : > { %v6903_v38 = vstv %s6896_s4  ;;  %s5180_s4 = sld [smem:[#allocation8 + $0x1f]] }
 0x400   : > { %v6586_v27 = vstv %s5075_s9 }
 0x401   : > { %2023 = vrot.lane.b32.xlu1 %v2019_v28, %s6806_s22  ;;  %1561 = vrot.lane.b32.xlu0 %v1557_v6, %s6807_s0  ;;  %v1721_v28 = vmul.f32 %v6865_v53, %v4380_v59  ;;  %v2215_v6 = vmul.f32 %v6866_v30, %v4380_v59  ;;  %v6871_v30 = vstv %s6862_s10  ;;  %s5120_s10 = sld [smem:[#allocation8 + $0x2b]] }
 0x403   : > { %v6905_v20 = vstv %s6900_s1  ;;  %s5195_s1 = sld [smem:[#allocation8 + $0x26]] }
 0x404   : > { %v6588_v50 = vstv %s5090_s12 }
 0x405   : > { %2040 = vrot.lane.b32.xlu1 %v2036_v13, %s6807_s0  ;;  %1708 = vrot.lane.b32.xlu0 %v1704_v25, %s6788_s26  ;;  %v1738_v13 = vmul.f32 %v6867_v63, %v4380_v59  ;;  %v2445_v25 = vmul.f32 %v6869_v40, %v4380_v59  ;;  %v6872_v63 = vstv %s6864_s19  ;;  %s5135_s19 = sld [smem:[#allocation8 + $0xa]] }
 0x407   : > { %v6592_v22 = vstv %s5120_s10 }
 0x409   : > { %2202 = vrot.lane.b32.xlu1 %v2198_v48, %s6788_s26  ;;  %1725 = vrot.lane.b32.xlu0 %v1721_v28, %s6792_s27  ;;  %v1755_v48 = vmul.f32 %v6870_v31, %v4380_v59 }
 0x40d   : > { %2219 = vrot.lane.b32.xlu1 %v2215_v6, %s6792_s27  ;;  %1742 = vrot.lane.b32.xlu0 %v1738_v13, %s6796_s2  ;;  %v2232_v6 = vmul.f32 %v6871_v30, %v4380_v59  ;;  %v1772_v13 = vmul.f32 %v6872_v63, %v4380_v59 }
 0x40f   : > { %v4847_v53 = vpop.permute.xlu1 %1488  ;;  %v4849_v28 = vpop.permute.xlu0 %1957 }
 0x411   : > { %2449 = vrot.lane.b32.xlu1 %v2445_v25, %s6788_s26  ;;  %1759 = vrot.lane.b32.xlu0 %v1755_v48, %s6802_s11  ;;  %v6873_v25 = vstv %s6868_s7  ;;  %v6874_v48 = vstv %s4421_s13  ;;  %s4969_s13 = sld [smem:[#allocation8 + $0x17]] }
 0x412   : > { %v2462_v26 = vmul.f32 %v6873_v25, %v4380_v59  ;;  %v1789_v51 = vmul.f32 %v6874_v48, %v4380_v59  ;;  %s5150_s7 = sld [smem:[#allocation8 + $0x11]] }
 0x413   : > { %v4859_v40 = vpop.permute.xlu1 %1503  ;;  %v4861_v31 = vpop.permute.xlu0 %1974 }
 0x415   : > { %2236 = vrot.lane.b32.xlu1 %v2232_v6, %s6796_s2  ;;  %1776 = vrot.lane.b32.xlu0 %v1772_v13, %s6806_s22  ;;  %v2692_v6 = vmul.f32 %v6875_v34, %v4380_v59  ;;  %v6876_v13 = vstv %s4476_s28  ;;  %s4957_s28 = sld [smem:[#allocation8 + $0x10]] }
 0x416   : > { %v2283_v61 = vmul.f32 %v6876_v13, %v4380_v59  ;;  %v6879_v13 = vstv %s4600_s21  ;;  %s4975_s21 = sld [smem:[#allocation8 + $0x15]] }
 0x417   : > { %v4871_v30 = vpop.permute.xlu1 %1518  ;;  %v4873_v63 = vpop.permute.xlu0 %1991  ;;  %v6569_v14 = vstv %s4969_s13 }
 0x419   : > { %2466 = vrot.lane.b32.xlu1 %v2462_v26, %s6792_s27  ;;  %1793 = vrot.lane.b32.xlu0 %v1789_v51, %s6807_s0  ;;  %v6877_v26 = vstv %s4498_s16  ;;  %s4947_s16 = sld [smem:[#allocation8 + $0x7]] }
 0x41a   : > { %v2249_v51 = vmul.f32 %v6877_v26, %v4380_v59  ;;  %v6880_v26 = vstv %s4630_s5  ;;  %s5009_s5 = sld [smem:[#allocation8 + $0x25]] }
 0x41b   : > { %v4883_v25 = vpop.permute.xlu1 %1533  ;;  %v4885_v48 = vpop.permute.xlu0 %2008  ;;  %v2743_v0 = vmul.f32 %v6880_v26, %v4380_v59  ;;  %v6565_v41 = vstv %s4957_s28 }
 0x41c   : > { %v6570_v9 = vstv %s4975_s21 }
 0x41d   : > { %2696 = vrot.lane.b32.xlu1 %v2692_v6, %s6788_s26  ;;  %2287 = vrot.lane.b32.xlu0 %v2283_v61, %s6807_s0  ;;  %v2479_v6 = vmul.f32 %v6879_v13, %v4380_v59  ;;  %v6882_v13 = vstv %s4686_s25  ;;  %s4959_s25 = sld [smem:[#allocation8 + $0xe]] }
 0x41e   : > { %v2973_v17 = vmul.f32 %v6882_v13, %v4380_v59 }
 0x41f   : > { %v4895_v34 = vpop.permute.xlu1 %1548  ;;  %v4897_v49 = vpop.permute.xlu0 %2025 }
 0x420   : > { %v6577_v55 = vstv %s5009_s5 }
 0x421   : > { %2253 = vrot.lane.b32.xlu1 %v2249_v51, %s6802_s11  ;;  %2517 = vrot.lane.b32.xlu0 %v2513_v45, %s6806_s22 }
 0x423   : > { %v4904_v1 = vpop.permute.xlu1 %1563  ;;  %v4906_v61 = vpop.permute.xlu0 %2042  ;;  %v6566_v15 = vstv %s4959_s25 }
 0x425   : > { %2483 = vrot.lane.b32.xlu1 %v2479_v6, %s6796_s2  ;;  %2747 = vrot.lane.b32.xlu0 %v2743_v0, %s6802_s11 }
 0x427   : > { %v4916_v51 = vpop.permute.xlu1 %1710  ;;  %v4918_v45 = vpop.permute.xlu0 %2204 }
 0x429   : > { %2713 = vrot.lane.b32.xlu1 %v2709_v60, %s6792_s27  ;;  %2977 = vrot.lane.b32.xlu0 %v2973_v17, %s6796_s2 }
 0x42b   : > { %v4925_v43 = vpop.permute.xlu1 %1727  ;;  %v4927_v26 = vpop.permute.xlu0 %2221 }
 0x42d   : > { %2943 = vrot.lane.b32.xlu1 %v4406_v42, %s6788_s26  ;;  %2534 = vrot.lane.b32.xlu0 %v4438_v21, %s6807_s0 }
 0x42f   : > { %v4933_v0 = vpop.permute.xlu1 %1744  ;;  %v4935_v6 = vpop.permute.xlu0 %2451 }
 0x431   : > { %2270 = vrot.lane.b32.xlu1 %v4445_v5, %s6806_s22  ;;  %2764 = vrot.lane.b32.xlu0 %v4450_v54, %s6806_s22  ;;  %v4971_v54 = vld [vmem:[#allocation2 + $0x8] sm:$0x7] }
 0x433   : > { %v4941_v17 = vpop.permute.xlu1 %1761  ;;  %v4943_v60 = vpop.permute.xlu0 %2238 }
 0x435   : > { %2500 = vrot.lane.b32.xlu1 %v4455_v12, %s6802_s11  ;;  %2994 = vrot.lane.b32.xlu0 %v4460_v46, %s6802_s11  ;;  %v6561_v12 = vstv %s4945_s8  ;;  %v6562_v46 = vstv %s4947_s16 }
 0x436   : > { %v1845_v24 = vmul.f32 %v6561_v12, %v4971_v54  ;;  %v1383_v13 = vmul.f32 %v6562_v46, %v4971_v54  ;;  %v1862_v12 = vmul.f32 %v6565_v41, %v4971_v54  ;;  %v1400_v46 = vmul.f32 %v6566_v15, %v4971_v54 }
 0x437   : > { %v4953_v59 = vpop.permute.xlu1 %1778  ;;  %v4955_v42 = vpop.permute.xlu0 %2468  ;;  %v1879_v41 = vmul.f32 %v6569_v14, %v4971_v54  ;;  %v1416_v15 = vmul.f32 %v6570_v9, %v4971_v54  ;;  %v1896_v14 = vmul.f32 %v6573_v8, %v4971_v54  ;;  %v1432_v9 = vmul.f32 %v6574_v57, %v4971_v54 }
 0x438   : > { %6883 = vst [vmem:[#allocation98_spill] sm:$0xff] %v4955_v42  ;;  %v1913_v8 = vmul.f32 %v6577_v55, %v4971_v54  ;;  %v1448_v57 = vmul.f32 %v6578_v56, %v4971_v54  ;;  %v1930_v55 = vmul.f32 %v6895_v10, %v4971_v54  ;;  %v1464_v56 = vmul.f32 %v6583_v29, %v4971_v54 }
 0x439   : > { %2730 = vrot.lane.b32.xlu1 %v4469_v33, %s6796_s2  ;;  %2781 = vrot.lane.b32.xlu0 %v4474_v47, %s6807_s0  ;;  %v2339_v10 = vmul.f32 %v6899_v23, %v4971_v54  ;;  %v1598_v29 = vmul.f32 %v6584_v7, %v4971_v54  ;;  %v2356_v23 = vmul.f32 %v6903_v38, %v4971_v54 }
 0x43a   : > { %v1615_v7 = vmul.f32 %v6585_v3, %v4971_v54  ;;  %v1632_v38 = vmul.f32 %v6586_v27, %v4971_v54  ;;  %v2586_v3 = vmul.f32 %v6905_v20, %v4971_v54  ;;  %v1649_v27 = vmul.f32 %v6588_v50, %v4971_v54 }
 0x43b   : > { %v4965_v21 = vpop.permute.xlu1 %1795  ;;  %v4967_v5 = vpop.permute.xlu0 %2698  ;;  %v1666_v50 = vmul.f32 %v6589_v11, %v4971_v54  ;;  %v1683_v11 = vmul.f32 %v6592_v22, %v4971_v54 }
 0x43c   : > { %6884 = vst [vmem:[#allocation99_spill] sm:$0xff] %v4967_v5 }
 0x43d   : > { %2960 = vrot.lane.b32.xlu1 %v4481_v36, %s6792_s27  ;;  %3011 = vrot.lane.b32.xlu0 %v4486_v35, %s6806_s22 }
 0x43f   : > { %v4981_v33 = vpop.permute.xlu1 %2289  ;;  %v4983_v47 = vpop.permute.xlu0 %2255 }
 0x440   : > { %6885 = vst [vmem:[#allocation100_spill] sm:$0xff] %v4981_v33 }
 0x441   : > { %1850 = vrot.lane.b32.xlu0 %v1845_v24, %s6788_s26  ;;  %1388 = vrot.lane.b32.xlu1 %v1383_v13, %s6788_s26 }
 0x443   : > { %v4999_v36 = vpop.permute.xlu1 %2519  ;;  %v5001_v35 = vpop.permute.xlu0 %2485 }
 0x444   : > { %6886 = vst [vmem:[#allocation101_spill] sm:$0xff] %v5001_v35 }
 0x445   : > { %1867 = vrot.lane.b32.xlu0 %v1862_v12, %s6792_s27  ;;  %1405 = vrot.lane.b32.xlu1 %v1400_v46, %s6792_s27 }
 0x447   : > { %v5017_v24 = vpop.permute.xlu1 %2749  ;;  %v5019_v13 = vpop.permute.xlu0 %2715 }
 0x448   : > { %6887 = vst [vmem:[#allocation102_spill] sm:$0xff] %v5017_v24  ;;  %6888 = vst [vmem:[#allocation103_spill] sm:$0xff] %v5019_v13 }
 0x449   : > { %1884 = vrot.lane.b32.xlu0 %v1879_v41, %s6796_s2  ;;  %1421 = vrot.lane.b32.xlu1 %v1416_v15, %s6796_s2 }
 0x44b   : > { %v5033_v12 = vpop.permute.xlu1 %2979  ;;  %v5035_v46 = vpop.permute.xlu0 %2945 }
 0x44c   : > { %6889 = vst [vmem:[#allocation104_spill] sm:$0xff] %v5033_v12  ;;  %6890 = vst [vmem:[#allocation105_spill] sm:$0xff] %v5035_v46 }
 0x44d   : > { %1901 = vrot.lane.b32.xlu0 %v1896_v14, %s6802_s11  ;;  %1437 = vrot.lane.b32.xlu1 %v1432_v9, %s6802_s11 }
 0x44f   : > { %v5049_v15 = vpop.permute.xlu1 %2536  ;;  %v5051_v41 = vpop.permute.xlu0 %2272 }
 0x450   : > { %6892 = vst [vmem:[#allocation106_spill] sm:$0xff] %v5049_v15 }
 0x451   : > { %1918 = vrot.lane.b32.xlu0 %v1913_v8, %s6806_s22  ;;  %1453 = vrot.lane.b32.xlu1 %v1448_v57, %s6806_s22 }
 0x453   : > { %v5064_v9 = vpop.permute.xlu1 %2766  ;;  %v5066_v14 = vpop.permute.xlu0 %2502 }
 0x454   : > { %6893 = vst [vmem:[#allocation107_spill] sm:$0xff] %v5064_v9  ;;  %6894 = vst [vmem:[#allocation108_spill] sm:$0xff] %v5066_v14  ;;  %v6604_v9 = vstv %s5180_s4  ;;  %v5439_v14 = vld [vmem:[#allocation2 + $0x14] sm:$0x7] }
 0x455   : > { %1935 = vrot.lane.b32.xlu0 %v1930_v55, %s6807_s0  ;;  %1469 = vrot.lane.b32.xlu1 %v1464_v56, %s6807_s0 }
 0x457   : > { %v5079_v57 = vpop.permute.xlu1 %2996  ;;  %v5081_v8 = vpop.permute.xlu0 %2732 }
 0x458   : > { %6897 = vst [vmem:[#allocation109_spill] sm:$0xff] %v5079_v57  ;;  %6898 = vst [vmem:[#allocation110_spill] sm:$0xff] %v5081_v8 }
 0x459   : > { %2344 = vrot.lane.b32.xlu0 %v2339_v10, %s6788_s26  ;;  %1603 = vrot.lane.b32.xlu1 %v1598_v29, %s6788_s26 }
 0x45b   : > { %v5094_v55 = vpop.permute.xlu1 %2783  ;;  %v5096_v56 = vpop.permute.xlu0 %2962 }
 0x45c   : > { %6901 = vst [vmem:[#allocation111_spill] sm:$0xff] %v5094_v55  ;;  %6902 = vst [vmem:[#allocation112_spill] sm:$0xff] %v5096_v56  ;;  %v6912_v56 = vstv %s4548_s18  ;;  %v6595_v55 = vstv %s5135_s19  ;;  %s6917_s18 = sld [smem:[#allocation89_spill]] }
 0x45d   : > { %2361 = vrot.lane.b32.xlu0 %v2356_v23, %s6792_s27  ;;  %1620 = vrot.lane.b32.xlu1 %v1615_v7, %s6792_s27  ;;  %v2092_v22 = vmul.f32 %v6595_v55, %v4971_v54 }
 0x45f   : > { %v5109_v29 = vpop.permute.xlu1 %3013  ;;  %v5111_v10 = vpop.permute.xlu0 %1486 }
 0x460   : > { %6904 = vst [vmem:[#allocation113_spill] sm:$0xff] %v5109_v29  ;;  %v6907_v29 = vstv %s4530_s24  ;;  %s6910_s24 = sld [smem:[#allocation86_spill]] }
 0x461   : > { %1637 = vrot.lane.b32.xlu1 %v1632_v38, %s6796_s2  ;;  %2591 = vrot.lane.b32.xlu0 %v2586_v3, %s6788_s26  ;;  %v2373_v20 = vmul.f32 %v6907_v29, %v4971_v54  ;;  %v2603_v29 = vmul.f32 %v6909_v37, %v4971_v54  ;;  %v2833_v37 = vmul.f32 %v6912_v56, %v4971_v54 }
 0x463   : > { %v5124_v7 = vpop.permute.xlu1 %1955  ;;  %v5126_v23 = vpop.permute.xlu0 %1501 }
 0x464   : > { %6906 = vst [vmem:[#allocation114_spill] sm:$0xff] %v5124_v7  ;;  %v6976_v7 = vstv %s5180_s4  ;;  %s3674_s4 = smov 123  }
 0x465   : > { %1654 = vrot.lane.b32.xlu1 %v1649_v27, %s6802_s11  ;;  %2378 = vrot.lane.b32.xlu0 %v2373_v20, %s6796_s2  ;;  %v2142_v8 = vmul.f32 %v6976_v7, %v4582_v44 }
 0x466   : > { %v6916_v57 = vstv %s6910_s24  ;;  %s5210_s24 = sld [smem:[#allocation8 + $0x2d]] }
 0x467   : > { %v5139_v3 = vpop.permute.xlu1 %1972  ;;  %v5141_v38 = vpop.permute.xlu0 %1516  ;;  %v2390_v56 = vmul.f32 %v6916_v57, %v4971_v54 }
 0x468   : > { %6908 = vst [vmem:[#allocation115_spill] sm:$0xff] %v5139_v3  ;;  %v6601_v3 = vstv %s5165_s23 }
 0x469   : > { %1671 = vrot.lane.b32.xlu1 %v1666_v50, %s6806_s22  ;;  %2608 = vrot.lane.b32.xlu0 %v2603_v29, %s6792_s27 }
 0x46b   : > { %v5154_v27 = vpop.permute.xlu1 %1989  ;;  %v5156_v20 = vpop.permute.xlu0 %1531 }
 0x46c   : > { %6911 = vst [vmem:[#allocation116_spill] sm:$0xff] %v5154_v27  ;;  %v6598_v27 = vstv %s5150_s7  ;;  %v6983_v12 = vstv %s5210_s24 }
 0x46d   : > { %1688 = vrot.lane.b32.xlu1 %v1683_v11, %s6807_s0  ;;  %2838 = vrot.lane.b32.xlu0 %v2833_v37, %s6788_s26  ;;  %v2109_v55 = vmul.f32 %v6598_v27, %v4971_v54  ;;  %v2126_v27 = vmul.f32 %v6601_v3, %v4971_v54  ;;  %v2143_v3 = vmul.f32 %v6604_v9, %v4971_v54 }
 0x46f   : > { %v5169_v50 = vpop.permute.xlu1 %2006  ;;  %v5171_v29 = vpop.permute.xlu0 %1546 }
 0x470   : > { %6914 = vst [vmem:[#allocation117_spill] sm:$0xff] %v5169_v50  ;;  %6915 = vst [vmem:[#allocation118_spill] sm:$0xff] %v5171_v29  ;;  %v6920_v50 = vstv %s6913_s17  ;;  %s5225_s17 = sld [smem:[#allocation8 + $0x27]] }
 0x471   : > { %2097 = vrot.lane.b32.xlu1 %v2092_v22, %s6788_s26  ;;  %2395 = vrot.lane.b32.xlu0 %v2390_v56, %s6802_s11  ;;  %v2620_v57 = vmul.f32 %v6920_v50, %v4971_v54 }
 0x473   : > { %v5184_v11 = vpop.permute.xlu1 %2023  ;;  %v5186_v37 = vpop.permute.xlu0 %1561 }
 0x474   : > { %6918 = vst [vmem:[#allocation119_spill] sm:$0xff] %v5184_v11  ;;  %6919 = vst [vmem:[#allocation120_spill] sm:$0xff] %v5186_v37  ;;  %v6923_v11 = vstv %s6917_s18  ;;  %s3673_s18 = smov 124  }
 0x475   : > { %2114 = vrot.lane.b32.xlu1 %v2109_v55, %s6792_s27  ;;  %2625 = vrot.lane.b32.xlu0 %v2620_v57, %s6796_s2  ;;  %v2850_v50 = vmul.f32 %v6923_v11, %v4971_v54 }
 0x477   : > { %v5199_v22 = vpop.permute.xlu1 %2040  ;;  %v5201_v56 = vpop.permute.xlu0 %1708 }
 0x478   : > { %6921 = vst [vmem:[#allocation121_spill] sm:$0xff] %v5199_v22  ;;  %6922 = vst [vmem:[#allocation122_spill] sm:$0xff] %v5201_v56  ;;  %v6926_v22 = vstv %s4947_s16  ;;  %v6607_v56 = vstv %s5195_s1  ;;  %s5240_s16 = sld [smem:[#allocation8 + $0x21]] }
 0x479   : > { %2131 = vrot.lane.b32.xlu1 %v2126_v27, %s6796_s2  ;;  %2855 = vrot.lane.b32.xlu0 %v2850_v50, %s6792_s27  ;;  %v1382_v11 = vmul.f32 %v6926_v22, %v4582_v44  ;;  %v2160_v9 = vmul.f32 %v6607_v56, %v4971_v54 }
 0x47b   : > { %v5214_v55 = vpop.permute.xlu1 %2202  ;;  %v5216_v57 = vpop.permute.xlu0 %1725 }
 0x47c   : > { %6924 = vst [vmem:[#allocation123_spill] sm:$0xff] %v5214_v55  ;;  %6925 = vst [vmem:[#allocation124_spill] sm:$0xff] %v5216_v57  ;;  %v6929_v55 = vstv %s4959_s25  ;;  %v6610_v57 = vstv %s5210_s24  ;;  %s5255_s25 = sld [smem:[#allocation8 + $0x1b]] }
 0x47d   : > { %2148 = vrot.lane.b32.xlu1 %v2143_v3, %s6802_s11  ;;  %1386 = vrot.lane.b32.xlu0 %v1382_v11, %s6788_s26  ;;  %v1399_v22 = vmul.f32 %v6929_v55, %v4582_v44  ;;  %v2177_v56 = vmul.f32 %v6610_v57, %v4971_v54 }
 0x47f   : > { %v5229_v27 = vpop.permute.xlu1 %2219  ;;  %v5231_v50 = vpop.permute.xlu0 %1742 }
 0x480   : > { %6927 = vst [vmem:[#allocation125_spill] sm:$0xff] %v5229_v27  ;;  %6928 = vst [vmem:[#allocation126_spill] sm:$0xff] %v5231_v50  ;;  %v6932_v27 = vstv %s4975_s21  ;;  %v6613_v50 = vstv %s5225_s17  ;;  %s5270_s21 = sld [smem:[#allocation8 + $0x2e]] }
 0x481   : > { %2165 = vrot.lane.b32.xlu1 %v2160_v9, %s6806_s22  ;;  %1403 = vrot.lane.b32.xlu0 %v1399_v22, %s6792_s27  ;;  %v1415_v55 = vmul.f32 %v6932_v27, %v4582_v44  ;;  %v2407_v57 = vmul.f32 %v6613_v50, %v4971_v54 }
 0x483   : > { %v5244_v3 = vpop.permute.xlu1 %2449  ;;  %v5246_v11 = vpop.permute.xlu0 %1759 }
 0x484   : > { %6930 = vst [vmem:[#allocation127_spill] sm:$0xff] %v5244_v3  ;;  %6931 = vst [vmem:[#allocation128_spill] sm:$0xff] %v5246_v11  ;;  %v6935_v3 = vstv %s4995_s14  ;;  %v6616_v11 = vstv %s5240_s16  ;;  %s5285_s14 = sld [smem:[#allocation8 + $0x28]] }
 0x485   : > { %2182 = vrot.lane.b32.xlu1 %v2177_v56, %s6807_s0  ;;  %1419 = vrot.lane.b32.xlu0 %v1415_v55, %s6796_s2  ;;  %v1431_v27 = vmul.f32 %v6935_v3, %v4582_v44  ;;  %v2637_v50 = vmul.f32 %v6616_v11, %v4971_v54 }
 0x487   : > { %v5259_v9 = vpop.permute.xlu1 %2236  ;;  %v5261_v22 = vpop.permute.xlu0 %1776 }
 0x488   : > { %6933 = vst [vmem:[#allocation129_spill] sm:$0xff] %v5259_v9  ;;  %6934 = vst [vmem:[#allocation130_spill] sm:$0xff] %v5261_v22  ;;  %v6938_v9 = vstv %s5013_s6  ;;  %v6619_v22 = vstv %s5255_s25  ;;  %s5300_s6 = sld [smem:[#allocation8 + $0x22]] }
 0x489   : > { %2412 = vrot.lane.b32.xlu1 %v2407_v57, %s6806_s22  ;;  %1435 = vrot.lane.b32.xlu0 %v1431_v27, %s6802_s11  ;;  %v1447_v3 = vmul.f32 %v6938_v9, %v4582_v44  ;;  %v2867_v11 = vmul.f32 %v6619_v22, %v4971_v54 }
 0x48b   : > { %v5274_v56 = vpop.permute.xlu1 %2466  ;;  %v5276_v55 = vpop.permute.xlu0 %1793 }
 0x48c   : > { %6936 = vst [vmem:[#allocation131_spill] sm:$0xff] %v5274_v56  ;;  %6937 = vst [vmem:[#allocation132_spill] sm:$0xff] %v5276_v55  ;;  %v6941_v56 = vstv %s5029_s29  ;;  %v6622_v55 = vstv %s5270_s21  ;;  %s5315_s29 = sld [smem:[#allocation8 + $0x2f]] }
 0x48d   : > { %2642 = vrot.lane.b32.xlu1 %v2637_v50, %s6802_s11  ;;  %1451 = vrot.lane.b32.xlu0 %v1447_v3, %s6806_s22  ;;  %v1463_v9 = vmul.f32 %v6941_v56, %v4582_v44  ;;  %v2424_v22 = vmul.f32 %v6622_v55, %v4971_v54 }
 0x48f   : > { %v5289_v57 = vpop.permute.xlu1 %2696  ;;  %v5291_v27 = vpop.permute.xlu0 %2287 }
 0x490   : > { %6939 = vst [vmem:[#allocation133_spill] sm:$0xff] %v5289_v57  ;;  %6940 = vst [vmem:[#allocation134_spill] sm:$0xff] %v5291_v27  ;;  %v6944_v57 = vstv %s5045_s30  ;;  %v6625_v27 = vstv %s5285_s14  ;;  %s5330_s30 = sld [smem:[#allocation8 + $0x29]] }
 0x491   : > { %2872 = vrot.lane.b32.xlu1 %v2867_v11, %s6796_s2  ;;  %1467 = vrot.lane.b32.xlu0 %v1463_v9, %s6807_s0  ;;  %v1597_v56 = vmul.f32 %v6944_v57, %v4582_v44  ;;  %v2654_v55 = vmul.f32 %v6625_v27, %v4971_v54 }
 0x493   : > { %v5304_v50 = vpop.permute.xlu1 %2253  ;;  %v5306_v3 = vpop.permute.xlu0 %2517 }
 0x494   : > { %6942 = vst [vmem:[#allocation135_spill] sm:$0xff] %v5304_v50  ;;  %6943 = vst [vmem:[#allocation136_spill] sm:$0xff] %v5306_v3  ;;  %v6947_v3 = vstv %s5060_s3  ;;  %v6630_v50 = vstv %s5300_s6  ;;  %s5555_s3 = sld [smem:[#allocation8 + $0x37]] }
 0x495   : > { %2429 = vrot.lane.b32.xlu1 %v2424_v22, %s6807_s0  ;;  %1601 = vrot.lane.b32.xlu0 %v1597_v56, %s6788_s26  ;;  %v1614_v57 = vmul.f32 %v6947_v3, %v4582_v44  ;;  %v2884_v27 = vmul.f32 %v6630_v50, %v4971_v54 }
 0x496   : > { %v6637_v15 = vstv %s5330_s30 }
 0x497   : > { %v5319_v11 = vpop.permute.xlu1 %2483  ;;  %v5321_v9 = vpop.permute.xlu0 %2747 }
 0x498   : > { %6945 = vst [vmem:[#allocation137_spill] sm:$0xff] %v5319_v11  ;;  %6946 = vst [vmem:[#allocation138_spill] sm:$0xff] %v5321_v9  ;;  %v6950_v9 = vstv %s5075_s9  ;;  %v6633_v11 = vstv %s5315_s29  ;;  %s5558_s9 = sld [smem:[#allocation8 + $0x31]] }
 0x499   : > { %2659 = vrot.lane.b32.xlu1 %v2654_v55, %s6806_s22  ;;  %1618 = vrot.lane.b32.xlu0 %v1614_v57, %s6792_s27  ;;  %v1631_v3 = vmul.f32 %v6950_v9, %v4582_v44 }
 0x49b   : > { %v5334_v22 = vpop.permute.xlu1 %2713  ;;  %v5336_v56 = vpop.permute.xlu0 %2977 }
 0x49c   : > { %6948 = vst [vmem:[#allocation139_spill] sm:$0xff] %v5334_v22  ;;  %6949 = vst [vmem:[#allocation140_spill] sm:$0xff] %v5336_v56  ;;  %v2671_v56 = vmul.f32 %v6633_v11, %v4971_v54  ;;  %v6953_v22 = vstv %s5090_s12  ;;  %s5575_s12 = sld [smem:[#allocation8]] }
 0x49d   : > { %2889 = vrot.lane.b32.xlu1 %v2884_v27, %s6802_s11  ;;  %1635 = vrot.lane.b32.xlu0 %v1631_v3, %s6796_s2  ;;  %v1648_v50 = vmul.f32 %v6953_v22, %v4582_v44  ;;  %v2901_v3 = vmul.f32 %v6637_v15, %v4971_v54 }
 0x49f   : > { %v5347_v55 = vpop.permute.xlu1 %2943  ;;  %v5349_v57 = vpop.permute.xlu0 %2534 }
 0x4a0   : > { %6951 = vst [vmem:[#allocation141_spill] sm:$0xff] %v5347_v55  ;;  %6952 = vst [vmem:[#allocation142_spill] sm:$0xff] %v5349_v57  ;;  %v6956_v57 = vstv %s5105_s20  ;;  %s7007_s20 = sld [smem:[#allocation77_spill]] }
 0x4a1   : > { %2676 = vrot.lane.b32.xlu1 %v2671_v56, %s6807_s0  ;;  %1652 = vrot.lane.b32.xlu0 %v1648_v50, %s6802_s11  ;;  %v1665_v11 = vmul.f32 %v6956_v57, %v4582_v44  ;;  %v6959_v56 = vstv %s4945_s8  ;;  %s6969_s8 = sld [smem:[#allocation75_spill]] }
 0x4a2   : > { %v1844_v55 = vmul.f32 %v6959_v56, %v4582_v44 }
 0x4a3   : > { %v5360_v27 = vpop.permute.xlu1 %2270  ;;  %v5362_v9 = vpop.permute.xlu0 %2764 }
 0x4a4   : > { %6954 = vst [vmem:[#allocation143_spill] sm:$0xff] %v5360_v27  ;;  %6955 = vst [vmem:[#allocation144_spill] sm:$0xff] %v5362_v9  ;;  %v6960_v9 = vstv %s5120_s10  ;;  %s7010_s10 = sld [smem:[#allocation79_spill]] }
 0x4a5   : > { %2906 = vrot.lane.b32.xlu1 %v2901_v3, %s6806_s22  ;;  %1669 = vrot.lane.b32.xlu0 %v1665_v11, %s6806_s22  ;;  %v1682_v27 = vmul.f32 %v6960_v9, %v4582_v44  ;;  %v6963_v3 = vstv %s4957_s28  ;;  %v6967_v9 = vstv %s4969_s13  ;;  %s6972_s28 = sld [smem:[#allocation90_spill]] }
 0x4a6   : > { %v1861_v15 = vmul.f32 %v6963_v3, %v4582_v44  ;;  %v1878_v56 = vmul.f32 %v6967_v9, %v4582_v44  ;;  %s5488_s13 = sld [smem:[#allocation8 + $0x32]] }
 0x4a7   : > { %v5372_v22 = vpop.permute.xlu1 %2500  ;;  %v5374_v50 = vpop.permute.xlu0 %2994  ;;  %v6979_v46 = vstv %s6969_s8 }
 0x4a8   : > { %6957 = vst [vmem:[#allocation145_spill] sm:$0xff] %v5372_v22  ;;  %6958 = vst [vmem:[#allocation146_spill] sm:$0xff] %v5374_v50  ;;  %v6964_v50 = vstv %s5135_s19  ;;  %s7011_s19 = sld [smem:[#allocation91_spill]] }
 0x4a9   : > { %1848 = vrot.lane.b32.xlu1 %v1844_v55, %s6788_s26  ;;  %1686 = vrot.lane.b32.xlu0 %v1682_v27, %s6807_s0  ;;  %v2091_v22 = vmul.f32 %v6964_v50, %v4582_v44  ;;  %v6971_v50 = vstv %s4991_s15  ;;  %s5494_s15 = sld [smem:[#allocation8 + $0x1]] }
 0x4aa   : > { %v1895_v3 = vmul.f32 %v6971_v50, %v4582_v44 }
 0x4ab   : > { %v5384_v57 = vpop.permute.xlu1 %2730  ;;  %v5386_v11 = vpop.permute.xlu0 %2781  ;;  %v6980_v37 = vstv %s6972_s28 }
 0x4ac   : > { %6961 = vst [vmem:[#allocation147_spill] sm:$0xff] %v5384_v57  ;;  %6962 = vst [vmem:[#allocation148_spill] sm:$0xff] %v5386_v11  ;;  %v6968_v11 = vstv %s5150_s7  ;;  %v1840_v29 = vmul.f32 %v6980_v37, %v4971_v54  ;;  %s7013_s7 = sld [smem:[#allocation92_spill]] }
 0x4ad   : > { %1865 = vrot.lane.b32.xlu1 %v1861_v15, %s6792_s27  ;;  %2095 = vrot.lane.b32.xlu0 %v2091_v22, %s6788_s26  ;;  %v2108_v57 = vmul.f32 %v6968_v11, %v4582_v44 }
 0x4af   : > { %v5396_v55 = vpop.permute.xlu1 %2960  ;;  %v5398_v27 = vpop.permute.xlu0 %3011 }
 0x4b0   : > { %6965 = vst [vmem:[#allocation149_spill] sm:$0xff] %v5396_v55  ;;  %6966 = vst [vmem:[#allocation150_spill] sm:$0xff] %v5398_v27  ;;  %v6973_v27 = vstv %s5165_s23  ;;  %s7014_s23 = sld [smem:[#allocation93_spill]] }
 0x4b1   : > { %1882 = vrot.lane.b32.xlu1 %v1878_v56, %s6796_s2  ;;  %2112 = vrot.lane.b32.xlu0 %v2108_v57, %s6792_s27  ;;  %v2125_v9 = vmul.f32 %v6973_v27, %v4582_v44  ;;  %v6975_v57 = vstv %s5009_s5  ;;  %s5527_s5 = sld [smem:[#allocation8 + $0x6]] }
 0x4b2   : > { %v1912_v55 = vmul.f32 %v6975_v57, %v4582_v44  ;;  %v1947_v57 = vmul.f32 %v5439_v14, %v6979_v46  ;;  %v2176_v46 = vmul.f32 %v6983_v12, %v4582_v44  ;;  %v6986_v12 = vstv %s5225_s17 }
 0x4b3   : > { %v5408_v15 = vpop.permute.xlu1 %1388  ;;  %v5410_v22 = vpop.permute.xlu0 %1850 }
 0x4b4   : > { %6970 = vst [vmem:[#allocation151_spill] sm:$0xff] %v5410_v22  ;;  %v1859_v7 = vadd.f32 %v5410_v22, %v1840_v29  ;;  %v2406_v22 = vmul.f32 %v6986_v12, %v4582_v44  ;;  %v6989_v12 = vstv %s5240_s16  ;;  %s7186_s16 = sld [smem:[#allocation189_spill]] }
 0x4b5   : > { %1899 = vrot.lane.b32.xlu1 %v1895_v3, %s6802_s11  ;;  %2129 = vrot.lane.b32.xlu0 %v2125_v9, %s6796_s2  ;;  %v6978_v3 = vstv %s5195_s1  ;;  %s3675_s1 = smov 122  }
 0x4b6   : > { %v2159_v9 = vmul.f32 %v6978_v3, %v4582_v44 }
 0x4b7   : > { %v5420_v11 = vpop.permute.xlu1 %1405  ;;  %v5422_v56 = vpop.permute.xlu0 %1867 }
 0x4b8   : > { %6974 = vst [vmem:[#allocation152_spill] sm:$0xff] %v5422_v56  ;;  %v1876_v37 = vadd.f32 %v5422_v56, %v1859_v7 }
 0x4b9   : > { %1916 = vrot.lane.b32.xlu1 %v1912_v55, %s6806_s22  ;;  %2146 = vrot.lane.b32.xlu0 %v2142_v8, %s6802_s11  ;;  %v1966_v8 = vadd.f32 %v4849_v28, %v1947_v57 }
 0x4bb   : > { %v5432_v27 = vpop.permute.xlu1 %1421  ;;  %v5434_v50 = vpop.permute.xlu0 %1884  ;;  %v1983_v13 = vadd.f32 %v4861_v31, %v1966_v8 }
 0x4bc   : > { %6977 = vst [vmem:[#allocation153_spill] sm:$0xff] %v5434_v50  ;;  %v1893_v29 = vadd.f32 %v5434_v50, %v1876_v37 }
 0x4bd   : > { %1933 = vrot.lane.b32.xlu1 %v4610_v62, %s6807_s0  ;;  %2163 = vrot.lane.b32.xlu0 %v2159_v9, %s6806_s22  ;;  %v2000_v62 = vadd.f32 %v4873_v63, %v1983_v13 }
 0x4bf   : > { %v5452_v55 = vpop.permute.xlu1 %1437  ;;  %v5454_v3 = vpop.permute.xlu0 %1901  ;;  %v2017_v8 = vadd.f32 %v4885_v48, %v2000_v62  ;;  %v2636_v62 = vmul.f32 %v6989_v12, %v4582_v44 }
 0x4c0   : > { %6981 = vst [vmem:[#allocation154_spill] sm:$0xff] %v5452_v55  ;;  %6982 = vst [vmem:[#allocation155_spill] sm:$0xff] %v5454_v3  ;;  %v1910_v7 = vadd.f32 %v5454_v3, %v1893_v29 }
 0x4c1   : > { %2342 = vrot.lane.b32.xlu1 %v4617_v4, %s6788_s26  ;;  %2180 = vrot.lane.b32.xlu0 %v2176_v46, %s6807_s0  ;;  %v2034_v4 = vadd.f32 %v4897_v49, %v2017_v8 }
 0x4c3   : > { %v5466_v9 = vpop.permute.xlu1 %1453  ;;  %v5468_v57 = vpop.permute.xlu0 %1918  ;;  %v2051_v29 = vadd.f32 %v4906_v61, %v2034_v4  ;;  %v6992_v4 = vstv %s5255_s25 }
 0x4c4   : > { %6984 = vst [vmem:[#allocation156_spill] sm:$0xff] %v5466_v9  ;;  %6985 = vst [vmem:[#allocation157_spill] sm:$0xff] %v5468_v57  ;;  %v1927_v13 = vadd.f32 %v5468_v57, %v1910_v7 }
 0x4c5   : > { %2359 = vrot.lane.b32.xlu1 %v4622_v2, %s6792_s27  ;;  %2410 = vrot.lane.b32.xlu0 %v2406_v22, %s6806_s22 }
 0x4c7   : > { %v5480_v46 = vpop.permute.xlu1 %1469  ;;  %v5482_v37 = vpop.permute.xlu0 %1935 }
 0x4c8   : > { %6987 = vst [vmem:[#allocation158_spill] sm:$0xff] %v5480_v46  ;;  %6988 = vst [vmem:[#allocation159_spill] sm:$0xff] %v5482_v37  ;;  %v1944_v2 = vadd.f32 %v5482_v37, %v1927_v13  ;;  %v2866_v13 = vmul.f32 %v6992_v4, %v4582_v44  ;;  %v6659_v37 = vstv %s5494_s15 }
 0x4c9   : > { %2589 = vrot.lane.b32.xlu1 %v4636_v39, %s6788_s26  ;;  %2640 = vrot.lane.b32.xlu0 %v2636_v62, %s6802_s11  ;;  %v6995_v62 = vstv %s5270_s21  ;;  %v1593_v3 = vmul.f32 %v6659_v37, %v4971_v54 }
 0x4ca   : > { %v5496_v22 = vadd.f32 %v2051_v29, %v1944_v2  ;;  %v2423_v29 = vmul.f32 %v6995_v62, %v4582_v44  ;;  %v6657_v2 = vstv %s5488_s13 }
 0x4cb   : > { %v5498_v8 = vpop.permute.xlu1 %1603  ;;  %v5500_v7 = vpop.permute.xlu0 %2344  ;;  %v1700_v62 = vmul.f32 %v5439_v14, %v6657_v2  ;;  %v7001_v2 = vstv %s5300_s6 }
 0x4cc   : > { %6990 = vst [vmem:[#allocation160_spill] sm:$0xff] %v5498_v8  ;;  %6991 = vst [vmem:[#allocation161_spill] sm:$0xff] %v5500_v7  ;;  %v2883_v56 = vmul.f32 %v7001_v2, %v4582_v44 }
 0x4cd   : > { %2376 = vrot.lane.b32.xlu1 %v4645_v19, %s6796_s2  ;;  %2870 = vrot.lane.b32.xlu0 %v2866_v13, %s6796_s2  ;;  %v6998_v13 = vstv %s5285_s14 }
 0x4ce   : > { %v2653_v57 = vmul.f32 %v6998_v13, %v4582_v44 }
 0x4cf   : > { %v5508_v39 = vpop.permute.xlu1 %1620  ;;  %v5510_v12 = vpop.permute.xlu0 %2361 }
 0x4d0   : > { %6993 = vst [vmem:[#allocation162_spill] sm:$0xff] %v5508_v39  ;;  %6994 = vst [vmem:[#allocation163_spill] sm:$0xff] %v5510_v12 }
 0x4d1   : > { %2606 = vrot.lane.b32.xlu1 %v4650_v32, %s6792_s27  ;;  %2427 = vrot.lane.b32.xlu0 %v2423_v29, %s6807_s0  ;;  %v1719_v32 = vadd.f32 %v4916_v51, %v1700_v62  ;;  %v1612_v29 = vadd.f32 %v5498_v8, %v1593_v3  ;;  %v7004_v62 = vstv %s5315_s29 }
 0x4d3   : > { %v5520_v4 = vpop.permute.xlu1 %1637  ;;  %v5522_v19 = vpop.permute.xlu0 %2591  ;;  %v1736_v37 = vadd.f32 %v4925_v43, %v1719_v32  ;;  %v2670_v32 = vmul.f32 %v7004_v62, %v4582_v44  ;;  %v3543_v62 = vld [vmem:[#allocation2] sm:$0x77] }
 0x4d4   : > { %6996 = vst [vmem:[#allocation164_spill] sm:$0xff] %v5520_v4  ;;  %6997 = vst [vmem:[#allocation165_spill] sm:$0xff] %v5522_v19  ;;  %v1629_v19 = vadd.f32 %v5508_v39, %v1612_v29  ;;  %v2826_v29 = vstv %s5527_s5 }
 0x4d5   : > { %2836 = vrot.lane.b32.xlu1 %v4658_v58, %s6788_s26  ;;  %2657 = vrot.lane.b32.xlu0 %v2653_v57, %s6806_s22  ;;  %s5549_s26 = sld [smem:[#allocation8 + $0x30]]  ;;  %v1753_v58 = vadd.f32 %v4933_v0, %v1736_v37 }
 0x4d6   : > { %v1646_v3 = vadd.f32 %v5520_v4, %v1629_v19  ;;  %v2828_v19 = vmul.f32 %v2826_v29, %v4971_v54 }
 0x4d7   : > { %v5540_v13 = vpop.permute.xlu1 %1654  ;;  %v5542_v50 = vpop.permute.xlu0 %2378 }
 0x4d8   : > { %6999 = vst [vmem:[#allocation166_spill] sm:$0xff] %v5540_v13  ;;  %7000 = vst [vmem:[#allocation167_spill] sm:$0xff] %v5542_v50 }
 0x4d9   : > { %2393 = vrot.lane.b32.xlu1 %v4665_v18, %s6802_s11  ;;  %2887 = vrot.lane.b32.xlu0 %v2883_v56, %s6802_s11  ;;  %v1770_v18 = vadd.f32 %v4941_v17, %v1753_v58  ;;  %v1663_v56 = vadd.f32 %v5540_v13, %v1646_v3  ;;  %s5570_s11 = sld [smem:[#allocation8 + $0x61]]  ;;  %v7008_v13 = vstv %s5330_s30 }
 0x4db   : > { %v5560_v57 = vpop.permute.xlu1 %1671  ;;  %v5562_v2 = vpop.permute.xlu0 %2608  ;;  %v1787_v37 = vadd.f32 %v4953_v59, %v1770_v18 }
 0x4dc   : > { %7002 = vst [vmem:[#allocation168_spill] sm:$0xff] %v5560_v57  ;;  %7003 = vst [vmem:[#allocation169_spill] sm:$0xff] %v5562_v2  ;;  %v1680_v44 = vadd.f32 %v5560_v57, %v1663_v56  ;;  %v2916_v56 = vstv %s5549_s26  ;;  %v2933_v57 = vstv %s5555_s3  ;;  %v1478_v2 = vstv %s5558_s9  ;;  %s440_s3 = sld [smem:[#allocation3]] }
 0x4dd   : > { %2623 = vrot.lane.b32.xlu1 %v4670_v16, %s6796_s2  ;;  %2674 = vrot.lane.b32.xlu0 %v2670_v32, %s6807_s0  ;;  %v2900_v16 = vmul.f32 %v3543_v62, %v7008_v13  ;;  %s7009_s2 = sld [smem:[#allocation78_spill]]  ;;  %v1804_v32 = vadd.f32 %v4965_v21, %v1787_v37  ;;  %v5613_v46 = vmul.f32 %v5439_v14, %v2933_v57 }
 0x4de   : > { %s7191_s9 = sld [smem:[#allocation17_spill]] }
 0x4df   : > { %v5580_v58 = vpop.permute.xlu1 %1688  ;;  %v5582_v3 = vpop.permute.xlu0 %2838  ;;  %7018 = vst [vmem:[#allocation173_spill] sm:$0xff] %v5613_v46  ;;  %v7024_v46 = vstv %s7013_s7 }
 0x4e0   : > { %7005 = vst [vmem:[#allocation170_spill] sm:$0xff] %v5580_v58  ;;  %7006 = vst [vmem:[#allocation171_spill] sm:$0xff] %v5582_v3  ;;  %v1697_v4 = vadd.f32 %v5580_v58, %v1680_v44  ;;  %v2847_v18 = vadd.f32 %v5582_v3, %v2828_v19  ;;  %v2918_v44 = vmul.f32 %v2916_v56, %v4971_v54  ;;  %v7015_v3 = vstv %s7007_s20 }
 0x4e1   : > { %2853 = vrot.lane.b32.xlu1 %v4681_v52, %s6792_s27  ;;  %2904 = vrot.lane.b32.xlu0 %v2900_v16, %s6806_s22  ;;  %v2917_v19 = vmul.f32 %v3543_v62, %v2916_v56  ;;  %v2194_v52 = vmul.f32 %v5439_v14, %v7015_v3  ;;  %v3023_v58 = vstv %s5570_s11  ;;  %v1378_v56 = vstv %s5575_s12  ;;  %s3671_s27 = smov 126   ;;  %s3672_s22 = smov 125  }
 0x4e2   : > { %v1808_v39 = vadd.f32 %v1804_v32, %v1697_v4  ;;  %v7017_v4 = vstv %s7010_s10  ;;  %v7019_v3 = vstv %s5488_s13  ;;  %v5634_v7 = vmul.f32 %v7024_v46, %v4971_v54  ;;  %s7192_s11 = sld [smem:[#allocation22_spill]] }
 0x4e3   : > { %v5595_v13 = vpop.permute.xlu1 %2097  ;;  %v5597_v37 = vpop.permute.xlu0 %2395  ;;  %v7016_v8 = vstv %s7009_s2  ;;  %v5610_v32 = vmul.f32 %v5439_v14, %v7017_v4  ;;  %v7022_v4 = vstv %s7011_s19  ;;  %v1491_v46 = vrot.slane %v4847_v53, 4 }
 0x4e4   : > { %7012 = vst [vmem:[#allocation172_spill] sm:$0xff] %v5597_v37  ;;  %v2441_v16 = vmul.f32 %v5439_v14, %v7016_v8  ;;  %v3544_v37 = vld [vmem:[#allocation2 + $0xc] sm:$0x77]  ;;  %v5629_v9 = vmul.f32 %v7022_v4, %v4971_v54  ;;  %7025 = vst [vmem:[#allocation177_spill] sm:$0xff] %v5634_v7  ;;  %s3443_s12 = smul.u32 3072, %s7191_s9 }
 0x4e5   : > { %2923 = vrot.lane.b32.xlu1 %v2918_v44, %s6807_s0  ;;  %2921 = vrot.lane.b32.xlu0 %v2917_v19, %s6807_s0  ;;  %v5618_v50 = vmul.f32 %v3544_v37, %v1478_v2  ;;  %v5622_v12 = vmul.f32 %v3544_v37, %v7019_v3  ;;  %v5624_v8 = vmul.f32 %v3544_v37, %v2933_v57  ;;  %v7026_v44 = vstv %s7014_s23  ;;  %s7214_s23 = sld [smem:[#allocation190_spill]] }
 0x4e6   : > { %7023 = vst [vmem:[#allocation176_spill] sm:$0xff] %v5629_v9  ;;  %v2087_v19 = vmul.f32 %v7026_v44, %v4971_v54  ;;  %v3025_v3 = vmul.f32 %v5439_v14, %v3023_v58  ;;  %v5644_v57 = vmul.f32 %v3543_v62, %v1378_v56  ;;  %v5650_v9 = vmul.f32 %v3543_v62, %v2826_v29 }
 0x4e7   : > { %7020 = vst [vmem:[#allocation174_spill] sm:$0xff] %v5622_v12  ;;  %7021 = vst [vmem:[#allocation175_spill] sm:$0xff] %v5624_v8  ;;  %v5639_v55 = vpop.permute.xlu1 %2114  ;;  %v5641_v2 = vpop.permute.xlu0 %2625  ;;  %v3024_v12 = vmul.f32 %v3544_v37, %v3023_v58  ;;  %v7028_v8 = vstv %s5494_s15  ;;  %v2213_v29 = vadd.f32 %v4918_v45, %v2194_v52  ;;  %v2707_v14 = vadd.f32 %v4967_v5, %v5610_v32 }
 0x4e8   : > { %7027 = vst [vmem:[#allocation178_spill] sm:$0xff] %v5641_v2  ;;  %v5648_v4 = vmul.f32 %v3543_v62, %v7028_v8  ;;  %7029 = vst [vmem:[#allocation179_spill] sm:$0xff] %v5650_v9  ;;  %v2106_v53 = vadd.f32 %v5595_v13, %v2087_v19  ;;  %v1408_v32 = vrot.slane %v5420_v11, 4  ;;  %s7205_s20 = smul.u32 192, %s7192_s11 }
 0x4e9   : > { %3030 = vrot.lane.b32.xlu1 %v3025_v3, %s6807_s0  ;;  %3028 = vrot.lane.b32.xlu0 %v3024_v12, %s6807_s0  ;;  %v2230_v7 = vadd.f32 %v4927_v26, %v2213_v29  ;;  %s3670_s0 = smov 127  }
 0x4ea   : > { %s6319_s2 = scalar_lea.vmem [#allocation9], %s7205_s20 }
 0x4eb   : > { %v5666_v3 = vpop.permute.xlu1 %2131  ;;  %v5668_v12 = vpop.permute.xlu0 %2855  ;;  %v2247_v44 = vadd.f32 %v4943_v60, %v2230_v7  ;;  %v2123_v7 = vadd.f32 %v5639_v55, %v2106_v53  ;;  %v1520_v53 = vrot.slane %v5141_v38, 4  ;;  %s3231_s10 = sshll.u32 %s6319_s2, 4  ;;  %s6357_s10 = int_to_ptr.vmem [resolvable:$true] %s3231_s10 }
 0x4ec   : > { %7030 = vst [vmem:[#allocation180_spill] sm:$0xff] %v5668_v12  ;;  %v5674_v52 = vadd.f32 %v5668_v12, %v2847_v18  ;;  %v2460_v18 = vadd.f32 %v4935_v6, %v2441_v16  ;;  %v1391_v16 = vrot.slane %v5408_v15, 4 }
 0x4ed   : > { %1827 = vrot.lane.b32.xlu0 %v1808_v39, %s3670_s0  ;;  %2074 = vrot.lane.b32.xlu1 %v5496_v22, %s3671_s27  ;;  %v1490_v39 = vrot.slane %v5111_v10, 4  ;;  %v2264_v29 = vadd.f32 %v4983_v47, %v2247_v44  ;;  %v2140_v44 = vadd.f32 %v5666_v3, %v2123_v7 }
 0x4ee   : > { %v2477_v56 = vadd.f32 %v4955_v42, %v2460_v18  ;;  %v1505_v18 = vrot.slane %v5126_v23, 4  ;;  %v7038_v42 = vld [vmem:[#allocation120_spill] sm:$0xff] }
 0x4ef   : > { %v5691_v58 = vpop.permute.xlu1 %2148  ;;  %v1387_v22 = vpop.permute.xlu0 %1386  ;;  %v2281_v54 = vadd.f32 %v5051_v41, %v2264_v29  ;;  %v1492_v19 = vsel %vm1392_vm1, %v1490_v39, %v1491_v46 }
 0x4f0   : > { %v1390_v37 = vrot.slane %v1387_v22, 4  ;;  %v2157_v29 = vadd.f32 %v5691_v58, %v2140_v44  ;;  %v2494_v39 = vadd.f32 %v5001_v35, %v2477_v56 }
 0x4f2   : > { %v1393_v15 = vsel %vm1392_vm1, %v1390_v37, %v1391_v16  ;;  %v1535_v16 = vrot.slane %v5156_v20, 4  ;;  %v7035_v37 = vld [vmem:[#allocation104_spill] sm:$0xff] }
 0x4f3   : > { %v1395_v8 = vsel %vm1394_vm2, %v1387_v22, %v1393_v15  ;;  %v5709_v12 = vpop.permute.xlu1 %2165  ;;  %v1404_v62 = vpop.permute.xlu0 %1403  ;;  %v2298_v22 = vadd.f32 %v4981_v33, %v2281_v54  ;;  %v1493_v15 = vsel %vm1394_vm2, %v5111_v10, %v1492_v19  ;;  %v1424_v10 = vrot.slane %v5432_v27, 4 }
 0x4f4   : > { %7031 = vst [vmem:[#allocation181_spill] sm:$0xff] %v5709_v12  ;;  %v1397_v7 = vadd.f32 %v1395_v8, %v5644_v57  ;;  %v1407_v9 = vrot.slane %v1404_v62, 4  ;;  %v2174_v11 = vadd.f32 %v5709_v12, %v2157_v29  ;;  %v7032_v57 = vrot.slane %v4859_v40, 4 }
 0x4f5   : > { %v1565_v29 = vrot.slane %v7038_v42, 4 }
 0x4f6   : > { %v1409_v44 = vsel %vm1392_vm1, %v1407_v9, %v1408_v32  ;;  %v1507_v8 = vsel %vm1392_vm1, %v1505_v18, %v7032_v57  ;;  %v7034_v18 = vld [vmem:[#allocation103_spill] sm:$0xff] }
 0x4f7   : > { %v1411_v56 = vsel %vm1410_vm3, %v1404_v62, %v1409_v44  ;;  %v5729_v46 = vpop.permute.xlu1 %2182  ;;  %v1420_v54 = vpop.permute.xlu0 %1419  ;;  %v2724_v57 = vadd.f32 %v7034_v18, %v2707_v14  ;;  %v1495_v62 = vadd.f32 %v1493_v15, %v5618_v50  ;;  %v1508_v44 = vsel %vm1410_vm3, %v5126_v23, %v1507_v8 }
 0x4f8   : > { %7033 = vst [vmem:[#allocation182_spill] sm:$0xff] %v5729_v46  ;;  %v1413_v19 = vadd.f32 %v1411_v56, %v1397_v7  ;;  %v2191_v9 = vadd.f32 %v5729_v46, %v2174_v11  ;;  %v1423_v32 = vrot.slane %v1420_v54, 4  ;;  %v7036_v7 = vrot.slane %v4871_v30, 4  ;;  %v7037_v56 = vld [vmem:[#allocation118_spill] sm:$0xff]  ;;  %v7042_v30 = vld [vmem:[#allocation105_spill] sm:$0xff] }
 0x4f9   : > { %v1550_v40 = vrot.slane %v7037_v56, 4  ;;  %v7040_v50 = vrot.slane %v4883_v25, 4  ;;  %v1510_v33 = vadd.f32 %v1508_v44, %v1495_v62 }
 0x4fa   : > { %v2302_v5 = vadd.f32 %v2298_v22, %v2191_v9  ;;  %v1425_v27 = vsel %vm1392_vm1, %v1423_v32, %v1424_v10  ;;  %v1522_v11 = vsel %vm1392_vm1, %v1520_v53, %v7036_v7  ;;  %v7041_v22 = vld [vmem:[#allocation154_spill] sm:$0xff]  ;;  %v7043_v9 = vld [vmem:[#allocation108_spill] sm:$0xff] }
 0x4fb   : > { %v1427_v14 = vsel %vm1426_vm4, %v1420_v54, %v1425_v27  ;;  %v5747_v18 = vpop.permute.xlu1 %2412  ;;  %v1436_v35 = vpop.permute.xlu0 %1435  ;;  %v1537_v23 = vsel %vm1392_vm1, %v1535_v16, %v7040_v50  ;;  %v1440_v15 = vrot.slane %v7041_v22, 4  ;;  %v2511_v32 = vadd.f32 %v7043_v9, %v2494_v39  ;;  %v7044_v7 = vld [vmem:[#allocation110_spill] sm:$0xff]  ;;  %v7046_v16 = vld [vmem:[#allocation176_spill] sm:$0xff]  ;;  %v7047_v50 = vld [vmem:[#allocation161_spill] sm:$0xff] }
 0x4fc   : > { %7039 = vst [vmem:[#allocation104_spill] sm:$0xff] %v5747_v18  ;;  %v1429_v8 = vadd.f32 %v1427_v14, %v1413_v19  ;;  %v1439_v10 = vrot.slane %v1436_v35, 4  ;;  %2321 = vrot.lane.b32.xlu0 %v2302_v5, %s3672_s22  ;;  %v2741_v54 = vadd.f32 %v7044_v7, %v2724_v57  ;;  %v7045_v27 = vld [vmem:[#allocation114_spill] sm:$0xff]  ;;  %v1523_v25 = vsel %vm1426_vm4, %v5141_v38, %v1522_v11  ;;  %v7051_v11 = vld [vmem:[#allocation156_spill] sm:$0xff] }
 0x4fd   : > { %v1959_v46 = vrot.slane %v7045_v27, 4  ;;  %v2353_v22 = vadd.f32 %v7047_v50, %v7046_v16  ;;  %v1538_v5 = vsel %vm1442_vm5, %v5156_v20, %v1537_v23  ;;  %v7048_v14 = vrot.slane %v4895_v34, 4  ;;  %v7052_v50 = vld [vmem:[#allocation163_spill] sm:$0xff]  ;;  %v7053_v20 = vld [vmem:[#allocation173_spill] sm:$0xff] }
 0x4fe   : > { %v1441_v19 = vsel %vm1392_vm1, %v1439_v10, %v1440_v15  ;;  %v7049_v57 = vrot.slane %v4904_v1, 4  ;;  %v1456_v16 = vrot.slane %v7051_v11, 4  ;;  %v2954_v34 = vadd.f32 %v7042_v30, %v7053_v20  ;;  %v7056_v11 = vld [vmem:[#allocation158_spill] sm:$0xff] }
 0x4ff   : > { %v1552_v39 = vsel %vm1392_vm1, %v1550_v40, %v7048_v14  ;;  %v1443_v62 = vsel %vm1442_vm5, %v1436_v35, %v1441_v19  ;;  %v5772_v44 = vpop.permute.xlu1 %2642  ;;  %v1452_v38 = vpop.permute.xlu0 %1451  ;;  %v2370_v15 = vadd.f32 %v7052_v50, %v2353_v22  ;;  %v2528_v40 = vadd.f32 %v4999_v36, %v2511_v32  ;;  %v7055_v14 = vld [vmem:[#allocation167_spill] sm:$0xff] }
 0x500   : > { %v1567_v53 = vsel %vm1392_vm1, %v1565_v29, %v7049_v57  ;;  %7050 = vst [vmem:[#allocation118_spill] sm:$0xff] %v5772_v44  ;;  %v1445_v10 = vadd.f32 %v1443_v62, %v1429_v8  ;;  %v1455_v12 = vrot.slane %v1452_v38, 4  ;;  %v2758_v1 = vadd.f32 %v5017_v24, %v2741_v54 }
 0x501   : > { %v1525_v23 = vadd.f32 %v1523_v25, %v1510_v33  ;;  %v7054_v29 = vrot.slane %v4849_v28, 4  ;;  %v1553_v19 = vsel %vm1458_vm6, %v7037_v56, %v1552_v39  ;;  %v2387_v57 = vadd.f32 %v7055_v14, %v2370_v15  ;;  %v7058_v25 = vld [vmem:[#allocation172_spill] sm:$0xff]  ;;  %v7059_v15 = vld [vmem:[#allocation106_spill] sm:$0xff] }
 0x502   : > { %v1457_v8 = vsel %vm1392_vm1, %v1455_v12, %v1456_v16  ;;  %v1568_v62 = vsel %vm1474_vm7, %v7038_v42, %v1567_v53  ;;  %v1472_v32 = vrot.slane %v7056_v11, 4  ;;  %v7060_v16 = vld [vmem:[#allocation107_spill] sm:$0xff]  ;;  %v7073_v14 = vld [vmem:[#allocation112_spill] sm:$0xff] }
 0x503   : > { %v1961_v35 = vsel %vm1392_vm1, %v1959_v46, %v7054_v29  ;;  %v1540_v22 = vadd.f32 %v1538_v5, %v1525_v23  ;;  %v1459_v54 = vsel %vm1458_vm6, %v1452_v38, %v1457_v8  ;;  %v5791_v33 = vpop.permute.xlu1 %2872  ;;  %v1468_v28 = vpop.permute.xlu0 %1467  ;;  %v2404_v46 = vadd.f32 %v7058_v25, %v2387_v57 }
 0x504   : > { %7057 = vst [vmem:[#allocation120_spill] sm:$0xff] %v5791_v33  ;;  %v1461_v20 = vadd.f32 %v1459_v54, %v1445_v10  ;;  %v2881_v56 = vadd.f32 %v5791_v33, %v5674_v52  ;;  %v1471_v39 = vrot.slane %v1468_v28, 4  ;;  %v2545_v57 = vadd.f32 %v7059_v15, %v2528_v40  ;;  %v7064_v40 = vld [vmem:[#allocation116_spill] sm:$0xff] }
 0x505   : > { %v1555_v53 = vadd.f32 %v1553_v19, %v1540_v22  ;;  %v2421_v38 = vadd.f32 %v5747_v18, %v2404_v46  ;;  %v2775_v10 = vadd.f32 %v7060_v16, %v2758_v1  ;;  %v1962_v52 = vsel %vm1394_vm2, %v7045_v27, %v1961_v35  ;;  %v7062_v19 = vld [vmem:[#allocation160_spill] sm:$0xff]  ;;  %v7065_v1 = vld [vmem:[#allocation122_spill] sm:$0xff]  ;;  %v7067_v35 = vld [vmem:[#allocation177_spill] sm:$0xff] }
 0x506   : > { %v1473_v29 = vsel %vm1392_vm1, %v1471_v39, %v1472_v32  ;;  %v1606_v22 = vrot.slane %v7062_v19, 4  ;;  %v7063_v32 = vld [vmem:[#allocation115_spill] sm:$0xff]  ;;  %v1993_v5 = vrot.slane %v7064_v40, 4  ;;  %v1712_v33 = vrot.slane %v7065_v1, 4  ;;  %v7066_v18 = vld [vmem:[#allocation124_spill] sm:$0xff] }
 0x507   : > { %v1570_v8 = vadd.f32 %v1568_v62, %v1555_v53  ;;  %v1475_v11 = vsel %vm1474_vm7, %v1468_v28, %v1473_v29  ;;  %v5807_v54 = vpop.permute.xlu1 %2429  ;;  %v1602_v42 = vpop.permute.xlu0 %1601  ;;  %v1976_v39 = vrot.slane %v7063_v32, 4  ;;  %v1729_v27 = vrot.slane %v7066_v18, 4  ;;  %v7068_v62 = vld [vmem:[#allocation165_spill] sm:$0xff] }
 0x508   : > { %7061 = vst [vmem:[#allocation154_spill] sm:$0xff] %v5807_v54  ;;  %v1477_v12 = vadd.f32 %v1475_v11, %v1461_v20  ;;  %v2438_v46 = vadd.f32 %v5807_v54, %v2421_v38  ;;  %v1605_v23 = vrot.slane %v1602_v42, 4  ;;  %v2600_v28 = vadd.f32 %v7068_v62, %v7067_v35  ;;  %v7070_v20 = vld [vmem:[#allocation109_spill] sm:$0xff]  ;;  %v7071_v54 = vld [vmem:[#allocation111_spill] sm:$0xff] }
 0x509   : > { %v2792_v24 = vadd.f32 %v7071_v54, %v2775_v10  ;;  %v5828_v35 = vadd.f32 %v7073_v14, %v2954_v34  ;;  %v7078_v10 = vrot.slane %v4873_v63, 4 }
 0x50a   : > { %v5817_v53 = vadd.f32 %v1570_v8, %v1477_v12  ;;  %v2549_v29 = vadd.f32 %v2545_v57, %v2438_v46  ;;  %v1607_v19 = vsel %vm1392_vm1, %v1605_v23, %v1606_v22  ;;  %v7074_v12 = vld [vmem:[#allocation169_spill] sm:$0xff]  ;;  %v7075_v8 = vld [vmem:[#allocation81_spill] sm:$0xff]  ;;  %v7076_v46 = vrot.slane %v4861_v31, 4 }
 0x50b   : > { %v1608_v16 = vsel %vm1394_vm2, %v1602_v42, %v1607_v19  ;;  %v5824_v15 = vpop.permute.xlu1 %2659  ;;  %v1619_v30 = vpop.permute.xlu0 %1618  ;;  %v2617_v57 = vadd.f32 %v7074_v12, %v2600_v28  ;;  %v1965_v22 = vadd.f32 %v1962_v52, %v7075_v8  ;;  %v7077_v19 = vld [vmem:[#allocation162_spill] sm:$0xff]  ;;  %v1995_v34 = vsel %vm1392_vm1, %v1993_v5, %v7078_v10 }
 0x50c   : > { %7069 = vst [vmem:[#allocation108_spill] sm:$0xff] %v5817_v53  ;;  %7072 = vst [vmem:[#allocation110_spill] sm:$0xff] %v5824_v15  ;;  %v1611_v23 = vadd.f32 %v1608_v16, %v5648_v4  ;;  %2568 = vrot.lane.b32.xlu1 %v2549_v29, %s3673_s18  ;;  %v1978_v42 = vsel %vm1392_vm1, %v1976_v39, %v7076_v46  ;;  %v1623_v25 = vrot.slane %v7077_v19, 4  ;;  %v1622_v11 = vrot.slane %v1619_v30, 4  ;;  %v7081_v31 = vld [vmem:[#allocation126_spill] sm:$0xff]  ;;  %v7082_v39 = vld [vmem:[#allocation128_spill] sm:$0xff] }
 0x50d   : > { %v7079_v28 = vrot.slane %v4916_v51, 4  ;;  %v7080_v16 = vrot.slane %v4925_v43, 4  ;;  %v2634_v52 = vadd.f32 %v5641_v2, %v2617_v57  ;;  %v1746_v8 = vrot.slane %v7081_v31, 4  ;;  %v7083_v19 = vld [vmem:[#allocation164_spill] sm:$0xff] }
 0x50e   : > { %v1763_v46 = vrot.slane %v7082_v39, 4  ;;  %v1640_v38 = vrot.slane %v7083_v19, 4  ;;  %v1624_v63 = vsel %vm1392_vm1, %v1622_v11, %v1623_v25  ;;  %v1979_v57 = vsel %vm1410_vm3, %v7063_v32, %v1978_v42 }
 0x50f   : > { %v1714_v4 = vsel %vm1392_vm1, %v1712_v33, %v7079_v28  ;;  %v1731_v29 = vsel %vm1392_vm1, %v1729_v27, %v7080_v16  ;;  %v5852_v53 = vpop.permute.xlu1 %2889  ;;  %v1636_v5 = vpop.permute.xlu0 %1635  ;;  %v2651_v51 = vadd.f32 %v5772_v44, %v2634_v52  ;;  %v1625_v33 = vsel %vm1410_vm3, %v1619_v30, %v1624_v63  ;;  %v7085_v28 = vld [vmem:[#allocation117_spill] sm:$0xff] }
 0x510   : > { %7084 = vst [vmem:[#allocation114_spill] sm:$0xff] %v5852_v53  ;;  %v2898_v43 = vadd.f32 %v5852_v53, %v2881_v56  ;;  %v1639_v27 = vrot.slane %v1636_v5, 4  ;;  %v1996_v10 = vsel %vm1426_vm4, %v7064_v40, %v1995_v34  ;;  %v2010_v16 = vrot.slane %v7085_v28, 4  ;;  %v7088_v34 = vld [vmem:[#allocation130_spill] sm:$0xff] }
 0x511   : > { %v1628_v19 = vadd.f32 %v1625_v33, %v1611_v23  ;;  %v1715_v25 = vsel %vm1394_vm2, %v7065_v1, %v1714_v4  ;;  %v1732_v11 = vsel %vm1410_vm3, %v7066_v18, %v1731_v29  ;;  %v2668_v30 = vadd.f32 %v5824_v15, %v2651_v51  ;;  %v7090_v18 = vld [vmem:[#allocation166_spill] sm:$0xff] }
 0x512   : > { %v1641_v56 = vsel %vm1392_vm1, %v1639_v27, %v1640_v38  ;;  %v7086_v52 = vrot.slane %v4933_v0, 4  ;;  %v7087_v42 = vrot.slane %v4941_v17, 4  ;;  %v1780_v23 = vrot.slane %v7088_v34, 4  ;;  %v7092_v17 = vld [vmem:[#allocation119_spill] sm:$0xff] }
 0x513   : > { %v1642_v63 = vsel %vm1426_vm4, %v1636_v5, %v1641_v56  ;;  %v5876_v1 = vpop.permute.xlu1 %2676  ;;  %v1653_v4 = vpop.permute.xlu0 %1652  ;;  %v1657_v29 = vrot.slane %v7090_v18, 4  ;;  %v7091_v0 = vrot.slane %v4885_v48, 4  ;;  %v2027_v27 = vrot.slane %v7092_v17, 4  ;;  %v7095_v5 = vld [vmem:[#allocation123_spill] sm:$0xff] }
 0x514   : > { %v1748_v32 = vsel %vm1392_vm1, %v1746_v8, %v7086_v52  ;;  %v1765_v40 = vsel %vm1392_vm1, %v1763_v46, %v7087_v42  ;;  %7089 = vst [vmem:[#allocation176_spill] sm:$0xff] %v5876_v1  ;;  %v1645_v51 = vadd.f32 %v1642_v63, %v1628_v19  ;;  %v2685_v38 = vadd.f32 %v5876_v1, %v2668_v30  ;;  %v7093_v46 = vld [vmem:[#allocation174_spill] sm:$0xff]  ;;  %v7094_v42 = vld [vmem:[#allocation132_spill] sm:$0xff] }
 0x515   : > { %v1656_v33 = vrot.slane %v1653_v4, 4  ;;  %v2012_v8 = vsel %vm1392_vm1, %v2010_v16, %v7091_v0  ;;  %v1718_v52 = vadd.f32 %v1715_v25, %v7093_v46  ;;  %v1797_v53 = vrot.slane %v7094_v42, 4  ;;  %v7097_v1 = vld [vmem:[#allocation168_spill] sm:$0xff] }
 0x516   : > { %v2206_v56 = vrot.slane %v7095_v5, 4  ;;  %v1749_v15 = vsel %vm1426_vm4, %v7081_v31, %v1748_v32  ;;  %v2796_v18 = vadd.f32 %v2792_v24, %v2685_v38  ;;  %v1766_v48 = vsel %vm1442_vm5, %v7082_v39, %v1765_v40 }
 0x517   : > { %v1658_v19 = vsel %vm1392_vm1, %v1656_v33, %v1657_v29  ;;  %v1735_v30 = vadd.f32 %v1732_v11, %v1718_v52  ;;  %v7096_v16 = vrot.slane %v4953_v59, 4  ;;  %v5896_v0 = vpop.permute.xlu1 %2906  ;;  %v1670_v46 = vpop.permute.xlu0 %1669  ;;  %v1674_v44 = vrot.slane %v7097_v1, 4  ;;  %v7102_v33 = vld [vmem:[#allocation170_spill] sm:$0xff] }
 0x518   : > { %v1659_v25 = vsel %vm1442_vm5, %v1653_v4, %v1658_v19  ;;  %v5900_v24 = vadd.f32 %v5896_v0, %v2898_v43  ;;  %v1673_v31 = vrot.slane %v1670_v46, 4  ;;  %2815 = vrot.lane.b32.xlu0 %v2796_v18, %s3674_s4  ;;  %v1982_v39 = vadd.f32 %v1979_v57, %v1965_v22  ;;  %v7101_v43 = vld [vmem:[#allocation125_spill] sm:$0xff] }
 0x519   : > { %v1782_v63 = vsel %vm1392_vm1, %v1780_v23, %v7096_v16  ;;  %v1662_v2 = vadd.f32 %v1659_v25, %v1645_v51  ;;  %v7098_v59 = vrot.slane %v4897_v49, 4  ;;  %v1752_v32 = vadd.f32 %v1749_v15, %v1735_v30  ;;  %v7105_v30 = vld [vmem:[#allocation151_spill] sm:$0xff]  ;;  %v7106_v25 = vld [vmem:[#allocation152_spill] sm:$0xff] }
 0x51a   : > { %v7099_v40 = vrot.slane %v4965_v21, 4  ;;  %v7100_v1 = vrot.slane %v4918_v45, 4  ;;  %v2223_v29 = vrot.slane %v7101_v43, 4  ;;  %v1783_v51 = vsel %vm1458_vm6, %v7088_v34, %v1782_v63 }
 0x51b   : > { %v2029_v11 = vsel %vm1392_vm1, %v2027_v27, %v7098_v59  ;;  %v1675_v22 = vsel %vm1392_vm1, %v1673_v31, %v1674_v44  ;;  %v1999_v57 = vadd.f32 %v1996_v10, %v1982_v39  ;;  %v2013_v49 = vsel %vm1442_vm5, %v7085_v28, %v2012_v8  ;;  %v1849_v38 = vpop.permute.xlu1 %1848  ;;  %v7103_v44 = vld [vmem:[#allocation121_spill] sm:$0xff] }
 0x51c   : > { %v1799_v23 = vsel %vm1392_vm1, %v1797_v53, %v7099_v40  ;;  %v2208_v4 = vsel %vm1392_vm1, %v2206_v56, %v7100_v1  ;;  %v1769_v15 = vadd.f32 %v1766_v48, %v1752_v32  ;;  %v1676_v21 = vsel %vm1458_vm6, %v1670_v46, %v1675_v22  ;;  %v1687_v53 = vpop.permute.xlu0 %1686 }
 0x51d   : > { %v1800_v45 = vsel %vm1474_vm7, %v7094_v42, %v1799_v23  ;;  %v1691_v27 = vrot.slane %v7102_v33, 4  ;;  %v1852_v52 = vrot.slane %v1849_v38, 4  ;;  %v1690_v56 = vrot.slane %v1687_v53, 4  ;;  %v7107_v23 = vld [vmem:[#allocation84_spill] sm:$0xff] }
 0x51e   : > { %v2030_v34 = vsel %vm1458_vm6, %v7092_v17, %v2029_v11  ;;  %v2044_v10 = vrot.slane %v7103_v44, 4  ;;  %v2209_v28 = vsel %vm1394_vm2, %v7095_v5, %v2208_v4  ;;  %v1786_v8 = vadd.f32 %v1783_v51, %v1769_v15 }
 0x51f   : > { %v7104_v18 = vrot.slane %v4927_v26, 4  ;;  %v1853_v48 = vrot.slane %v7105_v30, 4  ;;  %v1679_v42 = vadd.f32 %v1676_v21, %v1662_v2  ;;  %v1692_v16 = vsel %vm1392_vm1, %v1690_v56, %v1691_v27  ;;  %v1866_v39 = vpop.permute.xlu1 %1865  ;;  %v7110_v27 = vld [vmem:[#allocation153_spill] sm:$0xff]  ;;  %v7111_v56 = vld [vmem:[#allocation95_spill] sm:$0xff] }
 0x520   : > { %v1803_v63 = vadd.f32 %v1800_v45, %v1786_v8  ;;  %v1870_v46 = vrot.slane %v7106_v25, 4  ;;  %v2100_v17 = vrot.slane %v5595_v13, 4  ;;  %v1693_v31 = vsel %vm1474_vm7, %v1687_v53, %v1692_v16  ;;  %v2096_v59 = vpop.permute.xlu0 %2095  ;;  %v7108_v13 = vld [vmem:[#allocation129_spill] sm:$0xff]  ;;  %v7115_v16 = vld [vmem:[#allocation94_spill] sm:$0xff] }
 0x521   : > { %v2225_v19 = vsel %vm1392_vm1, %v2223_v29, %v7104_v18  ;;  %v1854_v5 = vsel %vm1392_vm1, %v1852_v52, %v1853_v48  ;;  %v1696_v11 = vadd.f32 %v1693_v31, %v1679_v42  ;;  %v1869_v26 = vrot.slane %v1866_v39, 4  ;;  %v7114_v48 = vld [vmem:[#allocation143_spill] sm:$0xff] }
 0x522   : > { %v2099_v32 = vrot.slane %v2096_v59, 4  ;;  %v5938_v40 = vadd.f32 %v7035_v37, %v5828_v35  ;;  %v2016_v2 = vadd.f32 %v2013_v49, %v1999_v57  ;;  %v2212_v1 = vadd.f32 %v2209_v28, %v7107_v23 }
 0x523   : > { %v2226_v4 = vsel %vm1410_vm3, %v7101_v43, %v2225_v19  ;;  %v2240_v29 = vrot.slane %v7108_v13, 4  ;;  %v5944_v51 = vadd.f32 %v1803_v63, %v1696_v11  ;;  %v1871_v22 = vsel %vm1392_vm1, %v1869_v26, %v1870_v46  ;;  %v1883_v45 = vpop.permute.xlu1 %1882  ;;  %v7116_v46 = vld [vmem:[#allocation155_spill] sm:$0xff] }
 0x524   : > { %v2101_v15 = vsel %vm1392_vm1, %v2099_v32, %v2100_v17  ;;  %v5948_v21 = vadd.f32 %v2030_v34, %v2016_v2  ;;  %v7109_v53 = vrot.slane %v4906_v61, 4  ;;  %v1855_v57 = vsel %vm1394_vm2, %v1849_v38, %v1854_v5  ;;  %v2113_v43 = vpop.permute.xlu0 %2112  ;;  %v7112_v34 = vld [vmem:[#allocation135_spill] sm:$0xff] }
 0x525   : > { %v2102_v49 = vsel %vm1394_vm2, %v2096_v59, %v2101_v15  ;;  %v2229_v33 = vadd.f32 %v2226_v4, %v2212_v1  ;;  %v1887_v52 = vrot.slane %v7110_v27, 4  ;;  %v1886_v8 = vrot.slane %v1883_v45, 4  ;;  %1823 = vrot.lane.b32.xlu0 %v5944_v51, %s3670_s0  ;;  %v7117_v2 = vld [vmem:[#allocation127_spill] sm:$0xff] }
 0x526   : > { %v2046_v35 = vsel %vm1392_vm1, %v2044_v10, %v7109_v53  ;;  %v2105_v28 = vadd.f32 %v2102_v49, %v7111_v56  ;;  %v2257_v18 = vrot.slane %v7112_v34, 4  ;;  %v2117_v61 = vrot.slane %v5639_v55, 4 }
 0x527   : > { %v1872_v10 = vsel %vm1410_vm3, %v1866_v39, %v1871_v22  ;;  %v2116_v38 = vrot.slane %v2113_v43, 4  ;;  %v7113_v19 = vrot.slane %v4943_v60, 4  ;;  %v2274_v42 = vrot.slane %v7114_v48, 4  ;;  %v1900_v39 = vpop.permute.xlu1 %1899 }
 0x528   : > { %v1858_v63 = vadd.f32 %v1855_v57, %v7115_v16  ;;  %v1888_v25 = vsel %vm1392_vm1, %v1886_v8, %v1887_v52  ;;  %v1904_v17 = vrot.slane %v7116_v46, 4  ;;  %v2134_v31 = vrot.slane %v5666_v3, 4  ;;  %v2130_v5 = vpop.permute.xlu0 %2129  ;;  %v7123_v46 = vld [vmem:[#allocation159_spill] sm:$0xff] }
 0x529   : > { %v2242_v30 = vsel %vm1392_vm1, %v2240_v29, %v7113_v19  ;;  %v1889_v59 = vsel %vm1426_vm4, %v1883_v45, %v1888_v25  ;;  %v2118_v55 = vsel %vm1392_vm1, %v2116_v38, %v2117_v61  ;;  %v1903_v26 = vrot.slane %v1900_v39, 4  ;;  %v7120_v45 = vld [vmem:[#allocation157_spill] sm:$0xff] }
 0x52a   : > { %v1875_v11 = vadd.f32 %v1872_v10, %v1858_v63  ;;  %v2119_v60 = vsel %vm1410_vm3, %v2113_v43, %v2118_v55  ;;  %v2133_v32 = vrot.slane %v2130_v5, 4  ;;  %v2453_v23 = vrot.slane %v7117_v2, 4 }
 0x52b   : > { %v2243_v1 = vsel %vm1426_vm4, %v7108_v13, %v2242_v30  ;;  %v7118_v4 = vrot.slane %v4983_v47, 4  ;;  %v2122_v29 = vadd.f32 %v2119_v60, %v2105_v28  ;;  %v7119_v22 = vrot.slane %v5051_v41, 4  ;;  %v1917_v52 = vpop.permute.xlu1 %1916  ;;  %v7122_v30 = vld [vmem:[#allocation134_spill] sm:$0xff] }
 0x52c   : > { %v1892_v53 = vadd.f32 %v1889_v59, %v1875_v11  ;;  %v1905_v57 = vsel %vm1392_vm1, %v1903_v26, %v1904_v17  ;;  %v2135_v49 = vsel %vm1392_vm1, %v2133_v32, %v2134_v31  ;;  %v1921_v43 = vrot.slane %v7120_v45, 4  ;;  %v2147_v56 = vpop.permute.xlu0 %2146  ;;  %v7125_v11 = vld [vmem:[#allocation131_spill] sm:$0xff]  ;;  %v7126_v26 = vld [vmem:[#allocation133_spill] sm:$0xff] }
 0x52d   : > { %v2259_v3 = vsel %vm1392_vm1, %v2257_v18, %v7118_v4  ;;  %v2276_v15 = vsel %vm1392_vm1, %v2274_v42, %v7119_v22  ;;  %v2151_v27 = vrot.slane %v5691_v58, 4  ;;  %v1906_v13 = vsel %vm1442_vm5, %v1900_v39, %v1905_v57  ;;  %v7127_v4 = vld [vmem:[#allocation100_spill] sm:$0xff]  ;;  %v7129_v57 = vld [vmem:[#allocation161_spill] sm:$0xff] }
 0x52e   : > { %v2136_v47 = vsel %vm1426_vm4, %v2130_v5, %v2135_v49  ;;  %v1909_v28 = vadd.f32 %v1906_v13, %v1892_v53  ;;  %v1920_v41 = vrot.slane %v1917_v52, 4  ;;  %v2150_v18 = vrot.slane %v2147_v56, 4  ;;  %v7130_v13 = vld [vmem:[#allocation182_spill] sm:$0xff] }
 0x52f   : > { %v2139_v8 = vadd.f32 %v2136_v47, %v2122_v29  ;;  %v2047_v61 = vsel %vm1474_vm7, %v7103_v44, %v2046_v35  ;;  %v7121_v10 = vrot.slane %v4935_v6, 4  ;;  %v2246_v19 = vadd.f32 %v2243_v1, %v2229_v33  ;;  %v7124_v44 = vld [vmem:[#allocation181_spill] sm:$0xff]  ;;  %v1934_v31 = vpop.permute.xlu1 %1933 }
 0x530   : > { %v2291_v58 = vrot.slane %v7122_v30, 4  ;;  %v2260_v42 = vsel %vm1442_vm5, %v7112_v34, %v2259_v3  ;;  %v2277_v16 = vsel %vm1458_vm6, %v7114_v48, %v2276_v15  ;;  %v1922_v63 = vsel %vm1392_vm1, %v1920_v41, %v1921_v43  ;;  %v2164_v59 = vpop.permute.xlu0 %2163 }
 0x531   : > { %v2455_v38 = vsel %vm1392_vm1, %v2453_v23, %v7121_v10  ;;  %v2152_v25 = vsel %vm1392_vm1, %v2150_v18, %v2151_v27  ;;  %v1938_v17 = vrot.slane %v7123_v46, 4  ;;  %v2168_v35 = vrot.slane %v7124_v44, 4  ;;  %v7133_v18 = vld [vmem:[#allocation99_spill] sm:$0xff] }
 0x532   : > { %v1923_v6 = vsel %vm1458_vm6, %v1917_v52, %v1922_v63  ;;  %v2153_v33 = vsel %vm1442_vm5, %v2147_v56, %v2152_v25  ;;  %v1937_v34 = vrot.slane %v1934_v31, 4  ;;  %v2167_v5 = vrot.slane %v2164_v59, 4  ;;  %v7136_v46 = vld [vmem:[#allocation139_spill] sm:$0xff] }
 0x533   : > { %v1926_v55 = vadd.f32 %v1923_v6, %v1909_v28  ;;  %v2156_v39 = vadd.f32 %v2153_v33, %v2139_v8  ;;  %v2050_v48 = vadd.f32 %v2047_v61, %v5948_v21  ;;  %v2470_v60 = vrot.slane %v7125_v11, 4  ;;  %v2343_v43 = vpop.permute.xlu1 %2342  ;;  %v7131_v28 = vld [vmem:[#allocation98_spill] sm:$0xff] }
 0x534   : > { %v2700_v32 = vrot.slane %v7126_v26, 4  ;;  %v2263_v23 = vadd.f32 %v2260_v42, %v2246_v19  ;;  %v2456_v1 = vsel %vm1394_vm2, %v7117_v2, %v2455_v38  ;;  %v7128_v3 = vrot.slane %v7127_v4, 4  ;;  %v2181_v27 = vpop.permute.xlu0 %2180  ;;  %v7135_v19 = vld [vmem:[#allocation137_spill] sm:$0xff] }
 0x535   : > { %v1939_v22 = vsel %vm1392_vm1, %v1937_v34, %v1938_v17  ;;  %v2169_v15 = vsel %vm1392_vm1, %v2167_v5, %v2168_v35  ;;  %v2347_v49 = vrot.slane %v7129_v57, 4  ;;  %v2185_v47 = vrot.slane %v7130_v13, 4  ;;  %v7139_v4 = vld [vmem:[#allocation101_spill] sm:$0xff] }
 0x536   : > { %v2293_v29 = vsel %vm1392_vm1, %v2291_v58, %v7128_v3  ;;  %v2280_v53 = vadd.f32 %v2277_v16, %v2263_v23  ;;  %v1940_v21 = vsel %vm1474_vm7, %v1934_v31, %v1939_v22  ;;  %v2170_v45 = vsel %vm1458_vm6, %v2164_v59, %v2169_v15  ;;  %v7137_v59 = vld [vmem:[#allocation96_spill] sm:$0xff] }
 0x537   : > { %v1943_v2 = vadd.f32 %v1940_v21, %v1926_v55  ;;  %v2346_v52 = vrot.slane %v2343_v43, 4  ;;  %v2184_v56 = vrot.slane %v2181_v27, 4  ;;  %v7132_v8 = vrot.slane %v7131_v28, 4  ;;  %v2360_v33 = vpop.permute.xlu1 %2359  ;;  %v7144_v21 = vld [vmem:[#allocation147_spill] sm:$0xff] }
 0x538   : > { %v7134_v61 = vrot.slane %v7133_v18, 4  ;;  %v2294_v38 = vsel %vm1474_vm7, %v7122_v30, %v2293_v29  ;;  %v2487_v58 = vrot.slane %v7135_v19, 4  ;;  %v2173_v16 = vadd.f32 %v2170_v45, %v2156_v39  ;;  %v6034_v31 = vpop.permute.xlu0 %2410 }
 0x539   : > { %v2472_v41 = vsel %vm1392_vm1, %v2470_v60, %v7132_v8  ;;  %v6027_v42 = vadd.f32 %v2050_v48, %v1943_v2  ;;  %v2348_v63 = vsel %vm1392_vm1, %v2346_v52, %v2347_v49  ;;  %v2186_v25 = vsel %vm1392_vm1, %v2184_v56, %v2185_v47  ;;  %v7138_v60 = vld [vmem:[#allocation85_spill] sm:$0xff]  ;;  %v7143_v49 = vld [vmem:[#allocation145_spill] sm:$0xff] }
 0x53a   : > { %v2702_v10 = vsel %vm1392_vm1, %v2700_v32, %v7134_v61  ;;  %v2717_v17 = vrot.slane %v7136_v46, 4  ;;  %v2297_v44 = vadd.f32 %v2294_v38, %v2280_v53  ;;  %v2349_v35 = vsel %vm1394_vm2, %v2343_v43, %v2348_v63  ;;  %v7141_v53 = vld [vmem:[#allocation103_spill] sm:$0xff]  ;;  %v7146_v56 = vld [vmem:[#allocation113_spill] sm:$0xff]  ;;  %v7148_v61 = vld [vmem:[#allocation140_spill] sm:$0xff] }
 0x53b   : > { %v2187_v6 = vsel %vm1474_vm7, %v2181_v27, %v2186_v25  ;;  %v2364_v30 = vrot.slane %v7052_v50, 4  ;;  %v2352_v55 = vadd.f32 %v2349_v35, %v7137_v59  ;;  %v2363_v39 = vrot.slane %v2360_v33, 4  ;;  %2070 = vrot.lane.b32.xlu1 %v6027_v42, %s3671_s27  ;;  %v2590_v43 = vpop.permute.xlu1 %2589  ;;  %v7145_v27 = vld [vmem:[#allocation136_spill] sm:$0xff]  ;;  %v7149_v38 = vld [vmem:[#allocation88_spill] sm:$0xff] }
 0x53c   : > { %v2190_v34 = vadd.f32 %v2187_v6, %v2173_v16  ;;  %v2965_v5 = vrot.slane %v7073_v14, 4  ;;  %v6043_v48 = vadd.f32 %v7070_v20, %v5938_v40  ;;  %v2459_v32 = vadd.f32 %v2456_v1, %v7138_v60  ;;  %v7150_v25 = vld [vmem:[#allocation141_spill] sm:$0xff] }
 0x53d   : > { %v2473_v23 = vsel %vm1410_vm3, %v7125_v11, %v2472_v41  ;;  %v2703_v50 = vsel %vm1394_vm2, %v7126_v26, %v2702_v10  ;;  %v7140_v3 = vrot.slane %v7139_v4, 4  ;;  %v2365_v15 = vsel %vm1392_vm1, %v2363_v39, %v2364_v30  ;;  %v6062_v26 = vpop.permute.xlu0 %2640  ;;  %v7147_v41 = vld [vmem:[#allocation138_spill] sm:$0xff]  ;;  %v7155_v60 = vld [vmem:[#allocation97_spill] sm:$0xff] }
 0x53e   : > { %v6053_v22 = vadd.f32 %v2297_v44, %v2190_v34  ;;  %v7142_v57 = vrot.slane %v7141_v53, 4  ;;  %v2504_v1 = vrot.slane %v7143_v49, 4  ;;  %v2734_v45 = vrot.slane %v7144_v21, 4  ;;  %v7154_v34 = vld [vmem:[#allocation167_spill] sm:$0xff]  ;;  %v7159_v53 = vld [vmem:[#allocation142_spill] sm:$0xff] }
 0x53f   : > { %v2489_v29 = vsel %vm1392_vm1, %v2487_v58, %v7140_v3  ;;  %v2366_v11 = vsel %vm1410_vm3, %v2360_v33, %v2365_v15  ;;  %v2521_v13 = vrot.slane %v7145_v27, 4  ;;  %v2594_v47 = vrot.slane %v7068_v62, 4  ;;  %v2377_v59 = vpop.permute.xlu1 %2376 }
 0x540   : > { %v2719_v40 = vsel %vm1392_vm1, %v2717_v17, %v7142_v57  ;;  %v2369_v2 = vadd.f32 %v2366_v11, %v2352_v55  ;;  %v2593_v52 = vrot.slane %v2590_v43, 4  ;;  %2317 = vrot.lane.b32.xlu0 %v6053_v22, %s3672_s22  ;;  %v3016_v28 = vrot.slane %v7146_v56, 4 }
 0x541   : > { %v2476_v8 = vadd.f32 %v2473_v23, %v2459_v32  ;;  %v2751_v18 = vrot.slane %v7147_v41, 4  ;;  %v2981_v10 = vrot.slane %v7148_v61, 4  ;;  %v2706_v58 = vadd.f32 %v2703_v50, %v7149_v38  ;;  %v6085_v55 = vpop.permute.xlu0 %2870  ;;  %v7156_v50 = vld [vmem:[#allocation102_spill] sm:$0xff] }
 0x542   : > { %v2490_v16 = vsel %vm1426_vm4, %v7135_v19, %v2489_v29  ;;  %v2720_v62 = vsel %vm1410_vm3, %v7136_v46, %v2719_v40  ;;  %v2595_v63 = vsel %vm1392_vm1, %v2593_v52, %v2594_v47  ;;  %v2947_v17 = vrot.slane %v7150_v25, 4  ;;  %v7163_v52 = vld [vmem:[#allocation149_spill] sm:$0xff]  ;;  %v7164_v38 = vld [vmem:[#allocation146_spill] sm:$0xff] }
 0x543   : > { %v7151_v44 = vrot.slane %v7043_v9, 4  ;;  %v7152_v6 = vrot.slane %v7044_v7, 4  ;;  %v2596_v30 = vsel %vm1394_vm2, %v2590_v43, %v2595_v63  ;;  %v7153_v19 = vrot.slane %v4999_v36, 4 }
 0x544   : > { %v2381_v39 = vrot.slane %v7154_v34, 4  ;;  %v2599_v32 = vadd.f32 %v2596_v30, %v7155_v60  ;;  %v2380_v9 = vrot.slane %v2377_v59, 4  ;;  %v2493_v23 = vadd.f32 %v2490_v16, %v2476_v8 }
 0x545   : > { %v2506_v35 = vsel %vm1392_vm1, %v2504_v1, %v7151_v44  ;;  %v2736_v33 = vsel %vm1392_vm1, %v2734_v45, %v7152_v6  ;;  %v2523_v46 = vsel %vm1392_vm1, %v2521_v13, %v7153_v19  ;;  %v7157_v4 = vrot.slane %v7156_v50, 4  ;;  %v7160_v45 = vld [vmem:[#allocation105_spill] sm:$0xff]  ;;  %v7162_v13 = vld [vmem:[#allocation144_spill] sm:$0xff] }
 0x546   : > { %v2723_v3 = vadd.f32 %v2720_v62, %v2706_v58  ;;  %v7158_v29 = vrot.slane %v7035_v37, 4  ;;  %v2538_v57 = vrot.slane %v7159_v53, 4  ;;  %v2507_v36 = vsel %vm1442_vm5, %v7143_v49, %v2506_v35 }
 0x547   : > { %v2753_v7 = vsel %vm1392_vm1, %v2751_v18, %v7157_v4  ;;  %v2737_v40 = vsel %vm1426_vm4, %v7144_v21, %v2736_v33  ;;  %v2382_v1 = vsel %vm1392_vm1, %v2380_v9, %v2381_v39  ;;  %v7161_v11 = vrot.slane %v7160_v45, 4  ;;  %v2607_v18 = vpop.permute.xlu1 %2606  ;;  %v7165_v33 = vld [vmem:[#allocation106_spill] sm:$0xff]  ;;  %v7174_v45 = vld [vmem:[#allocation172_spill] sm:$0xff] }
 0x548   : > { %v2983_v15 = vsel %vm1392_vm1, %v2981_v10, %v7158_v29  ;;  %v2768_v47 = vrot.slane %v7162_v13, 4  ;;  %v2964_v37 = vrot.slane %v7163_v52, 4  ;;  %v2383_v8 = vsel %vm1426_vm4, %v2377_v59, %v2382_v1  ;;  %v6110_v10 = vpop.permute.xlu0 %2427  ;;  %v7167_v59 = vld [vmem:[#allocation107_spill] sm:$0xff] }
 0x549   : > { %v2949_v43 = vsel %vm1392_vm1, %v2947_v17, %v7161_v11  ;;  %v2998_v49 = vrot.slane %v7164_v38, 4  ;;  %v2611_v58 = vrot.slane %v7074_v12, 4  ;;  %v2386_v21 = vadd.f32 %v2383_v8, %v2369_v2 }
 0x54a   : > { %v2610_v16 = vrot.slane %v2607_v18, 4  ;;  %v2524_v62 = vsel %vm1458_vm6, %v7145_v27, %v2523_v46  ;;  %v2754_v63 = vsel %vm1442_vm5, %v7147_v41, %v2753_v7  ;;  %v2510_v17 = vadd.f32 %v2507_v36, %v2493_v23  ;;  %v7169_v41 = vld [vmem:[#allocation148_spill] sm:$0xff]  ;;  %v7171_v23 = vld [vmem:[#allocation171_spill] sm:$0xff] }
 0x54b   : > { %v2740_v44 = vadd.f32 %v2737_v40, %v2723_v3  ;;  %v6120_v35 = vsel %vm1426_vm4, %v7148_v61, %v2983_v15  ;;  %v2950_v6 = vsel %vm1394_vm2, %v7150_v25, %v2949_v43  ;;  %v7166_v30 = vrot.slane %v7165_v33, 4  ;;  %v2837_v39 = vpop.permute.xlu1 %2836  ;;  %v7172_v3 = vld [vmem:[#allocation175_spill] sm:$0xff] }
 0x54c   : > { %v2612_v2 = vsel %vm1392_vm1, %v2610_v16, %v2611_v58  ;;  %v7168_v27 = vrot.slane %v7167_v59, 4  ;;  %v2785_v46 = vrot.slane %v7169_v41, 4  ;;  %v2966_v61 = vsel %vm1392_vm1, %v2964_v37, %v2965_v5  ;;  %v6136_v25 = vpop.permute.xlu0 %2657  ;;  %v7180_v59 = vld [vmem:[#allocation180_spill] sm:$0xff] }
 0x54d   : > { %v2540_v12 = vsel %vm1392_vm1, %v2538_v57, %v7166_v30  ;;  %v2613_v34 = vsel %vm1410_vm3, %v2607_v18, %v2612_v2  ;;  %v7170_v60 = vrot.slane %v7070_v20, 4  ;;  %v2841_v50 = vrot.slane %v7171_v23, 4  ;;  %v7176_v18 = vld [vmem:[#allocation179_spill] sm:$0xff] }
 0x54e   : > { %v2770_v19 = vsel %vm1392_vm1, %v2768_v47, %v7168_v27  ;;  %v2616_v4 = vadd.f32 %v2613_v34, %v2599_v32  ;;  %v2840_v7 = vrot.slane %v2837_v39, 4  ;;  %v2953_v29 = vadd.f32 %v2950_v6, %v7172_v3 }
 0x54f   : > { %v3000_v9 = vsel %vm1392_vm1, %v2998_v49, %v7170_v60  ;;  %v2541_v14 = vsel %vm1474_vm7, %v7159_v53, %v2540_v12  ;;  %v2527_v15 = vadd.f32 %v2524_v62, %v2510_v17  ;;  %v2757_v5 = vadd.f32 %v2754_v63, %v2740_v44  ;;  %v7177_v62 = vld [vmem:[#allocation150_spill] sm:$0xff] }
 0x550   : > { %v2771_v57 = vsel %vm1458_vm6, %v7162_v13, %v2770_v19  ;;  %v2967_v36 = vsel %vm1410_vm3, %v7163_v52, %v2966_v61  ;;  %v2414_v20 = vrot.slane %v6034_v31, 4  ;;  %v2842_v40 = vsel %vm1392_vm1, %v2840_v7, %v2841_v50  ;;  %v2394_v13 = vpop.permute.xlu1 %2393  ;;  %v6162_v47 = vpop.permute.xlu0 %2887  ;;  %v7175_v52 = vld [vmem:[#allocation104_spill] sm:$0xff]  ;;  %v7178_v17 = vld [vmem:[#allocation154_spill] sm:$0xff] }
 0x551   : > { %v6153_v32 = vsel %vm1442_vm5, %v7164_v38, %v3000_v9  ;;  %v7173_v1 = vrot.slane %v7071_v54, 4  ;;  %v2398_v11 = vrot.slane %v7174_v45, 4  ;;  %v2843_v43 = vsel %vm1394_vm2, %v2837_v39, %v2842_v40  ;;  %v7179_v12 = vld [vmem:[#allocation178_spill] sm:$0xff] }
 0x552   : > { %v2415_v37 = vrot.slane %v7175_v52, 4  ;;  %v2431_v8 = vrot.slane %v6110_v10, 4  ;;  %v2846_v49 = vadd.f32 %v2843_v43, %v7176_v18  ;;  %v2397_v38 = vrot.slane %v2394_v13, 4  ;;  %v7181_v39 = vld [vmem:[#allocation118_spill] sm:$0xff] }
 0x553   : > { %v6158_v53 = vsel %vm1392_vm1, %v2785_v46, %v7173_v1  ;;  %v2544_v58 = vadd.f32 %v2541_v14, %v2527_v15  ;;  %v2774_v16 = vadd.f32 %v2771_v57, %v2757_v5  ;;  %v2970_v54 = vadd.f32 %v2967_v36, %v2953_v29  ;;  %v7182_v7 = vld [vmem:[#allocation110_spill] sm:$0xff]  ;;  %v7183_v5 = vld [vmem:[#allocation120_spill] sm:$0xff] }
 0x554   : > { %v3015_v63 = vrot.slane %v7177_v62, 4  ;;  %v2432_v44 = vrot.slane %v7178_v17, 4  ;;  %v2416_v6 = vsel %vm1392_vm1, %v2414_v20, %v2415_v37  ;;  %v2644_v33 = vrot.slane %v6062_v26, 4  ;;  %v2624_v61 = vpop.permute.xlu1 %2623  ;;  %v2675_v34 = vpop.permute.xlu0 %2674  ;;  %v7184_v1 = vld [vmem:[#allocation176_spill] sm:$0xff] }
 0x555   : > { %v2399_v30 = vsel %vm1392_vm1, %v2397_v38, %v2398_v11  ;;  %v2628_v2 = vrot.slane %v7179_v12, 4  ;;  %v2858_v27 = vrot.slane %v7180_v59, 4  ;;  %v2661_v19 = vrot.slane %v6136_v25, 4  ;;  %v7185_v38 = vld [vmem:[#allocation114_spill] sm:$0xff] }
 0x556   : > { %v2400_v46 = vsel %vm1442_vm5, %v2394_v13, %v2399_v30  ;;  %v2645_v60 = vrot.slane %v7181_v39, 4  ;;  %v2433_v9 = vsel %vm1392_vm1, %v2431_v8, %v2432_v44  ;;  %v2627_v50 = vrot.slane %v2624_v61, 4 }
 0x557   : > { %v2403_v23 = vadd.f32 %v2400_v46, %v2386_v21  ;;  %v2662_v3 = vrot.slane %v7182_v7, 4  ;;  %v2417_v29 = vsel %vm1458_vm6, %v6034_v31, %v2416_v6  ;;  %v2874_v14 = vrot.slane %v6085_v55, 4 }
 0x558   : > { %v2678_v15 = vrot.slane %v2675_v34, 4  ;;  %v2875_v57 = vrot.slane %v7183_v5, 4  ;;  %v2646_v36 = vsel %vm1392_vm1, %v2644_v33, %v2645_v60  ;;  %v2629_v40 = vsel %vm1392_vm1, %v2627_v50, %v2628_v2  ;;  %v2854_v31 = vpop.permute.xlu1 %2853  ;;  %v2905_v13 = vpop.permute.xlu0 %2904 }
 0x559   : > { %v2420_v20 = vadd.f32 %v2417_v29, %v2403_v23  ;;  %v2679_v45 = vrot.slane %v7184_v1, 4  ;;  %v2434_v21 = vsel %vm1474_vm7, %v6110_v10, %v2433_v9  ;;  %v2663_v11 = vsel %vm1392_vm1, %v2661_v19, %v2662_v3 }
 0x55a   : > { %v2630_v43 = vsel %vm1426_vm4, %v2624_v61, %v2629_v40  ;;  %v2891_v37 = vrot.slane %v6162_v47, 4  ;;  %v2857_v18 = vrot.slane %v2854_v31, 4  ;;  %v2892_v17 = vrot.slane %v7185_v38, 4 }
 0x55b   : > { %v2437_v52 = vadd.f32 %v2434_v21, %v2420_v20  ;;  %v2633_v8 = vadd.f32 %v2630_v43, %v2616_v4  ;;  %v2647_v44 = vsel %vm1442_vm5, %v6062_v26, %v2646_v36  ;;  %v2876_v6 = vsel %vm1392_vm1, %v2874_v14, %v2875_v57 }
 0x55c   : > { %v2680_v10 = vsel %vm1392_vm1, %v2678_v15, %v2679_v45  ;;  %v2859_v30 = vsel %vm1392_vm1, %v2857_v18, %v2858_v27  ;;  %v2908_v12 = vrot.slane %v2905_v13, 4  ;;  %v2987_v59 = vadd.f32 %v6120_v35, %v2970_v54  ;;  %v2924_v61 = vpop.permute.xlu1 %2923  ;;  %v2922_v26 = vpop.permute.xlu0 %2921 }
 0x55d   : > { %v2650_v33 = vadd.f32 %v2647_v44, %v2633_v8  ;;  %v2548_v2 = vadd.f32 %v2544_v58, %v2437_v52  ;;  %v2909_v19 = vrot.slane %v5896_v0, 4  ;;  %v2664_v4 = vsel %vm1458_vm6, %v6136_v25, %v2663_v11 }
 0x55e   : > { %v2860_v46 = vsel %vm1410_vm3, %v2854_v31, %v2859_v30  ;;  %v2893_v39 = vsel %vm1392_vm1, %v2891_v37, %v2892_v17  ;;  %v2926_v23 = vrot.slane %v2924_v61, 4  ;;  %v2788_v35 = vsel %vm1474_vm7, %v7169_v41, %v6158_v53 }
 0x55f   : > { %v2667_v60 = vadd.f32 %v2664_v4, %v2650_v33  ;;  %v2863_v9 = vadd.f32 %v2860_v46, %v2846_v49  ;;  %2564 = vrot.lane.b32.xlu1 %v2548_v2, %s3673_s18  ;;  %v2877_v0 = vsel %vm1426_vm4, %v6085_v55, %v2876_v6  ;;  %v2681_v25 = vsel %vm1474_vm7, %v2675_v34, %v2680_v10  ;;  %v7187_v33 = vld [vmem:[#allocation108_spill] sm:$0xff] }
 0x560   : > { %v2925_v58 = vrot.slane %v2922_v26, 4  ;;  %v2791_v54 = vadd.f32 %v2788_v35, %v2774_v16  ;;  %v2910_v7 = vsel %vm1392_vm1, %v2908_v12, %v2909_v19  ;;  %v3022_v49 = vadd.f32 %v7146_v56, %v6043_v48  ;;  %v3031_v53 = vpop.permute.xlu1 %3030  ;;  %v3029_v16 = vpop.permute.xlu0 %3028  ;;  %v7188_v12 = vld [vmem:[#allocation25_spill] sm:$0xff] }
 0x561   : > { %v2684_v27 = vadd.f32 %v2681_v25, %v2667_v60  ;;  %v2880_v50 = vadd.f32 %v2877_v0, %v2863_v9  ;;  %v3004_v3 = vadd.f32 %v6153_v32, %v2987_v59  ;;  %v3017_v41 = vsel %vm1392_vm1, %v3015_v63, %v3016_v28  ;;  %v7189_v59 = vld [vmem:[#allocation24_spill] sm:$0xff] }
 0x562   : > { %v2894_v55 = vsel %vm1442_vm5, %v6162_v47, %v2893_v39  ;;  %v2927_v14 = vsel %vm1392_vm1, %v2925_v58, %v2926_v23  ;;  %v3033_v15 = vrot.slane %v3031_v53, 4  ;;  %v2911_v48 = vsel %vm1458_vm6, %v2905_v13, %v2910_v7  ;;  %v3426_v4 = vld [vmem:[%s7186_s16 + $0x1] ss:$8 sm:$0x3] }
 0x563   : > { %v2795_v34 = vadd.f32 %v2791_v54, %v2684_v27  ;;  %v2897_v29 = vadd.f32 %v2894_v55, %v2880_v50  ;;  %v2932_v32 = vadd.f32 %v2924_v61, %v5900_v24  ;;  %v3039_v5 = vadd.f32 %v3031_v53, %v3022_v49  ;;  %v3427_v46 = vld [vmem:[%s7186_s16 + $0x2] ss:$8 sm:$0x3]  ;;  %v3428_v25 = vld [vmem:[%s7186_s16 + $0x3] ss:$8 sm:$0x3] }
 0x564   : > { %v3032_v56 = vrot.slane %v3029_v16, 4  ;;  %v3018_v57 = vsel %vm1458_vm6, %v7177_v62, %v3017_v41  ;;  %v2928_v63 = vsel %vm1474_vm7, %v2922_v26, %v2927_v14  ;;  %v2069_v40 = vcombine.high %v6027_v42, %v6027_v42  ;;  %v1828_v13 = vpop.permute.xlu0 %1827  ;;  %v2075_v8 = vpop.permute.xlu1 %2074  ;;  %v3429_v26 = vld [vmem:[%s7186_s16 + $0x4] ss:$8 sm:$0x3] }
 0x565   : > { %v2914_v28 = vadd.f32 %v2911_v48, %v2897_v29  ;;  %2811 = vrot.lane.b32.xlu0 %v2795_v34, %s3674_s4  ;;  %v3021_v47 = vadd.f32 %v3018_v57, %v3004_v3  ;;  %v3043_v36 = vadd.f32 %v3039_v5, %v2932_v32  ;;  %v2563_v62 = vcombine.high %v2548_v2, %v2548_v2  ;;  %v3430_v7 = vld [vmem:[%s7186_s16 + $0x5] ss:$8 sm:$0x3]  ;;  %v3431_v57 = vld [vmem:[%s7186_s16 + $0x6] ss:$8 sm:$0x3] }
 0x566   : > { %v3034_v20 = vsel %vm1392_vm1, %v3032_v56, %v3033_v15  ;;  %v1822_v11 = vcombine.high %v5944_v51, %v5944_v51  ;;  %v2316_v42 = vcombine.high %v6053_v22, %v6053_v22  ;;  %v2810_v31 = vcombine.high %v2795_v34, %v2795_v34  ;;  %v1571_v22 = vld [vmem:[%s7186_s16] ss:$8 sm:$0x3] }
 0x567   : > { %v2931_v1 = vadd.f32 %v2928_v63, %v2914_v28  ;;  %v3035_v24 = vsel %vm1474_vm7, %v3029_v16, %v3034_v20  ;;  %v1585_v30 = vcombine.high %v7187_v33, %v7187_v33  ;;  %v1577_v2 = vrot.slane %v1571_v22, %v7188_v12 }
 0x568   : > { %v3038_v45 = vadd.f32 %v3035_v24, %v3021_v47  ;;  %v1581_v19 = vrot.slane %v1571_v22, %v7189_v59  ;;  %v1813_v39 = vrot.slane %v3426_v4, %v7188_v12  ;;  %v1817_v60 = vrot.slane %v3426_v4, %v7189_v59 }
 0x569   : > { %2072 = vrot.lane.b32.xlu0 %v2069_v40, %s3671_s27  ;;  %v2060_v9 = vrot.slane %v3427_v46, %v7188_v12  ;;  %v2064_v23 = vrot.slane %v3427_v46, %v7189_v59  ;;  %v1587_v35 = vmul.f32 %v1577_v2, %v7187_v33  ;;  %v2554_v58 = vrot.slane %v3429_v26, %v7188_v12  ;;  %s7219_s27 = sld [smem:[#allocation20_spill]] }
 0x56a   : > { %v3042_v21 = vadd.f32 %v3038_v45, %v2931_v1  ;;  %v1588_v0 = vmul.f32 %v1585_v30, %v1581_v19  ;;  %v2558_v54 = vrot.slane %v3429_v26, %v7189_v59  ;;  %v2307_v34 = vrot.slane %v3428_v25, %v7188_v12 }
 0x56b   : > { %v2311_v29 = vrot.slane %v3428_v25, %v7189_v59  ;;  %v2801_v14 = vrot.slane %v3430_v7, %v7188_v12  ;;  %v2805_v15 = vrot.slane %v3430_v7, %v7189_v59  ;;  %v3073_v2 = vstv %s440_s3 }
 0x56c   : > { %3058 = vrot.lane.b32.xlu1 %v3042_v21, %s3675_s1  ;;  %v3057_v43 = vcombine.high %v3042_v21, %v3042_v21  ;;  %v3676_v25 = vmov 1966171168  }
 0x56d   : > { %2566 = vrot.lane.b32.xlu0 %v2563_v62, %s3673_s18  ;;  %v3048_v62 = vrot.slane %v3431_v57, %v7188_v12  ;;  %s3588_s18 = scalar_lea.vmem %s6357_s10, 3072 }
 0x56e   : > { %v2322_v52 = vpop.permute.xlu0 %2321  ;;  %p3589_p12 = scmp.ne.s32.totalorder %s6357_s10, %s3588_s18 }
 0x56f   : > { %p7220_p0 = scmp.ne.s32.totalorder %s7219_s27, 0 }
 0x570   : > { %1825 = vrot.lane.b32.xlu1 %v1822_v11, %s3670_s0  ;;  %s6347_s0 = scalar_lea.hbm %s7214_s23, %s3443_s12 }
 0x571   : > { %3060 = vrot.lane.b32.xlu0 %v3057_v43, %s3675_s1  ;;  %p3590_p2 = pnand %p3589_p12, %p7220_p0 }
 0x573   : > { %p3591_p7 = pneg %p3590_p2 }
 0x574   : > { %2319 = vrot.lane.b32.xlu1 %v2316_v42, %s3672_s22  ;;  %s3217_s22 = scalar_lea.sflag [#allocation6], %s7192_s11 }
 0x578   : > { %2813 = vrot.lane.b32.xlu1 %v2810_v31, %s3674_s4  ;;  %s3677_s4 = smov [#allocation9]  }
 0x57c   : > { %3062 = vrot.lane.b32.xlu1 %v3043_v36, %s3675_s1  ;;  %s3592_s1 = sshll.u32 %s3677_s4, 4  ;;  %s3593_s1 = int_to_ptr.vmem [resolvable:$false] %s3592_s1 }
 0x57d   : > { %s3594_s24 = scalar_lea.vmem %s3593_s1, 6144  ;;  %p3595_p8 = scmp.lt.s32.totalorder %s6357_s10, %s3593_s1 }
 0x57e   : > { %v2569_v51 = vpop.permute.xlu1 %2568  ;;  %p3596_p9 = scmp.lt.s32.totalorder %s3594_s24, %s3588_s18 }
 0x580   : > { %p3597_p10 = por %p3596_p9, %p3595_p8 }
 0x582   : > { %p3598_p1 = pnand %p3597_p10, %p3591_p7 }
 0x58a   : > { %v6241_v37 = vpop.permute.xlu0 %2815 }
 0x597   : > { %v1824_v18 = vpop.permute.xlu0 %1823 }
 0x5ad   : > { %v2071_v17 = vpop.permute.xlu1 %2070 }
 0x5b2   : > { %v2318_v38 = vpop.permute.xlu0 %2317 }
 0x5d1   : > { %v2565_v6 = vpop.permute.xlu1 %2564 }
 0x5d7   : > { %v6243_v44 = vpop.permute.xlu0 %2811 }
 0x5db   : > { %v2073_v10 = vpop.permute.xlu0 %2072 }
 0x5dc   : > { %v2077_v49 = vsel %vm2076_vm8, %v2071_v17, %v2073_v10  ;;  %v2078_v3 = vsel %vm2076_vm8, %v2073_v10, %v2075_v8 }
 0x5dd   : > { %v2081_v48 = vmul.f32 %v2077_v49, %v2060_v9  ;;  %v2082_v32 = vmul.f32 %v2078_v3, %v2064_v23 }
 0x5de   : > { %v3059_v61 = vpop.permute.xlu1 %3058 }
 0x5df   : > { %v2567_v27 = vpop.permute.xlu0 %2566 }
 0x5e0   : > { %v2571_v47 = vsel %vm2570_vm10, %v2565_v6, %v2567_v27  ;;  %v2572_v63 = vsel %vm2570_vm10, %v2567_v27, %v2569_v51  ;;  %v3052_v51 = vrot.slane %v3431_v57, %v7189_v59 }
 0x5e1   : > { %v2575_v11 = vmul.f32 %v2571_v47, %v2554_v58  ;;  %v2576_v43 = vmul.f32 %v2572_v63, %v2558_v54  ;;  %v3116_v58 = vunpack.c.l.s4 %v3676_v25  ;;  %v7195_v63 = vld [vmem:[#allocation26_spill] sm:$0xff] }
 0x5e2   : > { %v1826_v50 = vpop.permute.xlu1 %1825 }
 0x5e3   : > { %v1830_v41 = vsel %vm1829_vm9, %v1824_v18, %v1826_v50  ;;  %v1831_v55 = vsel %vm1829_vm9, %v1826_v50, %v1828_v13  ;;  %v3061_v40 = vpop.permute.xlu0 %3060  ;;  %v3117_v54 = vunpack.c.0.s8 %v3116_v58  ;;  %v7190_v50 = vld [vmem:[#allocation23_spill] sm:$0xff]  ;;  %v7218_v58 = vld [vmem:[#allocation49_spill] sm:$0xff] }
 0x5e4   : > { %v1834_v53 = vmul.f32 %v1830_v41, %v1813_v39  ;;  %v1835_v16 = vmul.f32 %v1831_v55, %v1817_v60  ;;  %v3065_v8 = vsel %vm3064_vm12, %v3059_v61, %v3061_v40 }
 0x5e5   : > { %v3069_v10 = vmul.f32 %v3065_v8, %v3048_v62  ;;  %v3120_v7 = vsub.s32 %v3117_v54, %v7190_v50  ;;  %v7199_v62 = vld [vmem:[#allocation32_spill] sm:$0xff]  ;;  %v7203_v8 = vld [vmem:[#allocation34_spill] sm:$0xff] }
 0x5e6   : > { %v1836_v5 = vadd.f32 %v1834_v53, %v1587_v35  ;;  %v1837_v56 = vadd.f32 %v1835_v16, %v1588_v0  ;;  %v2320_v28 = vpop.permute.xlu1 %2319 }
 0x5e7   : > { %v2324_v36 = vsel %vm2323_vm11, %v2318_v38, %v2320_v28  ;;  %v2325_v20 = vsel %vm2323_vm11, %v2320_v28, %v2322_v52  ;;  %v7194_v28 = vld [vmem:[#allocation29_spill] sm:$0xff] }
 0x5e8   : > { %v2083_v1 = vadd.f32 %v2081_v48, %v1836_v5  ;;  %v2084_v24 = vadd.f32 %v2082_v32, %v1837_v56  ;;  %v2328_v45 = vmul.f32 %v2324_v36, %v2307_v34  ;;  %v2329_v21 = vmul.f32 %v2325_v20, %v2311_v29  ;;  %v7193_v56 = vld [vmem:[#allocation28_spill] sm:$0xff]  ;;  %v7196_v20 = vld [vmem:[#allocation27_spill] sm:$0xff] }
 0x5ea   : > { %v2330_v42 = vadd.f32 %v2328_v45, %v2083_v1  ;;  %v2331_v31 = vadd.f32 %v2329_v21, %v2084_v24  ;;  %v2814_v13 = vpop.permute.xlu1 %2813  ;;  %v7197_v1 = vld [vmem:[#allocation30_spill] sm:$0xff]  ;;  %v7198_v45 = vld [vmem:[#allocation31_spill] sm:$0xff] }
 0x5eb   : > { %v2818_v18 = vsel %vm2817_vm13, %v6243_v44, %v2814_v13  ;;  %v2819_v52 = vsel %vm2817_vm13, %v2814_v13, %v6241_v37 }
 0x5ec   : > { %v2577_v38 = vadd.f32 %v2575_v11, %v2330_v42  ;;  %v2578_v17 = vadd.f32 %v2576_v43, %v2331_v31  ;;  %v2822_v6 = vmul.f32 %v2818_v18, %v2801_v14  ;;  %v2823_v22 = vmul.f32 %v2819_v52, %v2805_v15  ;;  %v7200_v43 = vld [vmem:[#allocation33_spill] sm:$0xff]  ;;  %v7204_v52 = vld [vmem:[#allocation35_spill] sm:$0xff] }
 0x5ee   : > { %v2824_v33 = vadd.f32 %v2822_v6, %v2577_v38  ;;  %v3063_v30 = vpop.permute.xlu1 %3062  ;;  %v2825_v4 = vadd.f32 %v2823_v22, %v2578_v17  ;;  %v7206_v38 = vld [vmem:[#allocation38_spill] sm:$0xff]  ;;  %v7207_v6 = vld [vmem:[#allocation39_spill] sm:$0xff] }
 0x5ef   : > { %v3066_v19 = vsel %vm3064_vm12, %v3061_v40, %v3063_v30  ;;  %v7209_v30 = vld [vmem:[#allocation41_spill] sm:$0xff] }
 0x5f0   : > { %v3071_v46 = vadd.f32 %v3069_v10, %v2824_v33  ;;  %v3070_v61 = vmul.f32 %v3066_v19, %v3052_v51  ;;  %v7208_v10 = vld [vmem:[#allocation40_spill] sm:$0xff] }
 0x5f1   : > { %v7210_v19 = vld [vmem:[#allocation44_spill] sm:$0xff] }
 0x5f2   : > { %v3072_v26 = vadd.f32 %v3070_v61, %v2825_v4  ;;  %v3074_v44 = vadd.f32 %v3073_v2, %v3071_v46  ;;  %v7211_v46 = vld [vmem:[#allocation45_spill] sm:$0xff] }
 0x5f4   : > { %v3075_v39 = vadd.f32 %v3073_v2, %v3072_v26  ;;  %v3432_v60 = vmul.f32 -1.442695, %v3074_v44  ;;  %v7212_v26 = vld [vmem:[#allocation42_spill] sm:$0xff] }
 0x5f6   : > { %3534 = vpow2.f32 %v3432_v60  ;;  %v3433_v37 = vmul.f32 -1.442695, %v3075_v39  ;;  %v7213_v39 = vld [vmem:[#allocation43_spill] sm:$0xff] }
 0x5f8   : > { %3536 = vpow2.f32 %v3433_v37  ;;  %v7215_v37 = vld [vmem:[#allocation46_spill] sm:$0xff] }
 0x603   : > { %v3535_v9 = vpop.eup %3534 }
 0x604   : > { %v3082_v23 = vadd.f32 1.0, %v3535_v9 }
 0x605   : > { %v3537_v35 = vpop.eup %3536 }
 0x606   : > { %v3083_v0 = vadd.f32 1.0, %v3537_v35  ;;  %3538 = vrcp.f32 %v3082_v23  ;;  %v7216_v23 = vld [vmem:[#allocation47_spill] sm:$0xff] }
 0x608   : > { %3540 = vrcp.f32 %v3083_v0  ;;  %v7217_v0 = vld [vmem:[#allocation48_spill] sm:$0xff] }
 0x613   : > { %v3539_v27 = vpop.eup %3538 }
 0x615   : > { %v3541_v49 = vpop.eup %3540 }
 0x616   : > { %v3114_v3 = vcombine.low %v3539_v27, %v3541_v49 }
 0x618   : > { %v3121_v41 = vrot.slane %v3114_v3, %v3120_v7 }
 0x61a   : > { %v3122_v55 = vcombine.high %v3121_v41, %v3121_v41  ;;  %v3129_v53 = vrot.slane %v3121_v41, %v3120_v7 }
 0x61c   : > { %v3136_v16 = vrot.slane %v3122_v55, %v3120_v7  ;;  %v3137_v34 = vcombine.high %v3129_v53, %v3129_v53  ;;  %v3141_v29 = vrot.slane %v3129_v53, %v7188_v12  ;;  %v3145_v14 = vrot.slane %v3129_v53, %v7189_v59 }
 0x61e   : > { %v3149_v15 = vrot.slane %v3136_v16, %v7188_v12  ;;  %v3153_v48 = vrot.slane %v3136_v16, %v7189_v59  ;;  %v3157_v32 = vrot.slane %v3137_v34, %v7188_v12  ;;  %v3161_v5 = vrot.slane %v3137_v34, %v7189_v59  ;;  %v7201_v12 = vld [vmem:[#allocation36_spill] sm:$0xff]  ;;  %v7202_v59 = vld [vmem:[#allocation37_spill] sm:$0xff] }
 0x61f   : > { %v3168_v57 = vmul.f32 %v3141_v29, %v7193_v56  ;;  %v3169_v47 = vmul.f32 %v3145_v14, %v7194_v28  ;;  %v3170_v36 = vmul.f32 %v3141_v29, %v7195_v63  ;;  %v3171_v40 = vmul.f32 %v3145_v14, %v7196_v20 }
 0x620   : > { %v3172_v24 = vmul.f32 %v3141_v29, %v7197_v1  ;;  %v3173_v21 = vmul.f32 %v3145_v14, %v7198_v45  ;;  %v3174_v11 = vmul.f32 %v3141_v29, %v7199_v62  ;;  %v3175_v42 = vmul.f32 %v3145_v14, %v7200_v43 }
 0x621   : > { %v3176_v31 = vmul.f32 %v3149_v15, %v7201_v12  ;;  %v3177_v13 = vmul.f32 %v3153_v48, %v7202_v59  ;;  %v3178_v18 = vmul.f32 %v3149_v15, %v7203_v8  ;;  %v3179_v51 = vmul.f32 %v3153_v48, %v7204_v52  ;;  %3192 = vst [vmem:[%s6319_s2] sm:$0xff] %v3168_v57 }
 0x622   : > { %3193 = vst [vmem:[%s6319_s2 + $0x8] sm:$0xff] %v3169_v47  ;;  %3194 = vst [vmem:[%s6319_s2 + $0x10] sm:$0xff] %v3170_v36  ;;  %v3180_v17 = vmul.f32 %v3149_v15, %v7206_v38  ;;  %v3181_v22 = vmul.f32 %v3153_v48, %v7207_v6  ;;  %v3182_v33 = vmul.f32 %v3149_v15, %v7208_v10 }
 0x623   : > { %3195 = vst [vmem:[%s6319_s2 + $0x18] sm:$0xff] %v3171_v40  ;;  %v3183_v2 = vmul.f32 %v3153_v48, %v7209_v30  ;;  %3196 = vst [vmem:[%s6319_s2 + $0x20] sm:$0xff] %v3172_v24  ;;  %v3184_v4 = vmul.f32 %v3157_v32, %v7210_v19  ;;  %v3185_v61 = vmul.f32 %v3161_v5, %v7211_v46 }
 0x624   : > { %3197 = vst [vmem:[%s6319_s2 + $0x28] sm:$0xff] %v3173_v21  ;;  %3198 = vst [vmem:[%s6319_s2 + $0x30] sm:$0xff] %v3174_v11  ;;  %v3186_v44 = vmul.f32 %v3157_v32, %v7212_v26  ;;  %v3187_v60 = vmul.f32 %v3161_v5, %v7213_v39  ;;  %v3188_v9 = vmul.f32 %v3157_v32, %v7215_v37 }
 0x625   : > { %3199 = vst [vmem:[%s6319_s2 + $0x38] sm:$0xff] %v3175_v42  ;;  %3200 = vst [vmem:[%s6319_s2 + $0x40] sm:$0xff] %v3176_v31  ;;  %v3189_v35 = vmul.f32 %v3161_v5, %v7216_v23  ;;  %v3190_v25 = vmul.f32 %v3157_v32, %v7217_v0  ;;  %v3191_v54 = vmul.f32 %v3161_v5, %v7218_v58 }
 0x626   : > { %3201 = vst [vmem:[%s6319_s2 + $0x48] sm:$0xff] %v3177_v13  ;;  %3202 = vst [vmem:[%s6319_s2 + $0x50] sm:$0xff] %v3178_v18 }
 0x627   : > { %3203 = vst [vmem:[%s6319_s2 + $0x58] sm:$0xff] %v3179_v51  ;;  %3204 = vst [vmem:[%s6319_s2 + $0x60] sm:$0xff] %v3180_v17 }
 0x628   : > { %3205 = vst [vmem:[%s6319_s2 + $0x68] sm:$0xff] %v3181_v22  ;;  %3206 = vst [vmem:[%s6319_s2 + $0x70] sm:$0xff] %v3182_v33 }
 0x629   : > { %3207 = vst [vmem:[%s6319_s2 + $0x78] sm:$0xff] %v3183_v2  ;;  %3208 = vst [vmem:[%s6319_s2 + $0x80] sm:$0xff] %v3184_v4 }
 0x62a   : > { %3209 = vst [vmem:[%s6319_s2 + $0x88] sm:$0xff] %v3185_v61  ;;  %3210 = vst [vmem:[%s6319_s2 + $0x90] sm:$0xff] %v3186_v44 }
 0x62b   : > { %3211 = vst [vmem:[%s6319_s2 + $0x98] sm:$0xff] %v3187_v60  ;;  %3212 = vst [vmem:[%s6319_s2 + $0xa0] sm:$0xff] %v3188_v9 }
 0x62c   : > { %3213 = vst [vmem:[%s6319_s2 + $0xa8] sm:$0xff] %v3189_v35  ;;  %3214 = vst [vmem:[%s6319_s2 + $0xb0] sm:$0xff] %v3190_v25 }
 0x62d   : > { %3215 = vst [vmem:[%s6319_s2 + $0xb8] sm:$0xff] %v3191_v54 }
 0x62e   : > { %3601 = shalt.err (!%p3598_p1)
}
 0x62f   : > { %s3602_s17 = scalar_lea.hbm %s6347_s0, 3072  ;;  %s3606_s14 = scalar_lea.hbm %s7214_s23, 6144 }
 0x630   : > { %p3603_p4 = scmp.ne.s32.totalorder %s6347_s0, %s3602_s17  ;;  %p3607_p6 = scmp.lt.s32.totalorder %s6347_s0, %s7214_s23 }
 0x631   : > { %p3608_p13 = scmp.lt.s32.totalorder %s3606_s14, %s3602_s17 }
 0x632   : > { %p3604_p11 = pnand %p3603_p4, %p7220_p0 }
 0x633   : > { %p3609_p3 = por %p3608_p13, %p3607_p6 }
 0x634   : > { %p3605_p5 = pneg %p3604_p11 }
 0x636   : > { %p3610_p12 = pnand %p3609_p3, %p3605_p5 }
 0x638   : > { %3613 = shalt.err (!%p3610_p12)
}
 0x639   : > { %s3678_s30 = smov 256   ;;  %s3679_s8 = smov 16  }
 0x63a   : > { %3452 = dma.vmem_to_hbm [thread:$0]  (%p7220_p0), %s6357_s10, 3072, %s6347_s0, %s3217_s22, %s3678_s30, %s3678_s30, %s3679_s8  }
 0x63b PF: > { %s7221_s28 = sld [smem:[#allocation13_spill]] }
 0x63c   : > { %s7222_s13 = sld [smem:[#allocation21_spill]] }
 0x63d   : > { %s7223_s15 = sld [smem:[#allocation16_spill]] }
 0x641   : > { %s3246_s5 = sand.u32 1, %s7221_s28  }
 0x642   : > { %p7224_p2 = scmp.ne.s32.totalorder %s7222_s13, 0  ;;  %s3247_s26 = scalar_lea.sflag [#allocation6], %s3246_s5 }
 0x643   : > { %p7225_p7 = scmp.ge.s32.totalorder %s7223_s15, 2 }
 0x645   : > { %p3463_p8 = pnand %p7225_p7, %p7224_p2 }
 0x647   : > { %p3464_p9 = pneg %p3463_p8 }
 0x649   : > { %3639 = dma.done.wait (%p3464_p9), %s3247_s26, 3072  }
 0x64a   : > { %3641 = vsyncadd (%p3464_p9), %s3247_s26, 4294964224  ;;  %s7226_s10 = sld [smem:[#allocation18_spill]] }
 0x64b   : > { %s7227_s29 = sld [smem:[#allocation14_spill]] }
 0x64c   : > { %s7228_s30 = sld [smem:[#allocation15_spill]] }
 0x64d   : > { %s7229_s9 = sld [smem:[#allocation19_spill]] }
 0x650   : > { %p23_p10 = scmp.ge.s32.totalorder %s7226_s10, 4  }
 0x652   :  { %25 = sbr.rel (!%p23_p10) target bundleno = 16 (0x10), region = 109 }
 0x657   :  { %3252 = vsyncpa [#allocation5], 1 }
 0x658   :  { %3254 = vsyncpa [#allocation5 + $0x1], 1 }
 0x659   :  { %3255 = vsyncpa [#allocation6], 1 }
 0x65a   :  { %3257 = vsyncpa [#allocation6 + $0x1], 1 }
 0x65b   :  { %3258 = vsyncpa [#allocation7], 1 }
 0x65c   :  { %3260 = vsyncpa [#allocation7 + $0x1], 1 }

</bundles_post_ra>
